<compile_context>
chip_gen: v6e
topology: v6e:2x2x1
jax: 0.10.0
libtpu: 0.0.40
codegen_flags: <defaults>
</compile_context>

<pallas_src>
import functools

import numpy as np
import jax
import jax.numpy as jnp
from jax.experimental import pallas as pl
from jax.experimental.pallas import tpu as pltpu

BN_EPS = 1e-5
LANE = 128


def _round_up(x, m):
    return ((x + m - 1) // m) * m


def _pick_tile_h(H, W):
    """Largest multiple-of-8 divisor of H whose flat tile (tile_h*W) is <= 1024 rows."""
    cands = [t for t in range(8, H + 1, 8) if H % t == 0]
    if not cands:
        return H
    good = [t for t in cands if t * W <= 1024]
    return max(good) if good else min(cands)


# ---------------- Pallas kernels ----------------

def _fused_cbr2_kernel(xp_ref, w1_ref, s1_ref, b1_ref, w2_ref, s2_ref, b2_ref,
                       y2_ref, sum_ref, band_ref, *, tile_h, width, height):
    """Fused CBR1 (with +-1-row halo) -> CBR2 for one row band.

    xp_ref  : (1, H+4, W+2, Cin) bf16  input, rows padded by 2, cols padded by 1
    w1_ref  : (9, Cin, Cp) bf16 ; w2_ref : (9, Cp, Cp) bf16   per-tap conv weights
    s*/b*   : (1, Cp) f32              folded BatchNorm scale / bias
    y2_ref  : (1, tile_h*W, Cp) bf16   CBR2 output tile
    sum_ref : (1, 1, 1, Cp) f32        per-tile channel sums (feeds SE global mean)
    band_ref: (tile_h+2, W+2, Cp) bf16 VMEM scratch = zero-padded y1 band
    """
    cin = xp_ref.shape[-1]
    cp = w1_ref.shape[-1]
    th2 = tile_h + 2
    h0 = pl.multiple_of(pl.program_id(1) * tile_h, tile_h)

    # ---- CBR1 over rows [h0-1, h0+tile_h+1) : 9 shifted-slice matmuls ----
    acc1 = jnp.zeros((th2 * width, cp), jnp.float32)
    for t in range(9):                               # static unroll over the 9 taps
        dy, dx = divmod(t, 3)
        xs = xp_ref[0, pl.ds(h0 + dy, th2), pl.ds(dx, width), :]   # (th2, W, Cin)
        acc1 = acc1 + jnp.dot(xs.reshape(th2 * width, cin), w1_ref[t],
                              preferred_element_type=jnp.float32)
    y1 = jnp.maximum(acc1 * s1_ref[...] + b1_ref[...], 0.0)        # (th2*W, Cp) f32
    y1 = y1.reshape(th2, width, cp)

    # halo rows outside the image must be exactly zero (they are conv2's padding,
    # NOT relu(b1)); mask with a row iota.
    rows = jax.lax.broadcasted_iota(jnp.int32, (th2, width, 1), 0) + (h0 - 1)
    y1 = jnp.where((rows >= 0) & (rows < height), y1, 0.0)

    # stash the zero-padded y1 band in VMEM (cols 0 and W+1 stay zero)
    band_ref[...] = jnp.zeros(band_ref.shape, band_ref.dtype)
    band_ref[:, pl.ds(1, width), :] = y1.astype(band_ref.dtype)

    # ---- CBR2 on the interior rows : 9 shifted-slice matmuls over the band ----
    acc2 = jnp.zeros((tile_h * width, cp), jnp.float32)
    for t in range(9):
        dy, dx = divmod(t, 3)
        ys = band_ref[pl.ds(dy, tile_h), pl.ds(dx, width), :]       # (tile_h, W, Cp)
        acc2 = acc2 + jnp.dot(ys.reshape(tile_h * width, cp), w2_ref[t],
                              preferred_element_type=jnp.float32)
    y2 = jnp.maximum(acc2 * s2_ref[...] + b2_ref[...], 0.0)

    y2_ref[0] = y2.astype(y2_ref.dtype)
    # per-(batch, row-tile) channel partial sums feeding the SE global average pool
    sum_ref[0, 0] = jnp.sum(y2, axis=0, keepdims=True)


def _se_gate_kernel(sums_ref, wl1_ref, wl2_ref, gate_ref, *, inv_hw):
    # sums: (N, HT, 1, Cp) partial channel sums -> global mean -> MLP -> sigmoid gate
    m = jnp.sum(sums_ref[...], axis=(1, 2)) * inv_hw                       # (N, Cp) f32
    h = jnp.dot(m.astype(jnp.bfloat16), wl1_ref[...],
                preferred_element_type=jnp.float32)
    h = jnp.maximum(h, 0.0)
    g = jnp.dot(h.astype(jnp.bfloat16), wl2_ref[...],
                preferred_element_type=jnp.float32)
    gate_ref[...] = jax.nn.sigmoid(g)                                      # (N, Cp)


def _gate_mul_kernel(y_ref, g_ref, o_ref):
    # y: (1, tile_h*W, Cp) bf16 ; g: (1, 1, Cp) f32 ; o: (1, tile_h*W, Cp) f32
    o_ref[0] = (y_ref[0].astype(jnp.float32) * g_ref[0]).astype(o_ref.dtype)


# ---------------- forward pass ----------------

@functools.partial(jax.jit, static_argnames=("tile_h",))
def conv_block_forward(x_nchw, params, *, tile_h=None):
    N, Cin, H, W = x_nchw.shape
    Cout = params["w1"].shape[-1]
    Chid = params["wl1"].shape[-1]
    Cp = _round_up(Cout, LANE)
    Chp = _round_up(Chid, LANE)
    HW = H * W
    if tile_h is None:
        tile_h = _pick_tile_h(H, W)
    assert H % tile_h == 0 and tile_h % 8 == 0
    ht = H // tile_h
    bf16 = jnp.bfloat16

    # ---- lane-dense (pad-to-128) bf16 weights, f32 folded-BN scale/bias ----
    w1 = jnp.pad(params["w1"], ((0, 0), (0, 0), (0, 0), (0, Cp - Cout))
                 ).astype(bf16).reshape(9, Cin, Cp)
    w2 = jnp.pad(params["w2"], ((0, 0), (0, 0), (0, Cp - Cout), (0, Cp - Cout))
                 ).astype(bf16).reshape(9, Cp, Cp)
    wl1 = jnp.pad(params["wl1"], ((0, Cp - Cout), (0, Chp - Chid))).astype(bf16)
    wl2 = jnp.pad(params["wl2"], ((0, Chp - Chid), (0, Cp - Cout))).astype(bf16)

    def padc(v):  # (Cout,) f32 -> (1, Cp) f32; padded channels get zero scale/bias
        return jnp.pad(v, (0, Cp - Cout)).reshape(1, Cp).astype(jnp.float32)

    s1, b1 = padc(params["s1"]), padc(params["b1"])
    s2, b2 = padc(params["s2"]), padc(params["b2"])

    # ---- input: NCHW -> NHWC bf16, rows padded by 2 (CBR1 halo), cols by 1 ----
    x = jnp.transpose(x_nchw, (0, 2, 3, 1)).astype(bf16)
    xp = jnp.pad(x, ((0, 0), (2, 2), (1, 1), (0, 0)))

    psem = pltpu.CompilerParams(dimension_semantics=("parallel", "parallel"))

    # ---- stage 1: fused CBR1 -> CBR2 (+ per-tile channel sums), y1 stays in VMEM ----
    kfused = functools.partial(_fused_cbr2_kernel, tile_h=tile_h, width=W, height=H)
    y2, part_sums = pl.pallas_call(
        kfused,
        out_shape=(jax.ShapeDtypeStruct((N, HW, Cp), bf16),
                   jax.ShapeDtypeStruct((N, ht, 1, Cp), jnp.float32)),
        grid=(N, ht),
        in_specs=[
            pl.BlockSpec((1, H + 4, W + 2, Cin), lambda n, h: (n, 0, 0, 0)),
            pl.BlockSpec((9, Cin, Cp), lambda n, h: (0, 0, 0)),
            pl.BlockSpec((1, Cp), lambda n, h: (0, 0)),
            pl.BlockSpec((1, Cp), lambda n, h: (0, 0)),
            pl.BlockSpec((9, Cp, Cp), lambda n, h: (0, 0, 0)),
            pl.BlockSpec((1, Cp), lambda n, h: (0, 0)),
            pl.BlockSpec((1, Cp), lambda n, h: (0, 0)),
        ],
        out_specs=(pl.BlockSpec((1, tile_h * W, Cp), lambda n, h: (n, h, 0)),
                   pl.BlockSpec((1, 1, 1, Cp), lambda n, h: (n, h, 0, 0))),
        scratch_shapes=[pltpu.VMEM((tile_h + 2, W + 2, Cp), bf16)],
        compiler_params=psem,
    )(xp, w1, s1, b1, w2, s2, b2)

    # ---- stage 2: tiny SE MLP (global mean -> FC -> ReLU -> FC -> sigmoid) ----
    kse = functools.partial(_se_gate_kernel, inv_hw=1.0 / float(HW))
    gate = pl.pallas_call(
        kse,
        out_shape=jax.ShapeDtypeStruct((N, Cp), jnp.float32),
        grid=(1,),
        in_specs=[
            pl.BlockSpec((N, ht, 1, Cp), lambda i: (0, 0, 0, 0)),
            pl.BlockSpec((Cp, Chp), lambda i: (0, 0)),
            pl.BlockSpec((Chp, Cp), lambda i: (0, 0)),
        ],
        out_specs=pl.BlockSpec((N, Cp), lambda i: (0, 0)),
        compiler_params=pltpu.CompilerParams(dimension_semantics=("arbitrary",)),
    )(part_sums, wl1, wl2)

    # ---- stage 3: channel gating (lane-dense elementwise multiply) ----
    gate3 = gate.reshape(N, 1, Cp)
    out_flat = pl.pallas_call(
        _gate_mul_kernel,
        out_shape=jax.ShapeDtypeStruct((N, HW, Cp), jnp.float32),
        grid=(N, ht),
        in_specs=[
            pl.BlockSpec((1, tile_h * W, Cp), lambda n, h: (n, h, 0)),
            pl.BlockSpec((1, 1, Cp), lambda n, h: (n, 0, 0)),
        ],
        out_specs=pl.BlockSpec((1, tile_h * W, Cp), lambda n, h: (n, h, 0)),
        compiler_params=psem,
    )(y2, gate3)

    # drop channel padding, back to NCHW
    out = out_flat[:, :, :Cout].reshape(N, H, W, Cout)
    return jnp.transpose(out, (0, 3, 1, 2))


# ---------------- parameter init (matches Conv_block shapes) ----------------

def init_params(key, Cin, Cout):
    assert Cout % 8 == 0, "SE bottleneck uses Cout // 8 hidden units"
    Chid = Cout // 8
    k = jax.random.split(key, 4)
    w1 = jax.random.normal(k[0], (3, 3, Cin, Cout), jnp.float32) * np.sqrt(2.0 / (9 * Cin))
    w2 = jax.random.normal(k[1], (3, 3, Cout, Cout), jnp.float32) * np.sqrt(2.0 / (9 * Cout))
    wl1 = jax.random.normal(k[2], (Cout, Chid), jnp.float32) * np.sqrt(2.0 / Cout)   # Linear(C, C//8).weight.T
    wl2 = jax.random.normal(k[3], (Chid, Cout), jnp.float32) * np.sqrt(2.0 / Chid)   # Linear(C//8, C).weight.T
    # inference-mode BatchNorm folded: gamma=1, beta=0, running_mean=0, running_var=1
    scale = jnp.full((Cout,), 1.0 / np.sqrt(1.0 + BN_EPS), jnp.float32)
    bias = jnp.zeros((Cout,), jnp.float32)
    return dict(w1=w1, w2=w2, wl1=wl1, wl2=wl2, s1=scale, b1=bias, s2=scale, b2=bias)


# ---------------- pure-JAX f32 reference ----------------

def ref_forward(x_nchw, params):
    x = jnp.transpose(x_nchw, (0, 2, 3, 1)).astype(jnp.float32)   # NHWC

    def cbr(xin, w, s, b):
        y = jax.lax.conv_general_dilated(
            xin, w, (1, 1), [(1, 1), (1, 1)],
            dimension_numbers=("NHWC", "HWIO", "NHWC"))
        return jnp.maximum(y * s + b, 0.0)

    y1 = cbr(x, params["w1"], params["s1"], params["b1"])
    y2 = cbr(y1, params["w2"], params["s2"], params["b2"])
    se = jnp.mean(y2, axis=(1, 2))
    se = jnp.maximum(se @ params["wl1"], 0.0)
    se = jax.nn.sigmoid(se @ params["wl2"])
    out = y2 * se[:, None, None, :]
    return jnp.transpose(out, (0, 3, 1, 2))


if __name__ == "__main__":
    key = jax.random.PRNGKey(0)
    kx, kp = jax.random.split(key)
    N, Cin, H, W = 2, 4, 16, 16
    Cout = 8
    x = jax.random.normal(kx, (N, Cin, H, W), jnp.float32)
    params = init_params(kp, Cin, Cout)

    # tile_h=8 -> 2 spatial tiles per image: exercises the halo rows of the fused
    # CBR1->CBR2 band as well as the cross-tile SE partial-sum path.
    out = jax.block_until_ready(conv_block_forward(x, params, tile_h=8))
    ref = jax.block_until_ready(ref_forward(x, params))

    assert out.shape == (N, Cout, H, W)
    np.testing.assert_allclose(np.asarray(out), np.asarray(ref), atol=5e-2, rtol=5e-2)
    print("KERNEL_OK")
</pallas_src>

<mosaic_0001>
module attributes {stable_mosaic.version = 11 : i64} {
  func.func @_fused_cbr2_kernel(%arg0: i32, %arg1: i32, %arg2: memref<1x20x18x4xbf16, #tpu.memory_space<vmem>>, %arg3: memref<9x4x128xbf16, #tpu.memory_space<vmem>>, %arg4: memref<1x128xf32, #tpu.memory_space<vmem>>, %arg5: memref<1x128xf32, #tpu.memory_space<vmem>>, %arg6: memref<9x128x128xbf16, #tpu.memory_space<vmem>>, %arg7: memref<1x128xf32, #tpu.memory_space<vmem>>, %arg8: memref<1x128xf32, #tpu.memory_space<vmem>>, %arg9: memref<1x128x128xbf16, #tpu.memory_space<vmem>>, %arg10: memref<1x1x1x128xf32, #tpu.memory_space<vmem>>, %arg11: memref<10x18x128xbf16, #tpu.memory_space<vmem>>) attributes {dimension_semantics = [#tpu.dimension_semantics<parallel>, #tpu.dimension_semantics<parallel>], iteration_bounds = array<i64: 2, 2>, scalar_prefetch = 0 : i64, scratch_operands = 1 : i64, tpu.core_type = #tpu.core_type<tc>, window_params = [{transform_indices = @transform_0, window_bounds = array<i64: 1, 20, 18, 4>}, {pipeline_mode = #tpu.pipeline_mode<synchronous>, transform_indices = @transform_1, window_bounds = array<i64: 9, 4, 128>}, {pipeline_mode = #tpu.pipeline_mode<synchronous>, transform_indices = @transform_2, window_bounds = array<i64: 1, 128>}, {pipeline_mode = #tpu.pipeline_mode<synchronous>, transform_indices = @transform_3, window_bounds = array<i64: 1, 128>}, {pipeline_mode = #tpu.pipeline_mode<synchronous>, transform_indices = @transform_4, window_bounds = array<i64: 9, 128, 128>}, {pipeline_mode = #tpu.pipeline_mode<synchronous>, transform_indices = @transform_5, window_bounds = array<i64: 1, 128>}, {pipeline_mode = #tpu.pipeline_mode<synchronous>, transform_indices = @transform_6, window_bounds = array<i64: 1, 128>}, {transform_indices = @transform_7, window_bounds = array<i64: 1, 128, 128>}, {transform_indices = @transform_8, window_bounds = array<i64: 1, 1, 1, 128>}]} {
    %c8_i32 = arith.constant 8 : i32
    %0 = arith.muli %arg1, %c8_i32 : i32
    %1 = tpu.assume_multiple %0, 8 : i32
    %cst = arith.constant 0.000000e+00 : f32
    %2 = vector.broadcast %cst : f32 to vector<160x128xf32>
    %c0_i32 = arith.constant 0 : i32
    %3 = arith.addi %1, %c0_i32 : i32
    %c0 = arith.constant 0 : index
    %4 = arith.index_cast %3 : i32 to index
    %c0_0 = arith.constant 0 : index
    %c0_1 = arith.constant 0 : index
    %5 = vector.load %arg2[%c0, %4, %c0_0, %c0_1] : memref<1x20x18x4xbf16, #tpu.memory_space<vmem>>, vector<1x10x16x4xbf16>
    %6 = vector.shape_cast %5 : vector<1x10x16x4xbf16> to vector<10x16x4xbf16>
    %7 = vector.shape_cast %6 : vector<10x16x4xbf16> to vector<160x4xbf16>
    %c0_2 = arith.constant 0 : index
    %c0_3 = arith.constant 0 : index
    %c0_4 = arith.constant 0 : index
    %8 = vector.load %arg3[%c0_2, %c0_3, %c0_4] : memref<9x4x128xbf16, #tpu.memory_space<vmem>>, vector<1x4x128xbf16>
    %9 = vector.shape_cast %8 : vector<1x4x128xbf16> to vector<4x128xbf16>
    %cst_5 = arith.constant dense<0.000000e+00> : vector<160x128xf32>
    %10 = tpu.matmul %7, %9, %cst_5 {dimension_numbers = #tpu.dot_dimension_numbers<[1], [0], [0], [1], [0, 0, 1, 1], [], []>} : vector<160x4xbf16>, vector<4x128xbf16>, vector<160x128xf32> -> vector<160x128xf32>
    %11 = arith.addf %2, %10 : vector<160x128xf32>
    %c0_i32_6 = arith.constant 0 : i32
    %12 = arith.addi %1, %c0_i32_6 : i32
    %c0_7 = arith.constant 0 : index
    %13 = arith.index_cast %12 : i32 to index
    %c1 = arith.constant 1 : index
    %c0_8 = arith.constant 0 : index
    %14 = vector.load %arg2[%c0_7, %13, %c1, %c0_8] : memref<1x20x18x4xbf16, #tpu.memory_space<vmem>>, vector<1x10x16x4xbf16>
    %15 = vector.shape_cast %14 : vector<1x10x16x4xbf16> to vector<10x16x4xbf16>
    %16 = vector.shape_cast %15 : vector<10x16x4xbf16> to vector<160x4xbf16>
    %c1_9 = arith.constant 1 : index
    %c0_10 = arith.constant 0 : index
    %c0_11 = arith.constant 0 : index
    %17 = vector.load %arg3[%c1_9, %c0_10, %c0_11] : memref<9x4x128xbf16, #tpu.memory_space<vmem>>, vector<1x4x128xbf16>
    %18 = vector.shape_cast %17 : vector<1x4x128xbf16> to vector<4x128xbf16>
    %cst_12 = arith.constant dense<0.000000e+00> : vector<160x128xf32>
    %19 = tpu.matmul %16, %18, %cst_12 {dimension_numbers = #tpu.dot_dimension_numbers<[1], [0], [0], [1], [0, 0, 1, 1], [], []>} : vector<160x4xbf16>, vector<4x128xbf16>, vector<160x128xf32> -> vector<160x128xf32>
    %20 = arith.addf %11, %19 : vector<160x128xf32>
    %c0_i32_13 = arith.constant 0 : i32
    %21 = arith.addi %1, %c0_i32_13 : i32
    %c0_14 = arith.constant 0 : index
    %22 = arith.index_cast %21 : i32 to index
    %c2 = arith.constant 2 : index
    %c0_15 = arith.constant 0 : index
    %23 = vector.load %arg2[%c0_14, %22, %c2, %c0_15] : memref<1x20x18x4xbf16, #tpu.memory_space<vmem>>, vector<1x10x16x4xbf16>
    %24 = vector.shape_cast %23 : vector<1x10x16x4xbf16> to vector<10x16x4xbf16>
    %25 = vector.shape_cast %24 : vector<10x16x4xbf16> to vector<160x4xbf16>
    %c2_16 = arith.constant 2 : index
    %c0_17 = arith.constant 0 : index
    %c0_18 = arith.constant 0 : index
    %26 = vector.load %arg3[%c2_16, %c0_17, %c0_18] : memref<9x4x128xbf16, #tpu.memory_space<vmem>>, vector<1x4x128xbf16>
    %27 = vector.shape_cast %26 : vector<1x4x128xbf16> to vector<4x128xbf16>
    %cst_19 = arith.constant dense<0.000000e+00> : vector<160x128xf32>
    %28 = tpu.matmul %25, %27, %cst_19 {dimension_numbers = #tpu.dot_dimension_numbers<[1], [0], [0], [1], [0, 0, 1, 1], [], []>} : vector<160x4xbf16>, vector<4x128xbf16>, vector<160x128xf32> -> vector<160x128xf32>
    %29 = arith.addf %20, %28 : vector<160x128xf32>
    %c1_i32 = arith.constant 1 : i32
    %30 = arith.addi %1, %c1_i32 : i32
    %c0_20 = arith.constant 0 : index
    %31 = arith.index_cast %30 : i32 to index
    %c0_21 = arith.constant 0 : index
    %c0_22 = arith.constant 0 : index
    %32 = vector.load %arg2[%c0_20, %31, %c0_21, %c0_22] : memref<1x20x18x4xbf16, #tpu.memory_space<vmem>>, vector<1x10x16x4xbf16>
    %33 = vector.shape_cast %32 : vector<1x10x16x4xbf16> to vector<10x16x4xbf16>
    %34 = vector.shape_cast %33 : vector<10x16x4xbf16> to vector<160x4xbf16>
    %c3 = arith.constant 3 : index
    %c0_23 = arith.constant 0 : index
    %c0_24 = arith.constant 0 : index
    %35 = vector.load %arg3[%c3, %c0_23, %c0_24] : memref<9x4x128xbf16, #tpu.memory_space<vmem>>, vector<1x4x128xbf16>
    %36 = vector.shape_cast %35 : vector<1x4x128xbf16> to vector<4x128xbf16>
    %cst_25 = arith.constant dense<0.000000e+00> : vector<160x128xf32>
    %37 = tpu.matmul %34, %36, %cst_25 {dimension_numbers = #tpu.dot_dimension_numbers<[1], [0], [0], [1], [0, 0, 1, 1], [], []>} : vector<160x4xbf16>, vector<4x128xbf16>, vector<160x128xf32> -> vector<160x128xf32>
    %38 = arith.addf %29, %37 : vector<160x128xf32>
    %c1_i32_26 = arith.constant 1 : i32
    %39 = arith.addi %1, %c1_i32_26 : i32
    %c0_27 = arith.constant 0 : index
    %40 = arith.index_cast %39 : i32 to index
    %c1_28 = arith.constant 1 : index
    %c0_29 = arith.constant 0 : index
    %41 = vector.load %arg2[%c0_27, %40, %c1_28, %c0_29] : memref<1x20x18x4xbf16, #tpu.memory_space<vmem>>, vector<1x10x16x4xbf16>
    %42 = vector.shape_cast %41 : vector<1x10x16x4xbf16> to vector<10x16x4xbf16>
    %43 = vector.shape_cast %42 : vector<10x16x4xbf16> to vector<160x4xbf16>
    %c4 = arith.constant 4 : index
    %c0_30 = arith.constant 0 : index
    %c0_31 = arith.constant 0 : index
    %44 = vector.load %arg3[%c4, %c0_30, %c0_31] : memref<9x4x128xbf16, #tpu.memory_space<vmem>>, vector<1x4x128xbf16>
    %45 = vector.shape_cast %44 : vector<1x4x128xbf16> to vector<4x128xbf16>
    %cst_32 = arith.constant dense<0.000000e+00> : vector<160x128xf32>
    %46 = tpu.matmul %43, %45, %cst_32 {dimension_numbers = #tpu.dot_dimension_numbers<[1], [0], [0], [1], [0, 0, 1, 1], [], []>} : vector<160x4xbf16>, vector<4x128xbf16>, vector<160x128xf32> -> vector<160x128xf32>
    %47 = arith.addf %38, %46 : vector<160x128xf32>
    %c1_i32_33 = arith.constant 1 : i32
    %48 = arith.addi %1, %c1_i32_33 : i32
    %c0_34 = arith.constant 0 : index
    %49 = arith.index_cast %48 : i32 to index
    %c2_35 = arith.constant 2 : index
    %c0_36 = arith.constant 0 : index
    %50 = vector.load %arg2[%c0_34, %49, %c2_35, %c0_36] : memref<1x20x18x4xbf16, #tpu.memory_space<vmem>>, vector<1x10x16x4xbf16>
    %51 = vector.shape_cast %50 : vector<1x10x16x4xbf16> to vector<10x16x4xbf16>
    %52 = vector.shape_cast %51 : vector<10x16x4xbf16> to vector<160x4xbf16>
    %c5 = arith.constant 5 : index
    %c0_37 = arith.constant 0 : index
    %c0_38 = arith.constant 0 : index
    %53 = vector.load %arg3[%c5, %c0_37, %c0_38] : memref<9x4x128xbf16, #tpu.memory_space<vmem>>, vector<1x4x128xbf16>
    %54 = vector.shape_cast %53 : vector<1x4x128xbf16> to vector<4x128xbf16>
    %cst_39 = arith.constant dense<0.000000e+00> : vector<160x128xf32>
    %55 = tpu.matmul %52, %54, %cst_39 {dimension_numbers = #tpu.dot_dimension_numbers<[1], [0], [0], [1], [0, 0, 1, 1], [], []>} : vector<160x4xbf16>, vector<4x128xbf16>, vector<160x128xf32> -> vector<160x128xf32>
    %56 = arith.addf %47, %55 : vector<160x128xf32>
    %c2_i32 = arith.constant 2 : i32
    %57 = arith.addi %1, %c2_i32 : i32
    %c0_40 = arith.constant 0 : index
    %58 = arith.index_cast %57 : i32 to index
    %c0_41 = arith.constant 0 : index
    %c0_42 = arith.constant 0 : index
    %59 = vector.load %arg2[%c0_40, %58, %c0_41, %c0_42] : memref<1x20x18x4xbf16, #tpu.memory_space<vmem>>, vector<1x10x16x4xbf16>
    %60 = vector.shape_cast %59 : vector<1x10x16x4xbf16> to vector<10x16x4xbf16>
    %61 = vector.shape_cast %60 : vector<10x16x4xbf16> to vector<160x4xbf16>
    %c6 = arith.constant 6 : index
    %c0_43 = arith.constant 0 : index
    %c0_44 = arith.constant 0 : index
    %62 = vector.load %arg3[%c6, %c0_43, %c0_44] : memref<9x4x128xbf16, #tpu.memory_space<vmem>>, vector<1x4x128xbf16>
    %63 = vector.shape_cast %62 : vector<1x4x128xbf16> to vector<4x128xbf16>
    %cst_45 = arith.constant dense<0.000000e+00> : vector<160x128xf32>
    %64 = tpu.matmul %61, %63, %cst_45 {dimension_numbers = #tpu.dot_dimension_numbers<[1], [0], [0], [1], [0, 0, 1, 1], [], []>} : vector<160x4xbf16>, vector<4x128xbf16>, vector<160x128xf32> -> vector<160x128xf32>
    %65 = arith.addf %56, %64 : vector<160x128xf32>
    %c2_i32_46 = arith.constant 2 : i32
    %66 = arith.addi %1, %c2_i32_46 : i32
    %c0_47 = arith.constant 0 : index
    %67 = arith.index_cast %66 : i32 to index
    %c1_48 = arith.constant 1 : index
    %c0_49 = arith.constant 0 : index
    %68 = vector.load %arg2[%c0_47, %67, %c1_48, %c0_49] : memref<1x20x18x4xbf16, #tpu.memory_space<vmem>>, vector<1x10x16x4xbf16>
    %69 = vector.shape_cast %68 : vector<1x10x16x4xbf16> to vector<10x16x4xbf16>
    %70 = vector.shape_cast %69 : vector<10x16x4xbf16> to vector<160x4xbf16>
    %c7 = arith.constant 7 : index
    %c0_50 = arith.constant 0 : index
    %c0_51 = arith.constant 0 : index
    %71 = vector.load %arg3[%c7, %c0_50, %c0_51] : memref<9x4x128xbf16, #tpu.memory_space<vmem>>, vector<1x4x128xbf16>
    %72 = vector.shape_cast %71 : vector<1x4x128xbf16> to vector<4x128xbf16>
    %cst_52 = arith.constant dense<0.000000e+00> : vector<160x128xf32>
    %73 = tpu.matmul %70, %72, %cst_52 {dimension_numbers = #tpu.dot_dimension_numbers<[1], [0], [0], [1], [0, 0, 1, 1], [], []>} : vector<160x4xbf16>, vector<4x128xbf16>, vector<160x128xf32> -> vector<160x128xf32>
    %74 = arith.addf %65, %73 : vector<160x128xf32>
    %c2_i32_53 = arith.constant 2 : i32
    %75 = arith.addi %1, %c2_i32_53 : i32
    %c0_54 = arith.constant 0 : index
    %76 = arith.index_cast %75 : i32 to index
    %c2_55 = arith.constant 2 : index
    %c0_56 = arith.constant 0 : index
    %77 = vector.load %arg2[%c0_54, %76, %c2_55, %c0_56] : memref<1x20x18x4xbf16, #tpu.memory_space<vmem>>, vector<1x10x16x4xbf16>
    %78 = vector.shape_cast %77 : vector<1x10x16x4xbf16> to vector<10x16x4xbf16>
    %79 = vector.shape_cast %78 : vector<10x16x4xbf16> to vector<160x4xbf16>
    %c8 = arith.constant 8 : index
    %c0_57 = arith.constant 0 : index
    %c0_58 = arith.constant 0 : index
    %80 = vector.load %arg3[%c8, %c0_57, %c0_58] : memref<9x4x128xbf16, #tpu.memory_space<vmem>>, vector<1x4x128xbf16>
    %81 = vector.shape_cast %80 : vector<1x4x128xbf16> to vector<4x128xbf16>
    %cst_59 = arith.constant dense<0.000000e+00> : vector<160x128xf32>
    %82 = tpu.matmul %79, %81, %cst_59 {dimension_numbers = #tpu.dot_dimension_numbers<[1], [0], [0], [1], [0, 0, 1, 1], [], []>} : vector<160x4xbf16>, vector<4x128xbf16>, vector<160x128xf32> -> vector<160x128xf32>
    %83 = arith.addf %74, %82 : vector<160x128xf32>
    %c0_60 = arith.constant 0 : index
    %c0_61 = arith.constant 0 : index
    %84 = vector.load %arg4[%c0_60, %c0_61] : memref<1x128xf32, #tpu.memory_space<vmem>>, vector<1x128xf32>
    %85 = vector.broadcast %84 : vector<1x128xf32> to vector<160x128xf32>
    %86 = arith.mulf %83, %85 : vector<160x128xf32>
    %c0_62 = arith.constant 0 : index
    %c0_63 = arith.constant 0 : index
    %87 = vector.load %arg5[%c0_62, %c0_63] : memref<1x128xf32, #tpu.memory_space<vmem>>, vector<1x128xf32>
    %88 = vector.broadcast %87 : vector<1x128xf32> to vector<160x128xf32>
    %89 = arith.addf %86, %88 : vector<160x128xf32>
    %cst_64 = arith.constant 0.000000e+00 : f32
    %90 = vector.broadcast %cst_64 : f32 to vector<160x128xf32>
    %91 = arith.maximumf %89, %90 : vector<160x128xf32>
    %92 = vector.shape_cast %91 : vector<160x128xf32> to vector<10x16x128xf32>
    %93 = tpu.iota {dimensions = array<i32: 0>} : vector<10x16x1xi32>
    %c1_i32_65 = arith.constant 1 : i32
    %94 = arith.subi %1, %c1_i32_65 : i32
    %95 = vector.broadcast %94 : i32 to vector<10x16x1xi32>
    %96 = arith.addi %93, %95 : vector<10x16x1xi32>
    %c0_i32_66 = arith.constant 0 : i32
    %97 = vector.broadcast %c0_i32_66 : i32 to vector<10x16x1xi32>
    %98 = arith.cmpi sge, %96, %97 : vector<10x16x1xi32>
    %c16_i32 = arith.constant 16 : i32
    %99 = vector.broadcast %c16_i32 : i32 to vector<10x16x1xi32>
    %100 = arith.cmpi slt, %96, %99 : vector<10x16x1xi32>
    %101 = arith.andi %98, %100 : vector<10x16x1xi1>
    %cst_67 = arith.constant 0.000000e+00 : f32
    %102 = vector.shape_cast %101 : vector<10x16x1xi1> to vector<10x16x1xi1>
    %103 = vector.broadcast %102 : vector<10x16x1xi1> to vector<10x16x128xi1>
    %104 = vector.broadcast %cst_67 : f32 to vector<10x16x128xf32>
    %105 = arith.select %103, %92, %104 : vector<10x16x128xi1>, vector<10x16x128xf32>
    %cst_68 = arith.constant 0.000000e+00 : bf16
    %106 = vector.broadcast %cst_68 : bf16 to vector<10x18x128xbf16>
    %c0_69 = arith.constant 0 : index
    %c0_70 = arith.constant 0 : index
    %c0_71 = arith.constant 0 : index
    %107 = vector.load %arg11[%c0_69, %c0_70, %c0_71] : memref<10x18x128xbf16, #tpu.memory_space<vmem>>, vector<10x18x128xbf16>
    tpu.vector_store %arg11[%c0_69, %c0_70, %c0_71], %106 {strides = array<i32>} : memref<10x18x128xbf16, #tpu.memory_space<vmem>>, vector<10x18x128xbf16>,
    %108 = arith.truncf %105 : vector<10x16x128xf32> to vector<10x16x128xbf16>
    %c0_72 = arith.constant 0 : index
    %c1_73 = arith.constant 1 : index
    %c0_74 = arith.constant 0 : index
    %109 = vector.load %arg11[%c0_72, %c1_73, %c0_74] : memref<10x18x128xbf16, #tpu.memory_space<vmem>>, vector<10x16x128xbf16>
    tpu.vector_store %arg11[%c0_72, %c1_73, %c0_74], %108 {strides = array<i32>} : memref<10x18x128xbf16, #tpu.memory_space<vmem>>, vector<10x16x128xbf16>,
    %cst_75 = arith.constant 0.000000e+00 : f32
    %110 = vector.broadcast %cst_75 : f32 to vector<128x128xf32>
    %c0_76 = arith.constant 0 : index
    %c0_77 = arith.constant 0 : index
    %c0_78 = arith.constant 0 : index
    %111 = vector.load %arg11[%c0_76, %c0_77, %c0_78] : memref<10x18x128xbf16, #tpu.memory_space<vmem>>, vector<8x16x128xbf16>
    %112 = vector.shape_cast %111 : vector<8x16x128xbf16> to vector<128x128xbf16>
    %c0_79 = arith.constant 0 : index
    %c0_80 = arith.constant 0 : index
    %c0_81 = arith.constant 0 : index
    %113 = vector.load %arg6[%c0_79, %c0_80, %c0_81] : memref<9x128x128xbf16, #tpu.memory_space<vmem>>, vector<1x128x128xbf16>
    %114 = vector.shape_cast %113 : vector<1x128x128xbf16> to vector<128x128xbf16>
    %cst_82 = arith.constant dense<0.000000e+00> : vector<128x128xf32>
    %115 = tpu.matmul %112, %114, %cst_82 {dimension_numbers = #tpu.dot_dimension_numbers<[1], [0], [0], [1], [0, 0, 1, 1], [], []>} : vector<128x128xbf16>, vector<128x128xbf16>, vector<128x128xf32> -> vector<128x128xf32>
    %116 = arith.addf %110, %115 : vector<128x128xf32>
    %c0_83 = arith.constant 0 : index
    %c1_84 = arith.constant 1 : index
    %c0_85 = arith.constant 0 : index
    %117 = vector.load %arg11[%c0_83, %c1_84, %c0_85] : memref<10x18x128xbf16, #tpu.memory_space<vmem>>, vector<8x16x128xbf16>
    %118 = vector.shape_cast %117 : vector<8x16x128xbf16> to vector<128x128xbf16>
    %c1_86 = arith.constant 1 : index
    %c0_87 = arith.constant 0 : index
    %c0_88 = arith.constant 0 : index
    %119 = vector.load %arg6[%c1_86, %c0_87, %c0_88] : memref<9x128x128xbf16, #tpu.memory_space<vmem>>, vector<1x128x128xbf16>
    %120 = vector.shape_cast %119 : vector<1x128x128xbf16> to vector<128x128xbf16>
    %cst_89 = arith.constant dense<0.000000e+00> : vector<128x128xf32>
    %121 = tpu.matmul %118, %120, %cst_89 {dimension_numbers = #tpu.dot_dimension_numbers<[1], [0], [0], [1], [0, 0, 1, 1], [], []>} : vector<128x128xbf16>, vector<128x128xbf16>, vector<128x128xf32> -> vector<128x128xf32>
    %122 = arith.addf %116, %121 : vector<128x128xf32>
    %c0_90 = arith.constant 0 : index
    %c2_91 = arith.constant 2 : index
    %c0_92 = arith.constant 0 : index
    %123 = vector.load %arg11[%c0_90, %c2_91, %c0_92] : memref<10x18x128xbf16, #tpu.memory_space<vmem>>, vector<8x16x128xbf16>
    %124 = vector.shape_cast %123 : vector<8x16x128xbf16> to vector<128x128xbf16>
    %c2_93 = arith.constant 2 : index
    %c0_94 = arith.constant 0 : index
    %c0_95 = arith.constant 0 : index
    %125 = vector.load %arg6[%c2_93, %c0_94, %c0_95] : memref<9x128x128xbf16, #tpu.memory_space<vmem>>, vector<1x128x128xbf16>
    %126 = vector.shape_cast %125 : vector<1x128x128xbf16> to vector<128x128xbf16>
    %cst_96 = arith.constant dense<0.000000e+00> : vector<128x128xf32>
    %127 = tpu.matmul %124, %126, %cst_96 {dimension_numbers = #tpu.dot_dimension_numbers<[1], [0], [0], [1], [0, 0, 1, 1], [], []>} : vector<128x128xbf16>, vector<128x128xbf16>, vector<128x128xf32> -> vector<128x128xf32>
    %128 = arith.addf %122, %127 : vector<128x128xf32>
    %c1_97 = arith.constant 1 : index
    %c0_98 = arith.constant 0 : index
    %c0_99 = arith.constant 0 : index
    %129 = vector.load %arg11[%c1_97, %c0_98, %c0_99] : memref<10x18x128xbf16, #tpu.memory_space<vmem>>, vector<8x16x128xbf16>
    %130 = vector.shape_cast %129 : vector<8x16x128xbf16> to vector<128x128xbf16>
    %c3_100 = arith.constant 3 : index
    %c0_101 = arith.constant 0 : index
    %c0_102 = arith.constant 0 : index
    %131 = vector.load %arg6[%c3_100, %c0_101, %c0_102] : memref<9x128x128xbf16, #tpu.memory_space<vmem>>, vector<1x128x128xbf16>
    %132 = vector.shape_cast %131 : vector<1x128x128xbf16> to vector<128x128xbf16>
    %cst_103 = arith.constant dense<0.000000e+00> : vector<128x128xf32>
    %133 = tpu.matmul %130, %132, %cst_103 {dimension_numbers = #tpu.dot_dimension_numbers<[1], [0], [0], [1], [0, 0, 1, 1], [], []>} : vector<128x128xbf16>, vector<128x128xbf16>, vector<128x128xf32> -> vector<128x128xf32>
    %134 = arith.addf %128, %133 : vector<128x128xf32>
    %c1_104 = arith.constant 1 : index
    %c1_105 = arith.constant 1 : index
    %c0_106 = arith.constant 0 : index
    %135 = vector.load %arg11[%c1_104, %c1_105, %c0_106] : memref<10x18x128xbf16, #tpu.memory_space<vmem>>, vector<8x16x128xbf16>
    %136 = vector.shape_cast %135 : vector<8x16x128xbf16> to vector<128x128xbf16>
    %c4_107 = arith.constant 4 : index
    %c0_108 = arith.constant 0 : index
    %c0_109 = arith.constant 0 : index
    %137 = vector.load %arg6[%c4_107, %c0_108, %c0_109] : memref<9x128x128xbf16, #tpu.memory_space<vmem>>, vector<1x128x128xbf16>
    %138 = vector.shape_cast %137 : vector<1x128x128xbf16> to vector<128x128xbf16>
    %cst_110 = arith.constant dense<0.000000e+00> : vector<128x128xf32>
    %139 = tpu.matmul %136, %138, %cst_110 {dimension_numbers = #tpu.dot_dimension_numbers<[1], [0], [0], [1], [0, 0, 1, 1], [], []>} : vector<128x128xbf16>, vector<128x128xbf16>, vector<128x128xf32> -> vector<128x128xf32>
    %140 = arith.addf %134, %139 : vector<128x128xf32>
    %c1_111 = arith.constant 1 : index
    %c2_112 = arith.constant 2 : index
    %c0_113 = arith.constant 0 : index
    %141 = vector.load %arg11[%c1_111, %c2_112, %c0_113] : memref<10x18x128xbf16, #tpu.memory_space<vmem>>, vector<8x16x128xbf16>
    %142 = vector.shape_cast %141 : vector<8x16x128xbf16> to vector<128x128xbf16>
    %c5_114 = arith.constant 5 : index
    %c0_115 = arith.constant 0 : index
    %c0_116 = arith.constant 0 : index
    %143 = vector.load %arg6[%c5_114, %c0_115, %c0_116] : memref<9x128x128xbf16, #tpu.memory_space<vmem>>, vector<1x128x128xbf16>
    %144 = vector.shape_cast %143 : vector<1x128x128xbf16> to vector<128x128xbf16>
    %cst_117 = arith.constant dense<0.000000e+00> : vector<128x128xf32>
    %145 = tpu.matmul %142, %144, %cst_117 {dimension_numbers = #tpu.dot_dimension_numbers<[1], [0], [0], [1], [0, 0, 1, 1], [], []>} : vector<128x128xbf16>, vector<128x128xbf16>, vector<128x128xf32> -> vector<128x128xf32>
    %146 = arith.addf %140, %145 : vector<128x128xf32>
    %c2_118 = arith.constant 2 : index
    %c0_119 = arith.constant 0 : index
    %c0_120 = arith.constant 0 : index
    %147 = vector.load %arg11[%c2_118, %c0_119, %c0_120] : memref<10x18x128xbf16, #tpu.memory_space<vmem>>, vector<8x16x128xbf16>
    %148 = vector.shape_cast %147 : vector<8x16x128xbf16> to vector<128x128xbf16>
    %c6_121 = arith.constant 6 : index
    %c0_122 = arith.constant 0 : index
    %c0_123 = arith.constant 0 : index
    %149 = vector.load %arg6[%c6_121, %c0_122, %c0_123] : memref<9x128x128xbf16, #tpu.memory_space<vmem>>, vector<1x128x128xbf16>
    %150 = vector.shape_cast %149 : vector<1x128x128xbf16> to vector<128x128xbf16>
    %cst_124 = arith.constant dense<0.000000e+00> : vector<128x128xf32>
    %151 = tpu.matmul %148, %150, %cst_124 {dimension_numbers = #tpu.dot_dimension_numbers<[1], [0], [0], [1], [0, 0, 1, 1], [], []>} : vector<128x128xbf16>, vector<128x128xbf16>, vector<128x128xf32> -> vector<128x128xf32>
    %152 = arith.addf %146, %151 : vector<128x128xf32>
    %c2_125 = arith.constant 2 : index
    %c1_126 = arith.constant 1 : index
    %c0_127 = arith.constant 0 : index
    %153 = vector.load %arg11[%c2_125, %c1_126, %c0_127] : memref<10x18x128xbf16, #tpu.memory_space<vmem>>, vector<8x16x128xbf16>
    %154 = vector.shape_cast %153 : vector<8x16x128xbf16> to vector<128x128xbf16>
    %c7_128 = arith.constant 7 : index
    %c0_129 = arith.constant 0 : index
    %c0_130 = arith.constant 0 : index
    %155 = vector.load %arg6[%c7_128, %c0_129, %c0_130] : memref<9x128x128xbf16, #tpu.memory_space<vmem>>, vector<1x128x128xbf16>
    %156 = vector.shape_cast %155 : vector<1x128x128xbf16> to vector<128x128xbf16>
    %cst_131 = arith.constant dense<0.000000e+00> : vector<128x128xf32>
    %157 = tpu.matmul %154, %156, %cst_131 {dimension_numbers = #tpu.dot_dimension_numbers<[1], [0], [0], [1], [0, 0, 1, 1], [], []>} : vector<128x128xbf16>, vector<128x128xbf16>, vector<128x128xf32> -> vector<128x128xf32>
    %158 = arith.addf %152, %157 : vector<128x128xf32>
    %c2_132 = arith.constant 2 : index
    %c2_133 = arith.constant 2 : index
    %c0_134 = arith.constant 0 : index
    %159 = vector.load %arg11[%c2_132, %c2_133, %c0_134] : memref<10x18x128xbf16, #tpu.memory_space<vmem>>, vector<8x16x128xbf16>
    %160 = vector.shape_cast %159 : vector<8x16x128xbf16> to vector<128x128xbf16>
    %c8_135 = arith.constant 8 : index
    %c0_136 = arith.constant 0 : index
    %c0_137 = arith.constant 0 : index
    %161 = vector.load %arg6[%c8_135, %c0_136, %c0_137] : memref<9x128x128xbf16, #tpu.memory_space<vmem>>, vector<1x128x128xbf16>
    %162 = vector.shape_cast %161 : vector<1x128x128xbf16> to vector<128x128xbf16>
    %cst_138 = arith.constant dense<0.000000e+00> : vector<128x128xf32>
    %163 = tpu.matmul %160, %162, %cst_138 {dimension_numbers = #tpu.dot_dimension_numbers<[1], [0], [0], [1], [0, 0, 1, 1], [], []>} : vector<128x128xbf16>, vector<128x128xbf16>, vector<128x128xf32> -> vector<128x128xf32>
    %164 = arith.addf %158, %163 : vector<128x128xf32>
    %c0_139 = arith.constant 0 : index
    %c0_140 = arith.constant 0 : index
    %165 = vector.load %arg7[%c0_139, %c0_140] : memref<1x128xf32, #tpu.memory_space<vmem>>, vector<1x128xf32>
    %166 = vector.broadcast %165 : vector<1x128xf32> to vector<128x128xf32>
    %167 = arith.mulf %164, %166 : vector<128x128xf32>
    %c0_141 = arith.constant 0 : index
    %c0_142 = arith.constant 0 : index
    %168 = vector.load %arg8[%c0_141, %c0_142] : memref<1x128xf32, #tpu.memory_space<vmem>>, vector<1x128xf32>
    %169 = vector.broadcast %168 : vector<1x128xf32> to vector<128x128xf32>
    %170 = arith.addf %167, %169 : vector<128x128xf32>
    %cst_143 = arith.constant 0.000000e+00 : f32
    %171 = vector.broadcast %cst_143 : f32 to vector<128x128xf32>
    %172 = arith.maximumf %170, %171 : vector<128x128xf32>
    %173 = arith.truncf %172 : vector<128x128xf32> to vector<128x128xbf16>
    %c0_144 = arith.constant 0 : index
    %c0_145 = arith.constant 0 : index
    %c0_146 = arith.constant 0 : index
    %174 = vector.load %arg9[%c0_144, %c0_145, %c0_146] : memref<1x128x128xbf16, #tpu.memory_space<vmem>>, vector<1x128x128xbf16>
    %175 = vector.shape_cast %174 : vector<1x128x128xbf16> to vector<128x128xbf16>
    %176 = vector.shape_cast %173 : vector<128x128xbf16> to vector<1x128x128xbf16>
    tpu.vector_store %arg9[%c0_144, %c0_145, %c0_146], %176 {strides = array<i32>} : memref<1x128x128xbf16, #tpu.memory_space<vmem>>, vector<1x128x128xbf16>,
    %cst_147 = arith.constant dense<0.000000e+00> : vector<128xf32>
    %177 = vector.multi_reduction <add>, %172, %cst_147 [0] : vector<128x128xf32> to vector<128xf32>
    %178 = vector.shape_cast %177 : vector<128xf32> to vector<1x128xf32>
    %c0_148 = arith.constant 0 : index
    %c0_149 = arith.constant 0 : index
    %c0_150 = arith.constant 0 : index
    %c0_151 = arith.constant 0 : index
    %179 = vector.load %arg10[%c0_148, %c0_149, %c0_150, %c0_151] : memref<1x1x1x128xf32, #tpu.memory_space<vmem>>, vector<1x1x1x128xf32>
    %180 = vector.shape_cast %179 : vector<1x1x1x128xf32> to vector<1x128xf32>
    %181 = vector.shape_cast %178 : vector<1x128xf32> to vector<1x1x1x128xf32>
    tpu.vector_store %arg10[%c0_148, %c0_149, %c0_150, %c0_151], %181 {strides = array<i32>} : memref<1x1x1x128xf32, #tpu.memory_space<vmem>>, vector<1x1x1x128xf32>,
    return
  }
  func.func @transform_0(%arg0: i32, %arg1: i32) -> (i32, i32, i32, i32) {
    %c0_i32 = arith.constant 0 : i32
    %c0_i32_0 = arith.constant 0 : i32
    %c0_i32_1 = arith.constant 0 : i32
    %c0_i32_2 = arith.constant 0 : i32
    return %arg0, %c0_i32, %c0_i32_0, %c0_i32_1 : i32, i32, i32, i32
  }
  func.func @transform_1(%arg0: i32, %arg1: i32) -> (i32, i32, i32) {
    %c0_i32 = arith.constant 0 : i32
    %c0_i32_0 = arith.constant 0 : i32
    %c0_i32_1 = arith.constant 0 : i32
    %c0_i32_2 = arith.constant 0 : i32
    return %c0_i32, %c0_i32_0, %c0_i32_1 : i32, i32, i32
  }
  func.func @transform_2(%arg0: i32, %arg1: i32) -> (i32, i32) {
    %c0_i32 = arith.constant 0 : i32
    %c0_i32_0 = arith.constant 0 : i32
    %c0_i32_1 = arith.constant 0 : i32
    return %c0_i32, %c0_i32_0 : i32, i32
  }
  func.func @transform_3(%arg0: i32, %arg1: i32) -> (i32, i32) {
    %c0_i32 = arith.constant 0 : i32
    %c0_i32_0 = arith.constant 0 : i32
    %c0_i32_1 = arith.constant 0 : i32
    return %c0_i32, %c0_i32_0 : i32, i32
  }
  func.func @transform_4(%arg0: i32, %arg1: i32) -> (i32, i32, i32) {
    %c0_i32 = arith.constant 0 : i32
    %c0_i32_0 = arith.constant 0 : i32
    %c0_i32_1 = arith.constant 0 : i32
    %c0_i32_2 = arith.constant 0 : i32
    return %c0_i32, %c0_i32_0, %c0_i32_1 : i32, i32, i32
  }
  func.func @transform_5(%arg0: i32, %arg1: i32) -> (i32, i32) {
    %c0_i32 = arith.constant 0 : i32
    %c0_i32_0 = arith.constant 0 : i32
    %c0_i32_1 = arith.constant 0 : i32
    return %c0_i32, %c0_i32_0 : i32, i32
  }
  func.func @transform_6(%arg0: i32, %arg1: i32) -> (i32, i32) {
    %c0_i32 = arith.constant 0 : i32
    %c0_i32_0 = arith.constant 0 : i32
    %c0_i32_1 = arith.constant 0 : i32
    return %c0_i32, %c0_i32_0 : i32, i32
  }
  func.func @transform_7(%arg0: i32, %arg1: i32) -> (i32, i32, i32) {
    %c0_i32 = arith.constant 0 : i32
    %c0_i32_0 = arith.constant 0 : i32
    return %arg0, %arg1, %c0_i32 : i32, i32, i32
  }
  func.func @transform_8(%arg0: i32, %arg1: i32) -> (i32, i32, i32, i32) {
    %c0_i32 = arith.constant 0 : i32
    %c0_i32_0 = arith.constant 0 : i32
    %c0_i32_1 = arith.constant 0 : i32
    return %arg0, %arg1, %c0_i32, %c0_i32_0 : i32, i32, i32, i32
  }
}

module attributes {stable_mosaic.version = 11 : i64} {
  func.func @_gate_mul_kernel(%arg0: i32, %arg1: i32, %arg2: memref<1x128x128xbf16, #tpu.memory_space<vmem>>, %arg3: memref<1x1x128xf32, #tpu.memory_space<vmem>>, %arg4: memref<1x128x128xf32, #tpu.memory_space<vmem>>) attributes {dimension_semantics = [#tpu.dimension_semantics<parallel>, #tpu.dimension_semantics<parallel>], iteration_bounds = array<i64: 2, 2>, scalar_prefetch = 0 : i64, scratch_operands = 0 : i64, tpu.core_type = #tpu.core_type<tc>, window_params = [{transform_indices = @transform_0, window_bounds = array<i64: 1, 128, 128>}, {transform_indices = @transform_1, window_bounds = array<i64: 1, 1, 128>}, {transform_indices = @transform_2, window_bounds = array<i64: 1, 128, 128>}]} {
    %c0 = arith.constant 0 : index
    %c0_0 = arith.constant 0 : index
    %c0_1 = arith.constant 0 : index
    %0 = vector.load %arg2[%c0, %c0_0, %c0_1] : memref<1x128x128xbf16, #tpu.memory_space<vmem>>, vector<1x128x128xbf16>
    %1 = vector.shape_cast %0 : vector<1x128x128xbf16> to vector<128x128xbf16>
    %2 = arith.extf %1 : vector<128x128xbf16> to vector<128x128xf32>
    %c0_2 = arith.constant 0 : index
    %c0_3 = arith.constant 0 : index
    %c0_4 = arith.constant 0 : index
    %3 = vector.load %arg3[%c0_2, %c0_3, %c0_4] : memref<1x1x128xf32, #tpu.memory_space<vmem>>, vector<1x1x128xf32>
    %4 = vector.shape_cast %3 : vector<1x1x128xf32> to vector<1x128xf32>
    %5 = vector.broadcast %4 : vector<1x128xf32> to vector<128x128xf32>
    %6 = arith.mulf %2, %5 : vector<128x128xf32>
    %c0_5 = arith.constant 0 : index
    %c0_6 = arith.constant 0 : index
    %c0_7 = arith.constant 0 : index
    %7 = vector.load %arg4[%c0_5, %c0_6, %c0_7] : memref<1x128x128xf32, #tpu.memory_space<vmem>>, vector<1x128x128xf32>
    %8 = vector.shape_cast %7 : vector<1x128x128xf32> to vector<128x128xf32>
    %9 = vector.shape_cast %6 : vector<128x128xf32> to vector<1x128x128xf32>
    tpu.vector_store %arg4[%c0_5, %c0_6, %c0_7], %9 {strides = array<i32>} : memref<1x128x128xf32, #tpu.memory_space<vmem>>, vector<1x128x128xf32>,
    return
  }
  func.func @transform_0(%arg0: i32, %arg1: i32) -> (i32, i32, i32) {
    %c0_i32 = arith.constant 0 : i32
    %c0_i32_0 = arith.constant 0 : i32
    return %arg0, %arg1, %c0_i32 : i32, i32, i32
  }
  func.func @transform_1(%arg0: i32, %arg1: i32) -> (i32, i32, i32) {
    %c0_i32 = arith.constant 0 : i32
    %c0_i32_0 = arith.constant 0 : i32
    %c0_i32_1 = arith.constant 0 : i32
    return %arg0, %c0_i32, %c0_i32_0 : i32, i32, i32
  }
  func.func @transform_2(%arg0: i32, %arg1: i32) -> (i32, i32, i32) {
    %c0_i32 = arith.constant 0 : i32
    %c0_i32_0 = arith.constant 0 : i32
    return %arg0, %arg1, %c0_i32 : i32, i32, i32
  }
}

module attributes {stable_mosaic.version = 11 : i64} {
  func.func @_se_gate_kernel(%arg0: i32, %arg1: memref<2x2x1x128xf32, #tpu.memory_space<vmem>>, %arg2: memref<128x128xbf16, #tpu.memory_space<vmem>>, %arg3: memref<128x128xbf16, #tpu.memory_space<vmem>>, %arg4: memref<2x128xf32, #tpu.memory_space<vmem>>) attributes {dimension_semantics = [#tpu.dimension_semantics<arbitrary>], iteration_bounds = array<i64: 1>, scalar_prefetch = 0 : i64, scratch_operands = 0 : i64, tpu.core_type = #tpu.core_type<tc>, window_params = [{pipeline_mode = #tpu.pipeline_mode<synchronous>, transform_indices = @transform_0, window_bounds = array<i64: 2, 2, 1, 128>}, {pipeline_mode = #tpu.pipeline_mode<synchronous>, transform_indices = @transform_1, window_bounds = array<i64: 128, 128>}, {pipeline_mode = #tpu.pipeline_mode<synchronous>, transform_indices = @transform_2, window_bounds = array<i64: 128, 128>}, {pipeline_mode = #tpu.pipeline_mode<synchronous>, transform_indices = @transform_3, window_bounds = array<i64: 2, 128>}]} {
    %c0 = arith.constant 0 : index
    %c0_0 = arith.constant 0 : index
    %c0_1 = arith.constant 0 : index
    %c0_2 = arith.constant 0 : index
    %0 = vector.load %arg1[%c0, %c0_0, %c0_1, %c0_2] : memref<2x2x1x128xf32, #tpu.memory_space<vmem>>, vector<2x2x1x128xf32>
    %cst = arith.constant dense<0.000000e+00> : vector<2x128xf32>
    %1 = vector.multi_reduction <add>, %0, %cst [1, 2] : vector<2x2x1x128xf32> to vector<2x128xf32>
    %cst_3 = arith.constant 3.906250e-03 : f32
    %2 = vector.broadcast %cst_3 : f32 to vector<2x128xf32>
    %3 = arith.mulf %1, %2 : vector<2x128xf32>
    %4 = arith.truncf %3 : vector<2x128xf32> to vector<2x128xbf16>
    %c0_4 = arith.constant 0 : index
    %c0_5 = arith.constant 0 : index
    %5 = vector.load %arg2[%c0_4, %c0_5] : memref<128x128xbf16, #tpu.memory_space<vmem>>, vector<128x128xbf16>
    %cst_6 = arith.constant dense<0.000000e+00> : vector<2x128xf32>
    %6 = tpu.matmul %4, %5, %cst_6 {dimension_numbers = #tpu.dot_dimension_numbers<[1], [0], [0], [1], [0, 0, 1, 1], [], []>} : vector<2x128xbf16>, vector<128x128xbf16>, vector<2x128xf32> -> vector<2x128xf32>
    %cst_7 = arith.constant 0.000000e+00 : f32
    %7 = vector.broadcast %cst_7 : f32 to vector<2x128xf32>
    %8 = arith.maximumf %6, %7 : vector<2x128xf32>
    %9 = arith.truncf %8 : vector<2x128xf32> to vector<2x128xbf16>
    %c0_8 = arith.constant 0 : index
    %c0_9 = arith.constant 0 : index
    %10 = vector.load %arg3[%c0_8, %c0_9] : memref<128x128xbf16, #tpu.memory_space<vmem>>, vector<128x128xbf16>
    %cst_10 = arith.constant dense<0.000000e+00> : vector<2x128xf32>
    %11 = tpu.matmul %9, %10, %cst_10 {dimension_numbers = #tpu.dot_dimension_numbers<[1], [0], [0], [1], [0, 0, 1, 1], [], []>} : vector<2x128xbf16>, vector<128x128xbf16>, vector<2x128xf32> -> vector<2x128xf32>
    %12 = arith.negf %11 : vector<2x128xf32>
    %13 = math.exp %12 : vector<2x128xf32>
    %cst_11 = arith.constant 1.000000e+00 : f32
    %14 = vector.broadcast %cst_11 : f32 to vector<2x128xf32>
    %15 = arith.addf %14, %13 : vector<2x128xf32>
    %16 = arith.divf %14, %15 : vector<2x128xf32>
    %c0_12 = arith.constant 0 : index
    %c0_13 = arith.constant 0 : index
    %17 = vector.load %arg4[%c0_12, %c0_13] : memref<2x128xf32, #tpu.memory_space<vmem>>, vector<2x128xf32>
    tpu.vector_store %arg4[%c0_12, %c0_13], %16 {strides = array<i32>} : memref<2x128xf32, #tpu.memory_space<vmem>>, vector<2x128xf32>,
    return
  }
  func.func @transform_0(%arg0: i32) -> (i32, i32, i32, i32) {
    %c0_i32 = arith.constant 0 : i32
    %c0_i32_0 = arith.constant 0 : i32
    %c0_i32_1 = arith.constant 0 : i32
    %c0_i32_2 = arith.constant 0 : i32
    %c0_i32_3 = arith.constant 0 : i32
    return %c0_i32, %c0_i32_0, %c0_i32_1, %c0_i32_2 : i32, i32, i32, i32
  }
  func.func @transform_1(%arg0: i32) -> (i32, i32) {
    %c0_i32 = arith.constant 0 : i32
    %c0_i32_0 = arith.constant 0 : i32
    %c0_i32_1 = arith.constant 0 : i32
    return %c0_i32, %c0_i32_0 : i32, i32
  }
  func.func @transform_2(%arg0: i32) -> (i32, i32) {
    %c0_i32 = arith.constant 0 : i32
    %c0_i32_0 = arith.constant 0 : i32
    %c0_i32_1 = arith.constant 0 : i32
    return %c0_i32, %c0_i32_0 : i32, i32
  }
  func.func @transform_3(%arg0: i32) -> (i32, i32) {
    %c0_i32 = arith.constant 0 : i32
    %c0_i32_0 = arith.constant 0 : i32
    %c0_i32_1 = arith.constant 0 : i32
    return %c0_i32, %c0_i32_0 : i32, i32
  }
}

</mosaic_0001>

<bundles_post_ra>
// kernel: conv_block_forward.5
= control target key start
LH: loop header
LB: loop body
LE: loop exit
PB: predicated region body
PF: predicated region fallthrough
CT: control target
= control target key end

     0   :  { %s515_s9 = smov 0   ;;  %s517_s10 = smov 0   ;;  %s587_s0 = inlined_call_operand.vmem [shape: bf16[2,256,128], index: 0, kind: input, shape index: {}]   ;;  %s588_s1 = inlined_call_operand.vmem [shape: f32[2,1,128], index: 1, kind: input, shape index: {}]   ;;  %s589_s2 = inlined_call_operand.vmem [shape: f32[2,256,128], index: 2, kind: output, shape index: {}]  }
   0x1   :  { %s519_s11 = smov 0   ;;  %s521_s12 = smov 0  }
   0x2   :  { %s523_s13 = smov 0  }
   0x3 LB: > { %s21_s14 = sadd.s32 1, %s490_s11  ;;  %s24_s15 = sadd.s32 1, %s494_s12  ;;  %s498_s13 = sphi %s523_s13, %s12_s13   ;;  %s494_s12 = sphi %s521_s12, %s593_s12   ;;  %s490_s11 = sphi %s519_s11, %s592_s11   ;;  %s486_s10 = sphi %s517_s10, %s591_s10   ;;  %s482_s9 = sphi %s515_s9, %s590_s9  }
   0x4   : > { %p22_p0 = scmp.ge.s32.totalorder %s21_s14, 2  ;;  %p371_p1 = scmp.ge.s32.totalorder %s498_s13, 1 }
   0x5   : > { %p141_p2 = scmp.lt.s32.totalorder %s498_s13, 5 }
   0x6   : > { %s595_s14 = smov (%p22_p0, %s21_s14), 0  ;;  %s597_s15 = smov (!%p22_p0, %s24_s15), %s494_s12 }
   0x7   : > { %p142_p3 = pnand %p371_p1, %p141_p2  ;;  %p26_p4 = scmp.ge.s32.totalorder %s597_s15, 2 }
   0x8   : > { %s372_s16 = sshll.u32 (!%p142_p3), %s482_s9, 4  ;;  %p175_p5 = scmp.lt.s32.totalorder (!%p142_p3), %s486_s10, 1 }
   0x9   : > { %s599_s15 = smov (%p26_p4, %s597_s15), 0  ;;  %145 = sbr.rel (%p142_p3) target bundleno = 32 (0x20), region = 28 }
   0xa   : > { %p177_p6 = scmp.lt.s32.totalorder (!%p142_p3), %s372_s16, 31 }
   0xe   : > { %s601_s10 = smov (!%p175_p5, %s486_s10), 1  ;;  %s603_s16 = smov (!%p177_p6, %s372_s16), 31 }
   0xf   : > { %s373_s17 = sshll.u32 %s601_s10, 5  ;;  %s186_s20 = scalar_lea.vmem %s588_s1, %s601_s10 }
  0x10   : > { %s180_s21 = sadd.s32 %s373_s17, %s603_s16  ;;  %v378_v0 = vld [vmem:[%s186_s20] ss:$0 sm:$0xff] }
  0x11   : > { %s374_s22 = sshll.u32 %s180_s21, 2  ;;  %s377_s26 = sshll.u32 %s180_s21, 3 }
  0x12   : > { %s182_s25 = scalar_lea.vmem %s587_s0, %s374_s22  ;;  %s554_s29 = scalar_lea.vmem %s589_s2, %s377_s26 }
  0x13   : > { %v382_v1 = vld [vmem:[%s182_s25] sm:$0xff]   ;;  %v413_v2 = vld [vmem:[%s182_s25 + $0x8] sm:$0xff]   ;;  %v414_v3 = vld [vmem:[%s182_s25 + $0x10] sm:$0xff]  }
  0x14   : > { %v383_v4 = vunpack.c.l.bf16 %v382_v1  ;;  %v384_v5 = vunpack.c.h.bf16 %v382_v1  ;;  %v387_v6 = vunpack.c.l.bf16 %v413_v2  ;;  %v388_v7 = vunpack.c.h.bf16 %v413_v2  ;;  %v415_v8 = vld [vmem:[%s182_s25 + $0x18] sm:$0xff]   ;;  %v416_v13 = vld [vmem:[%s182_s25 + $0x20] sm:$0xff]   ;;  %v417_v14 = vld [vmem:[%s182_s25 + $0x28] sm:$0xff]  }
  0x15   : > { %v391_v9 = vunpack.c.l.bf16 %v414_v3  ;;  %v392_v10 = vunpack.c.h.bf16 %v414_v3  ;;  %v395_v11 = vunpack.c.l.bf16 %v415_v8  ;;  %v396_v12 = vunpack.c.h.bf16 %v415_v8  ;;  %v418_v19 = vld [vmem:[%s182_s25 + $0x30] sm:$0xff]   ;;  %v419_v20 = vld [vmem:[%s182_s25 + $0x38] sm:$0xff]  }
  0x16   : > { %v236_v15 = vmul.f32 %v383_v4, %v378_v0  ;;  %v237_v16 = vmul.f32 %v384_v5, %v378_v0  ;;  %v238_v17 = vmul.f32 %v387_v6, %v378_v0  ;;  %v239_v18 = vmul.f32 %v388_v7, %v378_v0 }
  0x17   : > { %v240_v21 = vmul.f32 %v391_v9, %v378_v0  ;;  %v241_v22 = vmul.f32 %v392_v10, %v378_v0  ;;  %v242_v23 = vmul.f32 %v395_v11, %v378_v0  ;;  %v243_v24 = vmul.f32 %v396_v12, %v378_v0 }
  0x18   : > { %252 = vst [vmem:[%s554_s29] sm:$0xff] %v236_v15  ;;  %253 = vst [vmem:[%s554_s29 + $0x8] sm:$0xff] %v237_v16  ;;  %v399_v25 = vunpack.c.l.bf16 %v416_v13  ;;  %v400_v26 = vunpack.c.h.bf16 %v416_v13  ;;  %v403_v27 = vunpack.c.l.bf16 %v417_v14  ;;  %v404_v28 = vunpack.c.h.bf16 %v417_v14 }
  0x19   : > { %254 = vst [vmem:[%s554_s29 + $0x10] sm:$0xff] %v238_v17  ;;  %255 = vst [vmem:[%s554_s29 + $0x18] sm:$0xff] %v239_v18  ;;  %v407_v29 = vunpack.c.l.bf16 %v418_v19  ;;  %v408_v30 = vunpack.c.h.bf16 %v418_v19  ;;  %v411_v31 = vunpack.c.l.bf16 %v419_v20  ;;  %v412_v32 = vunpack.c.h.bf16 %v419_v20 }
  0x1a   : > { %256 = vst [vmem:[%s554_s29 + $0x20] sm:$0xff] %v240_v21  ;;  %257 = vst [vmem:[%s554_s29 + $0x28] sm:$0xff] %v241_v22  ;;  %v244_v33 = vmul.f32 %v399_v25, %v378_v0  ;;  %v245_v34 = vmul.f32 %v400_v26, %v378_v0  ;;  %v246_v35 = vmul.f32 %v403_v27, %v378_v0 }
  0x1b   : > { %258 = vst [vmem:[%s554_s29 + $0x30] sm:$0xff] %v242_v23  ;;  %259 = vst [vmem:[%s554_s29 + $0x38] sm:$0xff] %v243_v24  ;;  %v247_v36 = vmul.f32 %v404_v28, %v378_v0  ;;  %v248_v37 = vmul.f32 %v407_v29, %v378_v0  ;;  %v249_v38 = vmul.f32 %v408_v30, %v378_v0 }
  0x1c   : > { %v250_v39 = vmul.f32 %v411_v31, %v378_v0  ;;  %v251_v40 = vmul.f32 %v412_v32, %v378_v0  ;;  %260 = vst [vmem:[%s554_s29 + $0x40] sm:$0xff] %v244_v33  ;;  %261 = vst [vmem:[%s554_s29 + $0x48] sm:$0xff] %v245_v34 }
  0x1d   : > { %262 = vst [vmem:[%s554_s29 + $0x50] sm:$0xff] %v246_v35  ;;  %263 = vst [vmem:[%s554_s29 + $0x58] sm:$0xff] %v247_v36 }
  0x1e   : > { %264 = vst [vmem:[%s554_s29 + $0x60] sm:$0xff] %v248_v37  ;;  %265 = vst [vmem:[%s554_s29 + $0x68] sm:$0xff] %v249_v38 }
  0x1f   : > { %266 = vst [vmem:[%s554_s29 + $0x70] sm:$0xff] %v250_v39  ;;  %267 = vst [vmem:[%s554_s29 + $0x78] sm:$0xff] %v251_v40 }
  0x20 PF: > { %s12_s13 = sadd.s32 1, %s498_s13   ;;  %s590_s9 = smov %s490_s11 }
  0x21   : > { %p9_p7 = scmp.ge.s32.totalorder %s12_s13, 6   ;;  %s591_s10 = smov %s494_s12 }
  0x22   : > { %s592_s11 = smov %s595_s14  ;;  %s593_s12 = smov %s599_s15 }
  0x23   :  { %11 = sbr.rel (!%p9_p7) target bundleno = 3 (0x3), region = 61 }

// kernel: conv_block_forward.4
= control target key start
LH: loop header
LB: loop body
LE: loop exit
PB: predicated region body
PF: predicated region fallthrough
CT: control target
= control target key end

     0   :  { %v368_v0 = vmov 0.0   ;;  %vm369_vm0 = vmmov 0   ;;  %vm19_vm1 = vcmask 1040384   ;;  %vm62_vm2 = vcmask 1041409   ;;  %s471_s1 = inlined_call_operand.vmem [shape: bf16[128,128], index: 1, kind: input, shape index: {}]   ;;  %s472_s0 = inlined_call_operand.vmem [shape: f32[2,2,1,128], index: 0, kind: input, shape index: {}]   ;;  %s473_s2 = inlined_call_operand.vmem [shape: bf16[128,128], index: 2, kind: input, shape index: {}]   ;;  %s474_s3 = inlined_call_operand.vmem [shape: f32[2,128], index: 3, kind: output, shape index: {}]  }
   0x1   :  { %306 = vmatprep.subr.bf16.mxu0 %v368_v0  ;;  %v348_v1 = vld [vmem:[%s471_s1 + $0x38] sm:$0xff]   ;;  %322 = vmatprep.mubr.msk.bf16.mxu0 %vm369_vm0, %v368_v0  ;;  %v349_v2 = vld [vmem:[%s471_s1 + $0x30] sm:$0xff]   ;;  %v350_v3 = vld [vmem:[%s471_s1 + $0x28] sm:$0xff]  }
   0x2   :  { %326 = vmatprep.subr.bf16.mxu1 %v368_v0  ;;  %342 = vmatprep.mubr.msk.bf16.mxu1 %vm369_vm0, %v368_v0  ;;  %v351_v4 = vld [vmem:[%s471_s1 + $0x20] sm:$0xff]   ;;  %v356_v12 = vld [vmem:[%s473_s2 + $0x38] sm:$0xff]   ;;  %v357_v15 = vld [vmem:[%s473_s2 + $0x30] sm:$0xff]  }
   0x3   :  { %307 = vmatpush3.bf16.msra.mxu0 %v348_v1  ;;  %v15_v5 = vld [vmem:[%s472_s0] sm:$0x1]  ;;  %v16_v6 = vld [vmem:[%s472_s0 + $0x1] sm:$0x1]  ;;  %v17_v7 = vld [vmem:[%s472_s0 + $0x2] sm:$0x1]  ;;  %327 = vmatpush3.bf16.msra.mxu1 %v356_v12 }
   0x4   :  { %308 = vmatprep.subr.bf16.mxu0 %v368_v0  ;;  %v18_v8 = vld [vmem:[%s472_s0 + $0x3] sm:$0x1]  ;;  %v20_v9 = vsel %vm19_vm1, %v15_v5, 0.0  ;;  %v21_v10 = vsel %vm19_vm1, %v16_v6, 0.0  ;;  %v29_v11 = vsel %vm19_vm1, %v17_v7, 0.0  ;;  %328 = vmatprep.subr.bf16.mxu1 %v368_v0  ;;  %v352_v19 = vld [vmem:[%s471_s1 + $0x18] sm:$0xff]  }
   0x5   :  { %v22_v13 = vadd.f32 %v21_v10, %v20_v9  ;;  %v30_v14 = vsel %vm19_vm1, %v18_v8, 0.0  ;;  %v358_v22 = vld [vmem:[%s473_s2 + $0x28] sm:$0xff]   ;;  %v353_v25 = vld [vmem:[%s471_s1 + $0x10] sm:$0xff]   ;;  %v359_v28 = vld [vmem:[%s473_s2 + $0x20] sm:$0xff]  }
   0x6   :  { %v31_v16 = vadd.f32 %v30_v14, %v29_v11  ;;  %v354_v31 = vld [vmem:[%s471_s1 + $0x8] sm:$0xff]   ;;  %v360_v34 = vld [vmem:[%s473_s2 + $0x18] sm:$0xff]   ;;  %v355_v37 = vld [vmem:[%s471_s1] sm:$0xff]  }
   0x7   :  { %309 = vmatpush3.bf16.msra.mxu0 %v349_v2  ;;  %v23_v17 = vrot.slane %v22_v13, 4  ;;  %329 = vmatpush3.bf16.msra.mxu1 %v357_v15  ;;  %v361_v40 = vld [vmem:[%s473_s2 + $0x10] sm:$0xff]   ;;  %v362_v44 = vld [vmem:[%s473_s2 + $0x8] sm:$0xff]   ;;  %v363_v46 = vld [vmem:[%s473_s2] sm:$0xff]  }
   0x8   :  { %310 = vmatprep.subr.bf16.mxu0 %v368_v0  ;;  %v32_v18 = vrot.slane %v31_v16, 4  ;;  %330 = vmatprep.subr.bf16.mxu1 %v368_v0 }
   0x9   :  { %v24_v20 = vadd.f32 %v23_v17, %v22_v13 }
   0xa   :  { %v33_v21 = vadd.f32 %v32_v18, %v31_v16 }
   0xb   :  { %311 = vmatpush3.bf16.msra.mxu0 %v350_v3  ;;  %v25_v23 = vrot.slane %v24_v20, 2  ;;  %331 = vmatpush3.bf16.msra.mxu1 %v358_v22 }
   0xc   :  { %312 = vmatprep.subr.bf16.mxu0 %v368_v0  ;;  %v34_v24 = vrot.slane %v33_v21, 2  ;;  %332 = vmatprep.subr.bf16.mxu1 %v368_v0 }
   0xd   :  { %v26_v26 = vadd.f32 %v25_v23, %v24_v20 }
   0xe   :  { %v35_v27 = vadd.f32 %v34_v24, %v33_v21 }
   0xf   :  { %313 = vmatpush3.bf16.msra.mxu0 %v351_v4  ;;  %v27_v29 = vrot.slane %v26_v26, 1  ;;  %333 = vmatpush3.bf16.msra.mxu1 %v359_v28 }
  0x10   :  { %314 = vmatprep.subr.bf16.mxu0 %v368_v0  ;;  %v36_v30 = vrot.slane %v35_v27, 1  ;;  %334 = vmatprep.subr.bf16.mxu1 %v368_v0 }
  0x11   :  { %v28_v32 = vadd.f32 %v27_v29, %v26_v26 }
  0x12   :  { %v37_v33 = vadd.f32 %v36_v30, %v35_v27 }
  0x13   :  { %315 = vmatpush3.bf16.msra.mxu0 %v352_v19  ;;  %v38_v35 = vmul.f32 0.00390625, %v28_v32  ;;  %335 = vmatpush3.bf16.msra.mxu1 %v360_v34 }
  0x14   :  { %316 = vmatprep.subr.bf16.mxu0 %v368_v0  ;;  %v39_v36 = vmul.f32 0.00390625, %v37_v33  ;;  %336 = vmatprep.subr.bf16.mxu1 %v368_v0 }
  0x15   :  { %v40_v38 = vpack.c.bf16 %v38_v35, %v38_v35 }
  0x16   :  { %v41_v39 = vpack.c.bf16 %v39_v36, %v39_v36 }
  0x17   :  { %317 = vmatpush3.bf16.msra.mxu0 %v353_v25  ;;  %v60_v41 = vunpack.c.l.b16 %v40_v38  ;;  %337 = vmatpush3.bf16.msra.mxu1 %v361_v40 }
  0x18   :  { %318 = vmatprep.subr.bf16.mxu0 %v368_v0  ;;  %v61_v42 = vunpack.c.l.b16 %v41_v39  ;;  %338 = vmatprep.subr.bf16.mxu1 %v368_v0 }
  0x1a   :  { %v63_v43 = vsel %vm62_vm2, %v61_v42, %v60_v41 }
  0x1b   :  { %319 = vmatpush3.bf16.msra.mxu0 %v354_v31  ;;  %v64_v45 = vpack.c.b16 %v63_v43, %v63_v43  ;;  %339 = vmatpush3.bf16.msra.mxu1 %v362_v44 }
  0x1c   :  { %320 = vmatprep.subr.bf16.mxu0 %v368_v0  ;;  %340 = vmatprep.subr.bf16.mxu1 %v368_v0 }
  0x1f   :  { %321 = vmatpush3.bf16.msra.mxu0 %v355_v37  ;;  %341 = vmatpush3.bf16.msra.mxu1 %v363_v46 }
  0x22   :  { %323 = vmatmul.mubr.bf16.vlgmr.msra.gmra.mxu0 %v64_v45 }
  0xe2   :  { %v148_v47 = vpop.f32.mrf.mxu0 }
  0xe3   :  { %v154_v48 = vmax.f32 %v148_v47, 0.0 }
  0xe4   :  { %v324_v49 = vpop.f32.mrf.mxu0 }
  0xe5   :  { %v155_v50 = vpack.c.bf16 %v154_v48, %v154_v48 }
  0xe6   :  { %v151_v51 = vpop.f32.mrf.mxu0 }
  0xe7   :  { %343 = vmatmul.mubr.bf16.vlgmr.msra.gmra.mxu1 %v155_v50 }
  0xe8   :  { %v325_v52 = vpop.f32.mrf.mxu0 }
 0x1a7   :  { %v254_v53 = vpop.f32.mrf.mxu1 }
 0x1a8   :  { %v287_v54 = vmul.f32 -1.442695, %v254_v53 }
 0x1a9   :  { %v344_v55 = vpop.f32.mrf.mxu1 }
 0x1aa   :  { %364 = vpow2.f32 %v287_v54 }
 0x1ab   :  { %v257_v56 = vpop.f32.mrf.mxu1 }
 0x1ad   :  { %v345_v57 = vpop.f32.mrf.mxu1 }
 0x1b7   :  { %v365_v58 = vpop.eup %364 }
 0x1b8   :  { %v263_v59 = vadd.f32 1.0, %v365_v58 }
 0x1ba   :  { %366 = vrcp.f32 %v263_v59 }
 0x1c7   :  { %v367_v60 = vpop.eup %366 }
 0x1c8   :  { %266 = vst [vmem:[%s474_s3] sm:$0x3] %v367_v60 }

// kernel: conv_block_forward.3
= control target key start
LH: loop header
LB: loop body
LE: loop exit
PB: predicated region body
PF: predicated region fallthrough
CT: control target
= control target key end

     0   :  { %s8777_s27 = smov 0   ;;  %s8779_s28 = smov 0   ;;  %s11588_s0 = inlined_call_operand.vmem [shape: bf16[2,20,18,4], index: 0, kind: input, shape index: {}]   ;;  %s11589_s1 = inlined_call_operand.vmem [shape: bf16[9,4,128], index: 1, kind: input, shape index: {}]   ;;  %s11590_s2 = inlined_call_operand.vmem [shape: f32[1,128], index: 2, kind: input, shape index: {}]   ;;  %s11591_s3 = inlined_call_operand.vmem [shape: f32[1,128], index: 3, kind: input, shape index: {}]   ;;  %s11592_s4 = inlined_call_operand.vmem [shape: bf16[9,128,128], index: 4, kind: input, shape index: {}]   ;;  %s11593_s5 = inlined_call_operand.vmem [shape: f32[1,128], index: 5, kind: input, shape index: {}]   ;;  %s11594_s6 = inlined_call_operand.vmem [shape: f32[1,128], index: 6, kind: input, shape index: {}]   ;;  %s11595_s7 = inlined_call_operand.vmem [shape: bf16[2,256,128], index: 7, kind: output, shape index: {0}]   ;;  %s11596_s8 = inlined_call_operand.vmem [shape: f32[2,2,1,128], index: 8, kind: output, shape index: {1}]  }
   0x1   :  { %s8781_s29 = smov 0   ;;  %s8783_s30 = smov 0  }
   0x2   :  { %s8785_s9 = smov 0  }
   0x3 LB: > { %s28_s10 = sadd.s32 1, %s8721_s29  ;;  %s31_s11 = sadd.s32 1, %s8725_s30  ;;  %s8729_s9 = sphi %s8785_s9, %s19_s9   ;;  %s8725_s30 = sphi %s8783_s30, %s11748_s30   ;;  %s8721_s29 = sphi %s8781_s29, %s11747_s29   ;;  %s8717_s28 = sphi %s8779_s28, %s11746_s28   ;;  %s8713_s27 = sphi %s8777_s27, %s11745_s27  }
   0x4   : > { %p29_p0 = scmp.ge.s32.totalorder %s28_s10, 2  ;;  %p7009_p1 = scmp.ge.s32.totalorder %s8729_s9, 1 }
   0x5   : > { %p281_p2 = scmp.lt.s32.totalorder %s8729_s9, 5 }
   0x6   : > { %s11750_s10 = smov (%p29_p0, %s28_s10), 0  ;;  %s11752_s11 = smov (!%p29_p0, %s31_s11), %s8725_s30 }
   0x7   : > { %p282_p3 = pnand %p7009_p1, %p281_p2  ;;  %p33_p4 = scmp.ge.s32.totalorder %s11752_s11, 2 }
   0x9   : > { %s11754_s11 = smov (%p33_p4, %s11752_s11), 0  ;;  %285 = sbr.rel (%p282_p3) target bundleno = 881 (0x371), region = 48 }
   0xe   : > { %v7018_v0 = vld [vmem:[%s11589_s1 + $0x2] sm:$0x3]  ;;  %vm690_vm0 = vcmask 1041408   ;;  %v373_v1 = vld [vmem:[%s11589_s1] sm:$0x3]  ;;  %p326_p5 = scmp.lt.s32.totalorder %s8717_s28, 1 }
   0xf   : > { %8512 = vmatprep.subr.msk.bf16.mxu0 %vm690_vm0, %v7018_v0  ;;  %v692_v2 = vsel %vm690_vm0, %v7018_v0, 0  ;;  %8513 = vmatprep.subr.msk.bf16.mxu1 %vm690_vm0, %v373_v1  ;;  %v888_v3 = vsel %vm690_vm0, %v373_v1, 0  ;;  %v7069_v4 = vld [vmem:[%s11589_s1 + $0x4] sm:$0x3]  ;;  %s7699_s18 = smul.u32 96, %s8713_s27  ;;  %vm659_vm2 = vcmask 31744  }
  0x10   : > { %8027 = vmatpush3.bf16.msra.mxu0 %v692_v2  ;;  %8049 = vmatpush3.bf16.msra.mxu1 %v888_v3  ;;  %s11756_s28 = smov (!%p326_p5, %s8717_s28), 1  ;;  %vm384_vm1 = vsmask.f32 3328  ;;  %v7112_v5 = vld [vmem:[%s11589_s1 + $0x6] sm:$0x3]  ;;  %v8836_v7 = vsel %vm690_vm0, %v7069_v4, 0 }
  0x11   : > { %8514 = vmatprep.subr.msk.bf16.mxu0 %vm690_vm0, %v7069_v4  ;;  %v8832_v6 = vld [vmem:[%s11589_s1 + $0x8] sm:$0x3]  ;;  %s8521_s23 = smul.u32 240, %s11756_s28  ;;  %vm385_vm3 = vsmask.f32 7440  ;;  %8515 = vmatprep.subr.msk.bf16.mxu1 %vm690_vm0, %v7112_v5  ;;  %v8845_v9 = vsel %vm690_vm0, %v7112_v5, 0 }
  0x12   : > { %v8842_v8 = vld [vmem:[%s11589_s1 + $0xa] sm:$0x3]  ;;  %v8849_v10 = vsel %vm690_vm0, %v8832_v6, 0  ;;  %v8854_v11 = vld [vmem:[%s11589_s1 + $0xc] sm:$0x3]  ;;  %vm8895_vm4 = vmor %vm384_vm1, %vm385_vm3  ;;  %v11602_v40 = vmov 0 }
  0x13   : > { %s330_s15 = scalar_lea.vmem %s11588_s0, %s8521_s23  ;;  %v8861_v12 = vsel %vm690_vm0, %v8842_v8, 0  ;;  %v8865_v13 = vsel %vm690_vm0, %v8854_v11, 0  ;;  %v11603_v40 = vsel %vm8895_vm4, 4294967295, %v11602_v40  ;;  %vm1033_vm5 = vcmask 1042432   ;;  %s7015_s12 = sshll.u32 %s8713_s27, 3 }
  0x14   : > { %s8867_s16 = scalar_lea.vmem %s330_s15, %s7699_s18  ;;  %11604 = vst [vmem:[#allocation3_spill] sm:$0xff] %v11603_v40  ;;  %vm1034_vm6 = vcmask 1046532   ;;  %v8609_v40 = vld [vmem:[%s11592_s4 + $0x138] sm:$0xff]   ;;  %s7362_s13 = sadd.s32 4294967295, %s7015_s12  ;;  %vm3788_vm12 = vcmask 1043456  }
  0x15   : > { %v353_v14 = vld [vmem:[%s8867_s16] sm:$0xf]  ;;  %v8871_v15 = vld [vmem:[%s8867_s16 + $0x4] sm:$0xf]  ;;  %v8874_v16 = vld [vmem:[%s8867_s16 + $0x8] sm:$0x1] }
  0x16   : > { %v388_v17 = vshrl.u32 %v353_v14, 16  ;;  %v391_v18 = vshll.u32 %v353_v14, 16  ;;  %v397_v19 = vshll.u32 %v8871_v15, 16  ;;  %v401_v20 = vshrl.u32 %v8871_v15, 16  ;;  %v355_v21 = vld [vmem:[%s8867_s16 + $0xc] sm:$0xf]  ;;  %vm9050_vm7 = vmor %vm1033_vm5, %vm1034_vm6 }
  0x17   : > { %v407_v22 = vshll.u32 %v8874_v16, 16  ;;  %v1041_v23 = vrot.slane %v8874_v16, 5  ;;  %v7039_v24 = vcombine.low %v353_v14, %v8871_v15  ;;  %v8883_v25 = vld [vmem:[%s8867_s16 + $0x10] sm:$0xf]  ;;  %v8886_v26 = vld [vmem:[%s8867_s16 + $0x14] sm:$0x1] }
  0x18   : > { %v390_v27 = vrot.slane %v388_v17, 4  ;;  %v393_v28 = vrot.slane %v391_v18, 5  ;;  %v399_v29 = vrot.slane %v397_v19, 5  ;;  %v403_v30 = vrot.slane %v401_v20, 4  ;;  %v357_v39 = vld [vmem:[%s8867_s16 + $0x18] sm:$0xf] }
  0x19   : > { %v409_v31 = vrot.slane %v407_v22, 5  ;;  %8050 = vmatprep.mubr.msk.bf16.mxu1 %vm659_vm2, %v7039_v24  ;;  %v412_v32 = vshrl.u32 %v355_v21, 16  ;;  %v415_v33 = vshll.u32 %v355_v21, 16  ;;  %v421_v34 = vshll.u32 %v8883_v25, 16  ;;  %v8901_v49 = vld [vmem:[%s8867_s16 + $0x1c] sm:$0xf] }
  0x1a   : > { %v394_v35 = vor.u32 %v393_v28, %v390_v27  ;;  %v404_v36 = vor.u32 %v403_v30, %v399_v29  ;;  %v425_v37 = vshrl.u32 %v8883_v25, 16  ;;  %v431_v38 = vshll.u32 %v8886_v26, 16  ;;  %v8906_v53 = vld [vmem:[%s8867_s16 + $0x20] sm:$0x1]  ;;  %v359_v59 = vld [vmem:[%s8867_s16 + $0x24] sm:$0xf] }
  0x1b   : > { %v414_v41 = vrot.slane %v412_v32, 4  ;;  %v417_v42 = vrot.slane %v415_v33, 5  ;;  %v423_v43 = vrot.slane %v421_v34, 5  ;;  %v1045_v44 = vrot.slane %v8883_v25, 5  ;;  %v8918_v4 = vld [vmem:[%s8867_s16 + $0x28] sm:$0xf] }
  0x1c   : > { %v395_v45 = vrot.slane %v394_v35, 4  ;;  %v405_v46 = vrot.slane %v404_v36, 4  ;;  %v427_v47 = vrot.slane %v425_v37, 4  ;;  %v433_v48 = vrot.slane %v431_v38, 5  ;;  %v8926_v18 = vld [vmem:[%s8867_s16 + $0x2c] sm:$0x1] }
  0x1d   : > { %v418_v50 = vor.u32 %v417_v42, %v414_v41  ;;  %v1048_v51 = vrot.slane %v8886_v26, 5  ;;  %v7040_v52 = vcombine.low %v355_v21, %v8883_v25  ;;  %v436_v54 = vshrl.u32 %v357_v39, 16  ;;  %v361_v24 = vld [vmem:[%s8867_s16 + $0x30] sm:$0xf]  ;;  %v8938_v34 = vld [vmem:[%s8867_s16 + $0x34] sm:$0xf] }
  0x1e   : > { %v400_v55 = vsel %vm8895_vm4, %v395_v45, %v399_v29  ;;  %v410_v56 = vsel %vm8895_vm4, %v405_v46, %v409_v31  ;;  %v428_v57 = vor.u32 %v427_v47, %v423_v43  ;;  %v439_v58 = vshll.u32 %v357_v39, 16  ;;  %v8943_v38 = vld [vmem:[%s8867_s16 + $0x38] sm:$0x1]  ;;  %s7011_s25 = sshll.u32 %s8713_s27, 4  ;;  %p343_p7 = scmp.lt.s32.totalorder %s8713_s27, 1 }
  0x1f   : > { %v7019_v60 = vcombine.low %v400_v55, %v410_v56  ;;  %v419_v61 = vrot.slane %v418_v50, 4  ;;  %8051 = vmatmul.mubr.msk.bf16.vlgmr.msra.gmra.mxu1 %vm659_vm2, %v7040_v52  ;;  %v438_v62 = vrot.slane %v436_v54, 4  ;;  %v445_v63 = vshll.u32 %v8901_v49, 16  ;;  %v363_v56 = vld [vmem:[%s8867_s16 + $0x3c] sm:$0xf]  ;;  %p11434_p6 = scmp.lt.s32.totalorder %s7011_s25, 31 }
  0x20   : > { %v429_v0 = vrot.slane %v428_v57, 4  ;;  %v441_v1 = vrot.slane %v439_v58, 5  ;;  %v449_v2 = vshrl.u32 %v8901_v49, 16  ;;  %v455_v3 = vshll.u32 %v8906_v53, 16  ;;  %8093 = vmatpush3.bf16.msra.mxu1 %v8845_v9  ;;  %s11760_s27 = smov (!%p343_p7, %s8713_s27), 1  ;;  %s7014_s22 = sshll.u32 %s11756_s28, 1 }
  0x21   : > { %8028 = vmatprep.mubr.msk.bf16.mxu0 %vm659_vm2, %v7019_v60  ;;  %v424_v5 = vsel %vm8895_vm4, %v419_v61, %v423_v43  ;;  %v447_v14 = vrot.slane %v445_v63, 5  ;;  %v7041_v17 = vcombine.low %v357_v39, %v8901_v49  ;;  %v460_v19 = vshrl.u32 %v359_v59, 16  ;;  %8517 = vmatprep.subr.msk.bf16.mxu1 %vm690_vm0, %v8842_v8  ;;  %v8958_v61 = vld [vmem:[%s8867_s16 + $0x40] sm:$0xf]  ;;  %s11758_s25 = smov (!%p11434_p6, %s7011_s25), 31  ;;  %s346_s23 = sadd.s32 %s7014_s22, %s11760_s27 }
  0x22   : > { %v434_v20 = vsel %vm8895_vm4, %v429_v0, %v433_v48  ;;  %v442_v21 = vor.u32 %v441_v1, %v438_v62  ;;  %v451_v9 = vrot.slane %v449_v2, 4  ;;  %v457_v22 = vrot.slane %v455_v3, 5  ;;  %v8962_v1 = vld [vmem:[%s8867_s16 + $0x44] sm:$0x1]  ;;  %s347_s26 = scalar_lea.vmem %s11596_s8, %s346_s23 }
  0x23   : > { %v7020_v27 = vcombine.low %v424_v5, %v434_v20  ;;  %8054 = vmatprep.mubr.msk.bf16.mxu1 %vm659_vm2, %v7041_v17  ;;  %v462_v28 = vrot.slane %v460_v19, 4  ;;  %v463_v29 = vshll.u32 %v359_v59, 16  ;;  %v469_v30 = vshll.u32 %v8918_v4, 16  ;;  %v365_v17 = vld [vmem:[%s8867_s16 + $0x48] sm:$0xf] }
  0x24   : > { %v443_v31 = vrot.slane %v442_v21, 4  ;;  %v452_v32 = vor.u32 %v451_v9, %v447_v14  ;;  %v473_v33 = vshrl.u32 %v8918_v4, 16  ;;  %v479_v8 = vshll.u32 %v8926_v18, 16 }
  0x25   : > { %8029 = vmatmul.mubr.msk.bf16.vlgmr.msra.gmra.mxu0 %vm659_vm2, %v7020_v27  ;;  %v465_v35 = vrot.slane %v463_v29, 5  ;;  %v471_v36 = vrot.slane %v469_v30, 5  ;;  %v7042_v37 = vcombine.low %v359_v59, %v8918_v4  ;;  %v484_v39 = vshrl.u32 %v361_v24, 16 }
  0x26   : > { %8071 = vmatpush3.bf16.msra.mxu0 %v8836_v7  ;;  %v448_v41 = vsel %vm8895_vm4, %v443_v31, %v447_v14  ;;  %v453_v42 = vrot.slane %v452_v32, 4  ;;  %v475_v43 = vrot.slane %v473_v33, 4  ;;  %v481_v45 = vrot.slane %v479_v8, 5  ;;  %v8978_v8 = vld [vmem:[%s8867_s16 + $0x50] sm:$0x1] }
  0x27   : > { %v466_v46 = vor.u32 %v465_v35, %v462_v28  ;;  %8055 = vmatmul.mubr.msk.bf16.gmra.mxu1 %vm659_vm2, %v7042_v37  ;;  %v486_v47 = vrot.slane %v484_v39, 4  ;;  %v487_v48 = vshll.u32 %v361_v24, 16  ;;  %v493_v50 = vshll.u32 %v8938_v34, 16  ;;  %8516 = vmatprep.subr.msk.bf16.mxu0 %vm690_vm0, %v8832_v6 }
  0x28   : > { %v458_v7 = vsel %vm8895_vm4, %v453_v42, %v457_v22  ;;  %v476_v52 = vor.u32 %v475_v43, %v471_v36  ;;  %v497_v54 = vshrl.u32 %v8938_v34, 16  ;;  %v503_v55 = vshll.u32 %v8943_v38, 16  ;;  %v8974_v22 = vld [vmem:[%s8867_s16 + $0x4c] sm:$0xf] }
  0x29   : > { %v7021_v57 = vcombine.low %v448_v41, %v458_v7  ;;  %v467_v58 = vrot.slane %v466_v46, 4  ;;  %v489_v59 = vrot.slane %v487_v48, 5  ;;  %v495_v60 = vrot.slane %v493_v50, 5  ;;  %v367_v41 = vld [vmem:[%s8867_s16 + $0x54] sm:$0xf] }
  0x2a   : > { %v477_v62 = vrot.slane %v476_v52, 4  ;;  %v499_v63 = vrot.slane %v497_v54, 4  ;;  %v505_v6 = vrot.slane %v503_v55, 5  ;;  %v7043_v0 = vcombine.low %v361_v24, %v8938_v34 }
  0x2b   : > { %8032 = vmatprep.mubr.msk.bf16.mxu0 %vm659_vm2, %v7021_v57  ;;  %v472_v2 = vsel %vm8895_vm4, %v467_v58, %v471_v36  ;;  %v490_v3 = vor.u32 %v489_v59, %v486_v47  ;;  %v508_v5 = vshrl.u32 %v363_v56, 16  ;;  %v511_v14 = vshll.u32 %v363_v56, 16  ;;  %v8988_v47 = vld [vmem:[%s8867_s16 + $0x58] sm:$0xf]  ;;  %v8995_v58 = vld [vmem:[%s8867_s16 + $0x5c] sm:$0x1] }
  0x2c   : > { %v482_v19 = vsel %vm8895_vm4, %v477_v62, %v481_v45  ;;  %v500_v20 = vor.u32 %v499_v63, %v495_v60  ;;  %8058 = vmatprep.mubr.msk.bf16.mxu1 %vm659_vm2, %v7043_v0  ;;  %v517_v21 = vshll.u32 %v8958_v61, 16  ;;  %v521_v9 = vshrl.u32 %v8958_v61, 16 }
  0x2d   : > { %v7022_v24 = vcombine.low %v472_v2, %v482_v19  ;;  %v491_v27 = vrot.slane %v490_v3, 4  ;;  %v510_v28 = vrot.slane %v508_v5, 4  ;;  %v513_v29 = vrot.slane %v511_v14, 5 }
  0x2e   : > { %v501_v30 = vrot.slane %v500_v20, 4  ;;  %v519_v31 = vrot.slane %v517_v21, 5  ;;  %v523_v32 = vrot.slane %v521_v9, 4  ;;  %v527_v33 = vshll.u32 %v8962_v1, 16 }
  0x2f   : > { %8033 = vmatmul.mubr.msk.bf16.gmra.mxu0 %vm659_vm2, %v7022_v24  ;;  %v496_v35 = vsel %vm8895_vm4, %v491_v27, %v495_v60  ;;  %v514_v36 = vor.u32 %v513_v29, %v510_v28  ;;  %v7044_v37 = vcombine.low %v363_v56, %v8958_v61  ;;  %v532_v39 = vshrl.u32 %v365_v17, 16  ;;  %v9009_v28 = vld [vmem:[%s8867_s16 + $0x64] sm:$0xf] }
  0x30   : > { %v506_v42 = vsel %vm8895_vm4, %v501_v30, %v505_v6  ;;  %v524_v43 = vor.u32 %v523_v32, %v519_v31  ;;  %v529_v45 = vrot.slane %v527_v33, 5  ;;  %v535_v46 = vshll.u32 %v365_v17, 16  ;;  %v369_v6 = vld [vmem:[%s8867_s16 + $0x60] sm:$0xf]  ;;  %v9014_v32 = vld [vmem:[%s8867_s16 + $0x68] sm:$0x1] }
  0x31   : > { %v7023_v48 = vcombine.low %v496_v35, %v506_v42  ;;  %v515_v50 = vrot.slane %v514_v36, 4  ;;  %8059 = vmatmul.mubr.msk.bf16.gmra.mxu1 %vm659_vm2, %v7044_v37  ;;  %v534_v7 = vrot.slane %v532_v39, 4  ;;  %v541_v52 = vshll.u32 %v8974_v22, 16  ;;  %v371_v42 = vld [vmem:[%s8867_s16 + $0x6c] sm:$0xf] }
  0x32   : > { %v525_v54 = vrot.slane %v524_v43, 4  ;;  %v537_v55 = vrot.slane %v535_v46, 5  ;;  %v545_v56 = vshrl.u32 %v8974_v22, 16  ;;  %v551_v57 = vshll.u32 %v8978_v8, 16 }
  0x33   : > { %8036 = vmatprep.mubr.msk.bf16.mxu0 %vm659_vm2, %v7023_v48  ;;  %v520_v59 = vsel %vm8895_vm4, %v515_v50, %v519_v31  ;;  %v543_v60 = vrot.slane %v541_v52, 5  ;;  %v7045_v62 = vcombine.low %v365_v17, %v8974_v22  ;;  %v556_v63 = vshrl.u32 %v367_v41, 16 }
  0x34   : > { %v530_v0 = vsel %vm8895_vm4, %v525_v54, %v529_v45  ;;  %v538_v2 = vor.u32 %v537_v55, %v534_v7  ;;  %v547_v3 = vrot.slane %v545_v56, 4  ;;  %v553_v5 = vrot.slane %v551_v57, 5 }
  0x35   : > { %v7024_v14 = vcombine.low %v520_v59, %v530_v0  ;;  %8062 = vmatprep.mubr.msk.bf16.mxu1 %vm659_vm2, %v7045_v62  ;;  %v558_v19 = vrot.slane %v556_v63, 4  ;;  %v559_v20 = vshll.u32 %v367_v41, 16  ;;  %v565_v21 = vshll.u32 %v8988_v47, 16 }
  0x36   : > { %v539_v9 = vrot.slane %v538_v2, 4  ;;  %v548_v24 = vor.u32 %v547_v3, %v543_v60  ;;  %v569_v17 = vshrl.u32 %v8988_v47, 16  ;;  %v575_v27 = vshll.u32 %v8995_v58, 16  ;;  %v1003_v3 = vld [vmem:[%s8867_s16] sm:$0xe] }
  0x37   : > { %8037 = vmatmul.mubr.msk.bf16.gmra.mxu0 %vm659_vm2, %v7024_v14  ;;  %v561_v29 = vrot.slane %v559_v20, 5  ;;  %v567_v30 = vrot.slane %v565_v21, 5  ;;  %v7046_v31 = vcombine.low %v367_v41, %v8988_v47  ;;  %v580_v33 = vshrl.u32 %v369_v6, 16  ;;  %v9022_v41 = vld [vmem:[%s8867_s16 + $0x70] sm:$0xf] }
  0x38   : > { %v544_v35 = vsel %vm8895_vm4, %v539_v9, %v543_v60  ;;  %v549_v36 = vrot.slane %v548_v24, 4  ;;  %v571_v37 = vrot.slane %v569_v17, 4  ;;  %v577_v39 = vrot.slane %v575_v27, 5  ;;  %v9029_v60 = vld [vmem:[%s8867_s16 + $0x74] sm:$0x1] }
  0x39   : > { %v562_v43 = vor.u32 %v561_v29, %v558_v19  ;;  %8063 = vmatmul.mubr.msk.bf16.gmra.mxu1 %vm659_vm2, %v7046_v31  ;;  %v582_v45 = vrot.slane %v580_v33, 4  ;;  %v583_v46 = vshll.u32 %v369_v6, 16  ;;  %v589_v48 = vshll.u32 %v9009_v28, 16 }
  0x3a   : > { %v554_v50 = vsel %vm8895_vm4, %v549_v36, %v553_v5  ;;  %v572_v7 = vor.u32 %v571_v37, %v567_v30  ;;  %v593_v52 = vshrl.u32 %v9009_v28, 16  ;;  %v599_v54 = vshll.u32 %v9014_v32, 16 }
  0x3b   : > { %v7025_v55 = vcombine.low %v544_v35, %v554_v50  ;;  %v563_v56 = vrot.slane %v562_v43, 4  ;;  %v585_v57 = vrot.slane %v583_v46, 5  ;;  %v591_v59 = vrot.slane %v589_v48, 5  ;;  %v1004_v43 = vld [vmem:[%s8867_s16 + $0xc] sm:$0xe] }
  0x3c   : > { %v573_v62 = vrot.slane %v572_v7, 4  ;;  %v595_v63 = vrot.slane %v593_v52, 4  ;;  %v601_v0 = vrot.slane %v599_v54, 5  ;;  %v7047_v2 = vcombine.low %v369_v6, %v9009_v28  ;;  %v1005_v7 = vld [vmem:[%s8867_s16 + $0x18] sm:$0xe] }
  0x3d   : > { %8040 = vmatprep.mubr.msk.bf16.mxu0 %vm659_vm2, %v7025_v55  ;;  %v568_v5 = vsel %vm8895_vm4, %v563_v56, %v567_v30  ;;  %v586_v14 = vor.u32 %v585_v57, %v582_v45  ;;  %v604_v19 = vshrl.u32 %v371_v42, 16  ;;  %v607_v20 = vshll.u32 %v371_v42, 16  ;;  %v8573_v30 = vld [vmem:[%s8867_s16 + $0xc] sm:$0xff]  }
  0x3e   : > { %v578_v21 = vsel %vm8895_vm4, %v573_v62, %v577_v39  ;;  %v596_v9 = vor.u32 %v595_v63, %v591_v59  ;;  %8066 = vmatprep.mubr.msk.bf16.mxu1 %vm659_vm2, %v7047_v2  ;;  %v613_v24 = vshll.u32 %v9022_v41, 16  ;;  %v617_v6 = vshrl.u32 %v9022_v41, 16 }
  0x3f   : > { %v7026_v17 = vcombine.low %v568_v5, %v578_v21  ;;  %v587_v27 = vrot.slane %v586_v14, 4  ;;  %v606_v29 = vrot.slane %v604_v19, 4  ;;  %v609_v31 = vrot.slane %v607_v20, 5  ;;  %v1006_v20 = vld [vmem:[%s8867_s16 + $0x24] sm:$0xe] }
  0x40   : > { %v597_v33 = vrot.slane %v596_v9, 4  ;;  %v615_v35 = vrot.slane %v613_v24, 5  ;;  %v619_v36 = vrot.slane %v617_v6, 4  ;;  %v623_v37 = vshll.u32 %v9029_v60, 16  ;;  %v1007_v21 = vld [vmem:[%s8867_s16 + $0x30] sm:$0xe] }
  0x41   : > { %8041 = vmatmul.mubr.msk.bf16.gmra.mxu0 %vm659_vm2, %v7026_v17  ;;  %v592_v39 = vsel %vm8895_vm4, %v587_v27, %v591_v59  ;;  %v610_v45 = vor.u32 %v609_v31, %v606_v29  ;;  %v7048_v46 = vcombine.low %v371_v42, %v9022_v41  ;;  %v11605_v48 = vmov 0  ;;  %v8575_v29 = vld [vmem:[%s8867_s16 + $0x24] sm:$0xff]  }
  0x42   : > { %v11606_v48 = vsel %vm9050_vm7, 4294967295, %v11605_v48  ;;  %v7059_v50 = vrot.slane %v1003_v3, 9  ;;  %v602_v52 = vsel %vm8895_vm4, %v597_v33, %v601_v0  ;;  %v620_v54 = vor.u32 %v619_v36, %v615_v35  ;;  %v1009_v33 = vld [vmem:[%s8867_s16 + $0x48] sm:$0xe] }
  0x43   : > { %11607 = vst [vmem:[#allocation4_spill] sm:$0xff] %v11606_v48  ;;  %v625_v55 = vrot.slane %v623_v37, 5  ;;  %v1038_v56 = vrot.slane %v8871_v15, 5  ;;  %v7027_v57 = vcombine.low %v592_v39, %v602_v52  ;;  %v611_v59 = vrot.slane %v610_v45, 4  ;;  %8067 = vmatmul.mubr.msk.bf16.gmra.mxu1 %vm659_vm2, %v7048_v46  ;;  %v1010_v45 = vld [vmem:[%s8867_s16 + $0x54] sm:$0xe] }
  0x44   : > { %v7060_v42 = vrot.slane %v1004_v43, 9  ;;  %v1047_v62 = vrot.slane %v1045_v44, 4  ;;  %v621_v63 = vrot.slane %v620_v54, 4  ;;  %8094 = vmatprep.mubr.msk.bf16.mxu1 %vm659_vm2, %v8573_v30  ;;  %v7061_v15 = vrot.slane %v1005_v7, 9 }
  0x45   : > { %v1039_v2 = vsel %vm9050_vm7, %v7059_v50, %v1038_v56  ;;  %v1040_v0 = vrot.slane %v1038_v56, 4  ;;  %8044 = vmatprep.mubr.msk.bf16.mxu0 %vm659_vm2, %v7027_v57  ;;  %v616_v3 = vsel %vm8895_vm4, %v611_v59, %v615_v35  ;;  %v1052_v19 = vrot.slane %v8901_v49, 5  ;;  %v8574_v49 = vld [vmem:[%s8867_s16 + $0x18] sm:$0xff]  }
  0x46   : > { %v9071_v5 = vsel %vm9050_vm7, %v7060_v42, %v1045_v44  ;;  %v9077_v14 = vsel %vm9050_vm7, %v1047_v62, %v1048_v51  ;;  %v626_v9 = vsel %vm8895_vm4, %v621_v63, %v625_v55  ;;  %v1055_v44 = vrot.slane %v8906_v53, 5  ;;  %v1008_v51 = vld [vmem:[%s8867_s16 + $0x3c] sm:$0xe]  ;;  %v1011_v55 = vld [vmem:[%s8867_s16 + $0x60] sm:$0xe] }
  0x47   : > { %v1042_v25 = vsel %vm9050_vm7, %v1040_v0, %v1041_v23  ;;  %v7071_v26 = vcombine.low %v9071_v5, %v9077_v14  ;;  %v7028_v24 = vcombine.low %v616_v3, %v626_v9  ;;  %v1053_v17 = vsel %vm9050_vm7, %v7061_v15, %v1052_v19  ;;  %v1012_v42 = vld [vmem:[%s8867_s16 + $0x6c] sm:$0xe]  ;;  %v8577_v14 = vld [vmem:[%s8867_s16 + $0x3c] sm:$0xff]  }
  0x48   : > { %v7070_v6 = vcombine.low %v1039_v2, %v1042_v25  ;;  %v1054_v27 = vrot.slane %v1052_v19, 4  ;;  %v7062_v31 = vrot.slane %v1006_v20, 9  ;;  %v1059_v16 = vrot.slane %v8918_v4, 5  ;;  %v8576_v2 = vld [vmem:[%s8867_s16 + $0x30] sm:$0xff]   ;;  %v7133_v5 = vld [vmem:[%s8867_s16 + $0xc] sm:$0xf] }
  0x49   : > { %v1062_v23 = vrot.slane %v8926_v18, 5  ;;  %v7063_v30 = vrot.slane %v1007_v21, 9  ;;  %8045 = vmatmul.mubr.msk.bf16.gmra.mxu0 %vm659_vm2, %v7028_v24  ;;  %v1066_v35 = vrot.slane %v8938_v34, 5  ;;  %v1069_v36 = vrot.slane %v8943_v38, 5 }
  0x4a   : > { %v1056_v53 = vsel %vm9050_vm7, %v1054_v27, %v1055_v44  ;;  %v7064_v37 = vrot.slane %v1008_v51, 9  ;;  %8072 = vmatprep.mubr.msk.bf16.mxu0 %vm659_vm2, %v7070_v6  ;;  %v9107_v4 = vsel %vm9050_vm7, %v7062_v31, %v1059_v16  ;;  %v1061_v18 = vrot.slane %v1059_v16, 4  ;;  %v9169_v51 = vld [vmem:[%s8867_s16 + $0x10] sm:$0xf] }
  0x4b   : > { %v7072_v43 = vcombine.low %v1053_v17, %v1056_v53  ;;  %v1073_v39 = vrot.slane %v8958_v61, 5  ;;  %8095 = vmatmul.mubr.msk.bf16.vlgmr.msra.gmra.mxu1 %vm659_vm2, %v8574_v49  ;;  %v9114_v34 = vsel %vm9050_vm7, %v7063_v30, %v1066_v35  ;;  %v1068_v38 = vrot.slane %v1066_v35, 4  ;;  %v9188_v49 = vld [vmem:[%s8867_s16 + $0x14] sm:$0x1]  ;;  %v9210_v35 = vld [vmem:[%s8867_s16 + $0x20] sm:$0x1] }
  0x4c   : > { %v1076_v46 = vrot.slane %v8962_v1, 5  ;;  %v7065_v50 = vrot.slane %v1009_v33, 9  ;;  %v9119_v7 = vsel %vm9050_vm7, %v1061_v18, %v1062_v23  ;;  %8098 = vmatprep.mubr.msk.bf16.mxu1 %vm659_vm2, %v8575_v29  ;;  %v1080_v54 = vrot.slane %v8974_v22, 5  ;;  %8137 = vmatpush3.bf16.msra.mxu1 %v8861_v12  ;;  %v7137_v23 = vld [vmem:[%s8867_s16 + $0x1c] sm:$0xf] }
  0x4d   : > { %v9124_v61 = vsel %vm9050_vm7, %v7064_v37, %v1073_v39  ;;  %v1075_v52 = vrot.slane %v1073_v39, 4  ;;  %v7073_v1 = vcombine.low %v9107_v4, %v9119_v7  ;;  %v9133_v56 = vsel %vm9050_vm7, %v1068_v38, %v1069_v36  ;;  %v8578_v36 = vld [vmem:[%s8867_s16 + $0x48] sm:$0xff]  }
  0x4e   : > { %v1083_v57 = vrot.slane %v8978_v8, 5  ;;  %v7066_v59 = vrot.slane %v1010_v45, 9  ;;  %v7074_v62 = vcombine.low %v9114_v34, %v9133_v56  ;;  %v9145_v12 = vsel %vm9050_vm7, %v7065_v50, %v1080_v54  ;;  %v8579_v45 = vld [vmem:[%s8867_s16 + $0x54] sm:$0xff]   ;;  %v9233_v4 = vld [vmem:[%s11589_s1 + $0xe] sm:$0x3] }
  0x4f   : > { %v9141_v22 = vsel %vm9050_vm7, %v1075_v52, %v1076_v46  ;;  %v1082_v63 = vrot.slane %v1080_v54, 4  ;;  %v1087_v8 = vrot.slane %v8988_v47, 5  ;;  %v1090_v15 = vrot.slane %v8995_v58, 5  ;;  %v7184_v54 = vld [vmem:[%s8867_s16 + $0xc] sm:$0xe]  ;;  %8519 = vmatprep.subr.msk.bf16.mxu1 %vm690_vm0, %v9233_v4 }
  0x50   : > { %v7075_v0 = vcombine.low %v9124_v61, %v9141_v22  ;;  %v7067_v3 = vrot.slane %v1011_v55, 9  ;;  %v1094_v20 = vrot.slane %v9009_v28, 5  ;;  %v1097_v21 = vrot.slane %v9014_v32, 5 }
  0x51   : > { %v9156_v19 = vsel %vm9050_vm7, %v1082_v63, %v1083_v57  ;;  %v7068_v9 = vrot.slane %v1012_v42, 9  ;;  %8073 = vmatmul.mubr.msk.bf16.vlgmr.msra.gmra.mxu0 %vm659_vm2, %v7071_v26  ;;  %v9165_v58 = vsel %vm9050_vm7, %v7066_v59, %v1087_v8  ;;  %v1089_v25 = vrot.slane %v1087_v8, 4  ;;  %v7185_v63 = vld [vmem:[%s8867_s16 + $0x18] sm:$0xe] }
  0x52   : > { %v7076_v47 = vcombine.low %v9145_v12, %v9156_v19  ;;  %v1101_v44 = vrot.slane %v9022_v41, 5  ;;  %8115 = vmatpush3.bf16.msra.mxu0 %v8849_v10  ;;  %8076 = vmatprep.mubr.msk.bf16.mxu0 %vm659_vm2, %v7072_v43  ;;  %v9175_v28 = vsel %vm9050_vm7, %v7067_v3, %v1094_v20  ;;  %v1096_v32 = vrot.slane %v1094_v20, 4 }
  0x53   : > { %v1104_v26 = vrot.slane %v9029_v60, 5  ;;  %v1577_v24 = vshrl.u32 %v7133_v5, 16  ;;  %8099 = vmatmul.mubr.msk.bf16.gmra.mxu1 %vm659_vm2, %v8576_v2  ;;  %v9181_v41 = vsel %vm9050_vm7, %v1089_v25, %v1090_v15  ;;  %v1580_v17 = vshll.u32 %v7133_v5, 16  ;;  %8518 = vmatprep.subr.msk.bf16.mxu0 %vm690_vm0, %v8854_v11  ;;  %v7136_v60 = vld [vmem:[%s8867_s16 + $0x18] sm:$0xf] }
  0x54   : > { %v9185_v10 = vsel %vm9050_vm7, %v7068_v9, %v1101_v44  ;;  %v1103_v6 = vrot.slane %v1101_v44, 4  ;;  %8102 = vmatprep.mubr.msk.bf16.mxu1 %vm659_vm2, %v8577_v14  ;;  %v7077_v27 = vcombine.low %v9165_v58, %v9181_v41  ;;  %v9198_v29 = vsel %vm9050_vm7, %v1096_v32, %v1097_v21  ;;  %v7139_v5 = vld [vmem:[%s8867_s16 + $0x24] sm:$0xf]  ;;  %v9247_v32 = vld [vmem:[%s8867_s16 + $0x28] sm:$0xf] }
  0x55   : > { %v1579_v31 = vrot.slane %v1577_v24, 4  ;;  %v1586_v16 = vshll.u32 %v9169_v51, 16  ;;  %v7078_v30 = vcombine.low %v9175_v28, %v9198_v29  ;;  %v1582_v33 = vrot.slane %v1580_v17, 5 }
  0x56   : > { %v9206_v11 = vsel %vm9050_vm7, %v1103_v6, %v1104_v26  ;;  %v1590_v53 = vshrl.u32 %v9169_v51, 16  ;;  %v1596_v18 = vshll.u32 %v9188_v49, 16  ;;  %v1601_v39 = vshrl.u32 %v7136_v60, 16 }
  0x57   : > { %v7079_v37 = vcombine.low %v9185_v10, %v9206_v11  ;;  %v1588_v43 = vrot.slane %v1586_v16, 5  ;;  %v1583_v38 = vor.u32 %v1582_v33, %v1579_v31  ;;  %v1604_v50 = vshll.u32 %v7136_v60, 16  ;;  %v9259_v16 = vld [vmem:[%s8867_s16 + $0x2c] sm:$0x1] }
  0x58   : > { %v1592_v46 = vrot.slane %v1590_v53, 4  ;;  %v1610_v52 = vshll.u32 %v7137_v23, 16  ;;  %v1598_v55 = vrot.slane %v1596_v18, 5  ;;  %v1603_v57 = vrot.slane %v1601_v39, 4  ;;  %v8580_v53 = vld [vmem:[%s8867_s16 + $0x60] sm:$0xff]  }
  0x59   : > { %v1614_v59 = vshrl.u32 %v7137_v23, 16  ;;  %v1620_v42 = vshll.u32 %v9210_v35, 16  ;;  %8077 = vmatmul.mubr.msk.bf16.gmra.mxu0 %vm659_vm2, %v7073_v1  ;;  %v1584_v2 = vrot.slane %v1583_v38, 4  ;;  %v1606_v15 = vrot.slane %v1604_v50, 5  ;;  %v7142_v18 = vld [vmem:[%s8867_s16 + $0x30] sm:$0xf] }
  0x5a   : > { %v1593_v8 = vor.u32 %v1592_v46, %v1588_v43  ;;  %v1612_v3 = vrot.slane %v1610_v52, 5  ;;  %8080 = vmatprep.mubr.msk.bf16.mxu0 %vm659_vm2, %v7074_v62  ;;  %v7194_v21 = vrot.slane %v7184_v54, 9  ;;  %v2056_v9 = vrot.slane %v9169_v51, 5  ;;  %v9272_v39 = vld [vmem:[%s8867_s16 + $0x34] sm:$0xf] }
  0x5b   : > { %v1616_v14 = vrot.slane %v1614_v59, 4  ;;  %v1622_v20 = vrot.slane %v1620_v42, 5  ;;  %8103 = vmatmul.mubr.msk.bf16.gmra.mxu1 %vm659_vm2, %v8578_v36  ;;  %v1589_v7 = vsel %vm8895_vm4, %v1584_v2, %v1588_v43  ;;  %v1607_v34 = vor.u32 %v1606_v15, %v1603_v57  ;;  %v9279_v54 = vld [vmem:[%s8867_s16 + $0x38] sm:$0x1] }
  0x5c   : > { %v1594_v1 = vrot.slane %v1593_v8, 4  ;;  %v2059_v56 = vrot.slane %v9188_v49, 5  ;;  %8106 = vmatprep.mubr.msk.bf16.mxu1 %vm659_vm2, %v8579_v45  ;;  %v9244_v25 = vsel %vm9050_vm7, %v7194_v21, %v2056_v9  ;;  %v2058_v44 = vrot.slane %v2056_v9, 4  ;;  %v8581_v45 = vld [vmem:[%s8867_s16 + $0x6c] sm:$0xff]  }
  0x5d   : > { %v1617_v62 = vor.u32 %v1616_v14, %v1612_v3  ;;  %v7195_v51 = vrot.slane %v7185_v63, 9  ;;  %v1608_v24 = vrot.slane %v1607_v34, 4  ;;  %v2063_v6 = vrot.slane %v7137_v23, 5  ;;  %v7186_v63 = vld [vmem:[%s8867_s16 + $0x24] sm:$0xe] }
  0x5e   : > { %v1599_v26 = vsel %vm8895_vm4, %v1594_v1, %v1598_v55  ;;  %v2066_v49 = vrot.slane %v9210_v35, 5  ;;  %v9256_v31 = vsel %vm9050_vm7, %v2058_v44, %v2059_v56  ;;  %v1625_v33 = vshrl.u32 %v7139_v5, 16  ;;  %v7187_v8 = vld [vmem:[%s8867_s16 + $0x30] sm:$0xe] }
  0x5f   : > { %v9252_v17 = vcombine.low %v1589_v7, %v1599_v26  ;;  %v1618_v60 = vrot.slane %v1617_v62, 4  ;;  %v1613_v36 = vsel %vm8895_vm4, %v1608_v24, %v1612_v3  ;;  %v7205_v23 = vcombine.low %v9244_v25, %v9256_v31  ;;  %v9361_v31 = vld [vmem:[%s8867_s16 + $0x50] sm:$0x1] }
  0x60   : > { %v9268_v35 = vsel %vm9050_vm7, %v7195_v51, %v2063_v6  ;;  %v2065_v43 = vrot.slane %v2063_v6, 4  ;;  %v1627_v46 = vrot.slane %v1625_v33, 4  ;;  %v1628_v50 = vshll.u32 %v7139_v5, 16  ;;  %v8582_v51 = vld [vmem:[%s8867_s16 + $0x78] sm:$0xff]  }
  0x61   : > { %v1623_v38 = vsel %vm8895_vm4, %v1618_v60, %v1622_v20  ;;  %v1634_v52 = vshll.u32 %v9247_v32, 16  ;;  %8081 = vmatmul.mubr.msk.bf16.gmra.mxu0 %vm659_vm2, %v7075_v0  ;;  %v1638_v59 = vshrl.u32 %v9247_v32, 16  ;;  %v1644_v42 = vshll.u32 %v9259_v16, 16  ;;  %v7145_v60 = vld [vmem:[%s8867_s16 + $0x3c] sm:$0xf] }
  0x62   : > { %v9285_v55 = vcombine.low %v1613_v36, %v1623_v38  ;;  %v9289_v57 = vsel %vm9050_vm7, %v2065_v43, %v2066_v49  ;;  %8084 = vmatprep.mubr.msk.bf16.mxu0 %vm659_vm2, %v7076_v47  ;;  %v1630_v22 = vrot.slane %v1628_v50, 5  ;;  %v1649_v2 = vshrl.u32 %v7142_v18, 16  ;;  %v7148_v50 = vld [vmem:[%s8867_s16 + $0x48] sm:$0xf] }
  0x63   : > { %v7206_v61 = vcombine.low %v9268_v35, %v9289_v57  ;;  %v1636_v0 = vrot.slane %v1634_v52, 5  ;;  %8107 = vmatmul.mubr.msk.bf16.gmra.mxu1 %vm659_vm2, %v8580_v53  ;;  %v1640_v15 = vrot.slane %v1638_v59, 4  ;;  %v1646_v3 = vrot.slane %v1644_v42, 5  ;;  %v9387_v57 = vld [vmem:[%s8867_s16 + $0x58] sm:$0xf] }
  0x64   : > { %v1652_v5 = vshll.u32 %v7142_v18, 16  ;;  %v1658_v14 = vshll.u32 %v9272_v39, 16  ;;  %8110 = vmatprep.mubr.msk.bf16.mxu1 %vm659_vm2, %v8581_v45  ;;  %v1631_v12 = vor.u32 %v1630_v22, %v1627_v46  ;;  %v1651_v19 = vrot.slane %v1649_v2, 4  ;;  %v9315_v18 = vld [vmem:[%s8867_s16 + $0x40] sm:$0xf] }
  0x65   : > { %v1662_v47 = vshrl.u32 %v9272_v39, 16  ;;  %v1668_v20 = vshll.u32 %v9279_v54, 16  ;;  %v1641_v21 = vor.u32 %v1640_v15, %v1636_v0  ;;  %v7196_v1 = vrot.slane %v7186_v63, 9  ;;  %v9318_v45 = vld [vmem:[%s8867_s16 + $0x44] sm:$0x1] }
  0x66   : > { %v1654_v9 = vrot.slane %v1652_v5, 5  ;;  %v1660_v7 = vrot.slane %v1658_v14, 5  ;;  %v1632_v34 = vrot.slane %v1631_v12, 4  ;;  %v2070_v44 = vrot.slane %v9247_v32, 5  ;;  %v7149_v22 = vld [vmem:[%s8867_s16 + $0x4c] sm:$0xf] }
  0x67   : > { %v1664_v56 = vrot.slane %v1662_v47, 4  ;;  %v1670_v62 = vrot.slane %v1668_v20, 5  ;;  %v1642_v26 = vrot.slane %v1641_v21, 4  ;;  %v2073_v6 = vrot.slane %v9259_v16, 5  ;;  %v7188_v14 = vld [vmem:[%s8867_s16 + $0x3c] sm:$0xe] }
  0x68   : > { %v1655_v24 = vor.u32 %v1654_v9, %v1651_v19  ;;  %v7197_v49 = vrot.slane %v7187_v8, 9  ;;  %v1637_v33 = vsel %vm8895_vm4, %v1632_v34, %v1636_v0  ;;  %v2071_v36 = vsel %vm9050_vm7, %v7196_v1, %v2070_v44  ;;  %v7189_v34 = vld [vmem:[%s8867_s16 + $0x48] sm:$0xe] }
  0x69   : > { %v1665_v53 = vor.u32 %v1664_v56, %v1660_v7  ;;  %v2072_v43 = vrot.slane %v2070_v44, 4  ;;  %8085 = vmatmul.mubr.msk.bf16.gmra.mxu0 %vm659_vm2, %v7077_v27  ;;  %v1647_v32 = vsel %vm8895_vm4, %v1642_v26, %v1646_v3  ;;  %v2077_v38 = vrot.slane %v9272_v39, 5  ;;  %v7151_v26 = vld [vmem:[%s8867_s16 + $0x54] sm:$0xf] }
  0x6a   : > { %v1656_v16 = vrot.slane %v1655_v24, 4  ;;  %v2080_v46 = vrot.slane %v9279_v54, 5  ;;  %8088 = vmatprep.mubr.msk.bf16.mxu0 %vm659_vm2, %v7078_v30  ;;  %v9333_v52 = vcombine.low %v1637_v33, %v1647_v32  ;;  %v1673_v27 = vshrl.u32 %v7145_v60, 16  ;;  %v9393_v32 = vld [vmem:[%s8867_s16 + $0x5c] sm:$0x1] }
  0x6b   : > { %v1666_v58 = vrot.slane %v1665_v53, 4  ;;  %v2074_v41 = vsel %vm9050_vm7, %v2072_v43, %v2073_v6  ;;  %8111 = vmatmul.mubr.msk.bf16.gmra.mxu1 %vm659_vm2, %v8582_v51  ;;  %v9342_v28 = vsel %vm9050_vm7, %v7197_v49, %v2077_v38  ;;  %v2079_v29 = vrot.slane %v2077_v38, 4 }
  0x6c   : > { %v1661_v39 = vsel %vm8895_vm4, %v1656_v16, %v1660_v7  ;;  %v7207_v54 = vcombine.low %v2071_v36, %v2074_v41  ;;  %8138 = vmatprep.mubr.msk.bf16.mxu1 %vm659_vm2, %v7205_v23  ;;  %v1675_v59 = vrot.slane %v1673_v27, 4  ;;  %v1676_v42 = vshll.u32 %v7145_v60, 16  ;;  %v9401_v41 = vld [vmem:[%s8867_s16 + $0x64] sm:$0xf] }
  0x6d   : > { %v1671_v30 = vsel %vm8895_vm4, %v1666_v58, %v1670_v62  ;;  %v1682_v63 = vshll.u32 %v9315_v18, 16  ;;  %v9356_v2 = vsel %vm9050_vm7, %v2079_v29, %v2080_v46  ;;  %v1686_v8 = vshrl.u32 %v9315_v18, 16  ;;  %v7154_v58 = vld [vmem:[%s8867_s16 + $0x60] sm:$0xf] }
  0x6e   : > { %v9352_v0 = vcombine.low %v1661_v39, %v1671_v30  ;;  %v1692_v25 = vshll.u32 %v9318_v45, 16  ;;  %v7208_v23 = vcombine.low %v9342_v28, %v9356_v2  ;;  %v1678_v15 = vrot.slane %v1676_v42, 5  ;;  %v9408_v30 = vld [vmem:[%s8867_s16 + $0x68] sm:$0x1]  ;;  %v7191_v28 = vld [vmem:[%s8867_s16 + $0x60] sm:$0xe] }
  0x6f   : > { %v1684_v3 = vrot.slane %v1682_v63, 5  ;;  %v1697_v5 = vshrl.u32 %v7148_v50, 16  ;;  %v1688_v12 = vrot.slane %v1686_v8, 4  ;;  %v1700_v47 = vshll.u32 %v7148_v50, 16 }
  0x70   : > { %v1694_v19 = vrot.slane %v1692_v25, 5  ;;  %v1706_v20 = vshll.u32 %v7149_v22, 16  ;;  %v1679_v21 = vor.u32 %v1678_v15, %v1675_v59  ;;  %v1710_v7 = vshrl.u32 %v7149_v22, 16  ;;  %v9413_v59 = vld [vmem:[%s11589_s1 + $0x10] sm:$0x3] }
  0x71   : > { %v1699_v9 = vrot.slane %v1697_v5, 4  ;;  %v1716_v1 = vshll.u32 %v9361_v31, 16  ;;  %8089 = vmatmul.mubr.msk.bf16.gmra.mxu0 %vm659_vm2, %v7079_v37  ;;  %v1689_v56 = vor.u32 %v1688_v12, %v1684_v3  ;;  %v1702_v62 = vrot.slane %v1700_v47, 5  ;;  %v7190_v25 = vld [vmem:[%s8867_s16 + $0x54] sm:$0xe] }
  0x72   : > { %v1708_v44 = vrot.slane %v1706_v20, 5  ;;  %v7198_v51 = vrot.slane %v7188_v14, 9  ;;  %8116 = vmatprep.mubr.msk.bf16.mxu0 %vm659_vm2, %v9252_v17  ;;  %v1680_v24 = vrot.slane %v1679_v21, 4  ;;  %v1712_v6 = vrot.slane %v1710_v7, 4 }
  0x73   : > { %v1718_v49 = vrot.slane %v1716_v1, 5  ;;  %v2084_v60 = vrot.slane %v9315_v18, 5  ;;  %8139 = vmatmul.mubr.msk.bf16.vlgmr.msra.gmra.mxu1 %vm659_vm2, %v7206_v61  ;;  %v1690_v10 = vrot.slane %v1689_v56, 4  ;;  %v1703_v11 = vor.u32 %v1702_v62, %v1699_v9 }
  0x74   : > { %v2087_v37 = vrot.slane %v9318_v45, 5  ;;  %v7199_v33 = vrot.slane %v7189_v34, 9  ;;  %8142 = vmatprep.mubr.msk.bf16.mxu1 %vm659_vm2, %v7207_v54  ;;  %v1685_v17 = vsel %vm8895_vm4, %v1680_v24, %v1684_v3  ;;  %v1713_v53 = vor.u32 %v1712_v6, %v1708_v44 }
  0x75   : > { %v2085_v36 = vsel %vm9050_vm7, %v7198_v51, %v2084_v60  ;;  %v2086_v35 = vrot.slane %v2084_v60, 4  ;;  %v1695_v61 = vsel %vm8895_vm4, %v1690_v10, %v1694_v19  ;;  %v1704_v43 = vrot.slane %v1703_v11, 4  ;;  %v7157_v10 = vld [vmem:[%s8867_s16 + $0x6c] sm:$0xf] }
  0x76   : > { %v2091_v18 = vrot.slane %v7149_v22, 5  ;;  %v2094_v45 = vrot.slane %v9361_v31, 5  ;;  %v9395_v16 = vcombine.low %v1685_v17, %v1695_v61  ;;  %v1714_v38 = vrot.slane %v1713_v53, 4  ;;  %v7158_v61 = vld [vmem:[%s8867_s16 + $0x70] sm:$0xf] }
  0x77   : > { %v2088_v46 = vsel %vm9050_vm7, %v2086_v35, %v2087_v37  ;;  %v1721_v50 = vshrl.u32 %v7151_v26, 16  ;;  %v1709_v27 = vsel %vm8895_vm4, %v1704_v43, %v1708_v44  ;;  %v1724_v22 = vshll.u32 %v7151_v26, 16 }
  0x78   : > { %v7209_v39 = vcombine.low %v2085_v36, %v2088_v46  ;;  %v2092_v54 = vsel %vm9050_vm7, %v7199_v33, %v2091_v18  ;;  %v2093_v29 = vrot.slane %v2091_v18, 4  ;;  %v1719_v42 = vsel %vm8895_vm4, %v1714_v38, %v1718_v49 }
  0x79   : > { %v1723_v63 = vrot.slane %v1721_v50, 4  ;;  %v1730_v8 = vshll.u32 %v9387_v57, 16  ;;  %8117 = vmatmul.mubr.msk.bf16.vlgmr.msra.gmra.mxu0 %vm659_vm2, %v9285_v55  ;;  %v9421_v31 = vcombine.low %v1709_v27, %v1719_v42  ;;  %v1734_v3 = vshrl.u32 %v9387_v57, 16 }
  0x7a   : > { %v2095_v15 = vsel %vm9050_vm7, %v2093_v29, %v2094_v45  ;;  %v1740_v5 = vshll.u32 %v9393_v32, 16  ;;  %8159 = vmatpush3.bf16.msra.mxu0 %v8865_v13  ;;  %8120 = vmatprep.mubr.msk.bf16.mxu0 %vm659_vm2, %v9333_v52  ;;  %v1726_v12 = vrot.slane %v1724_v22, 5  ;;  %v1745_v47 = vshrl.u32 %v7154_v58, 16  ;;  %v7161_v29 = vld [vmem:[%s8867_s16 + $0x7c] sm:$0xf] }
  0x7b   : > { %v7210_v14 = vcombine.low %v2092_v54, %v2095_v15  ;;  %v1732_v19 = vrot.slane %v1730_v8, 5  ;;  %8143 = vmatmul.mubr.msk.bf16.gmra.mxu1 %vm659_vm2, %v7208_v23  ;;  %v1736_v55 = vrot.slane %v1734_v3, 4  ;;  %v1748_v21 = vshll.u32 %v7154_v58, 16  ;;  %8520 = vmatprep.subr.msk.bf16.mxu0 %vm690_vm0, %v9413_v59  ;;  %v7160_v58 = vld [vmem:[%s8867_s16 + $0x78] sm:$0xf] }
  0x7c   : > { %v1742_v20 = vrot.slane %v1740_v5, 5  ;;  %v1754_v9 = vshll.u32 %v9401_v41, 16  ;;  %8146 = vmatprep.mubr.msk.bf16.mxu1 %vm659_vm2, %v7209_v39  ;;  %v1727_v13 = vor.u32 %v1726_v12, %v1723_v63  ;;  %v1747_v52 = vrot.slane %v1745_v47, 4  ;;  %v7162_v8 = vld [vmem:[%s8867_s16 + $0x80] sm:$0x1] }
  0x7d   : > { %v1758_v7 = vshrl.u32 %v9401_v41, 16  ;;  %v1764_v1 = vshll.u32 %v9408_v30, 16  ;;  %v1737_v2 = vor.u32 %v1736_v55, %v1732_v19  ;;  %v1750_v23 = vrot.slane %v1748_v21, 5  ;;  %v7193_v12 = vld [vmem:[%s8867_s16 + $0x78] sm:$0xe] }
  0x7e   : > { %v1756_v34 = vrot.slane %v1754_v9, 5  ;;  %v7200_v56 = vrot.slane %v7190_v25, 9  ;;  %v1728_v62 = vrot.slane %v1727_v13, 4  ;;  %v2098_v26 = vrot.slane %v9387_v57, 5  ;;  %v7192_v25 = vld [vmem:[%s8867_s16 + $0x6c] sm:$0xe] }
  0x7f   : > { %v1760_v44 = vrot.slane %v1758_v7, 4  ;;  %v1766_v51 = vrot.slane %v1764_v1, 5  ;;  %v1738_v24 = vrot.slane %v1737_v2, 4  ;;  %v1751_v6 = vor.u32 %v1750_v23, %v1747_v52 }
  0x80   : > { %v2101_v49 = vrot.slane %v9393_v32, 5  ;;  %v7201_v60 = vrot.slane %v7191_v28, 9  ;;  %v1733_v11 = vsel %vm8895_vm4, %v1728_v62, %v1732_v19  ;;  %v2099_v33 = vsel %vm9050_vm7, %v7200_v56, %v2098_v26 }
  0x81   : > { %v1761_v37 = vor.u32 %v1760_v44, %v1756_v34  ;;  %v2100_v17 = vrot.slane %v2098_v26, 4  ;;  %8121 = vmatmul.mubr.msk.bf16.gmra.mxu0 %vm659_vm2, %v9352_v0  ;;  %v1743_v53 = vsel %vm8895_vm4, %v1738_v24, %v1742_v20  ;;  %v1752_v36 = vrot.slane %v1751_v6, 4  ;;  %v9460_v0 = vld [vmem:[%s8867_s16 + $0x74] sm:$0x1] }
  0x82   : > { %v2105_v35 = vrot.slane %v9401_v41, 5  ;;  %v2108_v57 = vrot.slane %v9408_v30, 5  ;;  %8124 = vmatprep.mubr.msk.bf16.mxu0 %vm659_vm2, %v9395_v16  ;;  %v7170_v43 = vcombine.low %v1733_v11, %v1743_v53  ;;  %v1769_v32 = vshrl.u32 %v7157_v10, 16  ;;  %v9489_v11 = vld [vmem:[%s8867_s16 + $0x1c] sm:$0xf] }
  0x83   : > { %v1762_v18 = vrot.slane %v1761_v37, 4  ;;  %v2102_v45 = vsel %vm9050_vm7, %v2100_v17, %v2101_v49  ;;  %8147 = vmatmul.mubr.msk.bf16.gmra.mxu1 %vm659_vm2, %v7210_v14  ;;  %v1757_v38 = vsel %vm8895_vm4, %v1752_v36, %v1756_v34  ;;  %v1772_v39 = vshll.u32 %v7157_v10, 16  ;;  %v9494_v36 = vld [vmem:[%s8867_s16 + $0x20] sm:$0x1] }
  0x84   : > { %v7211_v46 = vcombine.low %v2099_v33, %v2102_v45  ;;  %v2106_v16 = vsel %vm9050_vm7, %v7201_v60, %v2105_v35  ;;  %v2107_v50 = vrot.slane %v2105_v35, 4  ;;  %v1771_v27 = vrot.slane %v1769_v32, 4 }
  0x85   : > { %v1767_v41 = vsel %vm8895_vm4, %v1762_v18, %v1766_v51  ;;  %v1778_v54 = vshll.u32 %v7158_v61, 16  ;;  %v1782_v63 = vshrl.u32 %v7158_v61, 16  ;;  %v1788_v22 = vshll.u32 %v9460_v0, 16  ;;  %v7271_v18 = vld [vmem:[%s8867_s16 + $0x24] sm:$0xf] }
  0x86   : > { %v7171_v30 = vcombine.low %v1757_v38, %v1767_v41  ;;  %8150 = vmatprep.mubr.msk.bf16.mxu1 %vm659_vm2, %v7211_v46  ;;  %v2109_v42 = vsel %vm9050_vm7, %v2107_v50, %v2108_v57  ;;  %v1774_v3 = vrot.slane %v1772_v39, 5  ;;  %v1793_v14 = vshrl.u32 %v7160_v58, 16  ;;  %v9506_v46 = vld [vmem:[%s8867_s16 + $0x28] sm:$0xf]  ;;  %v9515_v41 = vld [vmem:[%s8867_s16 + $0x2c] sm:$0x1] }
  0x87   : > { %v7212_v15 = vcombine.low %v2106_v16, %v2109_v42  ;;  %v1780_v5 = vrot.slane %v1778_v54, 5  ;;  %v1784_v19 = vrot.slane %v1782_v63, 4  ;;  %v1790_v47 = vrot.slane %v1788_v22, 5  ;;  %v7274_v42 = vld [vmem:[%s8867_s16 + $0x30] sm:$0xf] }
  0x88   : > { %v1796_v55 = vshll.u32 %v7160_v58, 16  ;;  %v1802_v20 = vshll.u32 %v7161_v29, 16  ;;  %v1775_v21 = vor.u32 %v1774_v3, %v1771_v27  ;;  %v1795_v9 = vrot.slane %v1793_v14, 4 }
  0x89   : > { %v1806_v13 = vshrl.u32 %v7161_v29, 16  ;;  %v1812_v52 = vshll.u32 %v7162_v8, 16  ;;  %8125 = vmatmul.mubr.msk.bf16.gmra.mxu0 %vm659_vm2, %v9421_v31  ;;  %v1785_v7 = vor.u32 %v1784_v19, %v1780_v5  ;;  %v7202_v2 = vrot.slane %v7192_v25, 9  ;;  %v7268_v31 = vld [vmem:[%s8867_s16 + $0x18] sm:$0xf] }
  0x8a   : > { %v1798_v1 = vrot.slane %v1796_v55, 5  ;;  %v1804_v28 = vrot.slane %v1802_v20, 5  ;;  %8128 = vmatprep.mubr.msk.bf16.mxu0 %vm659_vm2, %v7170_v43  ;;  %v1776_v23 = vrot.slane %v1775_v21, 4  ;;  %v2112_v62 = vrot.slane %v7158_v61, 5  ;;  %v8583_v55 = vld [vmem:[%s8867_s16 + $0x18] sm:$0xff]  }
  0x8b   : > { %v1808_v34 = vrot.slane %v1806_v13, 4  ;;  %v1814_v56 = vrot.slane %v1812_v52, 5  ;;  %8151 = vmatmul.mubr.msk.bf16.gmra.mxu1 %vm659_vm2, %v7212_v15  ;;  %v1786_v44 = vrot.slane %v1785_v7, 4  ;;  %v2115_v26 = vrot.slane %v9460_v0, 5  ;;  %v9535_v52 = vld [vmem:[%s8867_s16 + $0x38] sm:$0x1] }
  0x8c   : > { %v1799_v51 = vor.u32 %v1798_v1, %v1795_v9  ;;  %v7203_v24 = vrot.slane %v7193_v12, 9  ;;  %v1781_v6 = vsel %vm8895_vm4, %v1776_v23, %v1780_v5  ;;  %v2113_v60 = vsel %vm9050_vm7, %v7202_v2, %v2112_v62  ;;  %v9527_v5 = vld [vmem:[%s8867_s16 + $0x34] sm:$0xf]  ;;  %v7277_v23 = vld [vmem:[%s8867_s16 + $0x3c] sm:$0xf] }
  0x8d   : > { %v1809_v49 = vor.u32 %v1808_v34, %v1804_v28  ;;  %v2114_v10 = vrot.slane %v2112_v62, 4  ;;  %v1791_v37 = vsel %vm8895_vm4, %v1786_v44, %v1790_v47  ;;  %v2119_v17 = vrot.slane %v7161_v29, 5 }
  0x8e   : > { %v1800_v33 = vrot.slane %v1799_v51, 4  ;;  %v2122_v53 = vrot.slane %v7162_v8, 5  ;;  %v7172_v35 = vcombine.low %v1781_v6, %v1791_v37  ;;  %v2897_v43 = vsel %vm690_vm0, %v9233_v4, 0  ;;  %v9539_v51 = vld [vmem:[%s8867_s16 + $0x40] sm:$0xf] }
  0x8f   : > { %v1810_v57 = vrot.slane %v1809_v49, 4  ;;  %v2116_v61 = vsel %vm9050_vm7, %v2114_v10, %v2115_v26  ;;  %v2120_v32 = vsel %vm9050_vm7, %v7203_v24, %v2119_v17  ;;  %v2121_v38 = vrot.slane %v2119_v17, 4  ;;  %8181 = vmatpush3.bf16.msra.mxu1 %v2897_v43  ;;  %v8584_v43 = vld [vmem:[%s8867_s16 + $0x24] sm:$0xff]  }
  0x90   : > { %v1805_v45 = vsel %vm8895_vm4, %v1800_v33, %v1804_v28  ;;  %v7213_v0 = vcombine.low %v2113_v60, %v2116_v61  ;;  %v9512_v50 = vsel %vm690_vm0, %v9413_v59, 0  ;;  %v2595_v4 = vshrl.u32 %v7268_v31, 16  ;;  %v9549_v33 = vld [vmem:[%s8867_s16 + $0x44] sm:$0x1]  ;;  %v7280_v61 = vld [vmem:[%s8867_s16 + $0x48] sm:$0xf] }
  0x91   : > { %v1815_v16 = vsel %vm8895_vm4, %v1810_v57, %v1814_v56  ;;  %v2598_v58 = vshll.u32 %v7268_v31, 16  ;;  %8129 = vmatmul.mubr.msk.bf16.gmra.mxu0 %vm659_vm2, %v7171_v30  ;;  %v2123_v39 = vsel %vm9050_vm7, %v2121_v38, %v2122_v53  ;;  %v2604_v54 = vshll.u32 %v9489_v11, 16  ;;  %v9558_v38 = vld [vmem:[%s8867_s16 + $0x4c] sm:$0xf] }
  0x92   : > { %v7173_v27 = vcombine.low %v1805_v45, %v1815_v16  ;;  %8154 = vmatprep.mubr.msk.bf16.mxu1 %vm659_vm2, %v7213_v0  ;;  %v2608_v29 = vshrl.u32 %v9489_v11, 16  ;;  %8132 = vmatprep.mubr.msk.bf16.mxu0 %vm659_vm2, %v7172_v35  ;;  %v7214_v59 = vcombine.low %v2120_v32, %v2123_v39  ;;  %v2597_v63 = vrot.slane %v2595_v4, 4  ;;  %v8585_v4 = vld [vmem:[%s8867_s16 + $0x30] sm:$0xff]  }
  0x93   : > { %v2600_v22 = vrot.slane %v2598_v58, 5  ;;  %v2614_v30 = vshll.u32 %v9494_v36, 16  ;;  %v2606_v8 = vrot.slane %v2604_v54, 5  ;;  %v2619_v15 = vshrl.u32 %v7271_v18, 16 }
  0x94   : > { %v2610_v25 = vrot.slane %v2608_v29, 4  ;;  %v2622_v3 = vshll.u32 %v7271_v18, 16  ;;  %8155 = vmatmul.mubr.msk.bf16.gmra.mxu1 %vm659_vm2, %v7214_v59  ;;  %v2628_v19 = vshll.u32 %v9506_v46, 16  ;;  %v2632_v47 = vshrl.u32 %v9506_v46, 16 }
  0x95   : > { %v2601_v14 = vor.u32 %v2600_v22, %v2597_v63  ;;  %v2616_v12 = vrot.slane %v2614_v30, 5  ;;  %v2621_v21 = vrot.slane %v2619_v15, 4  ;;  %v2638_v13 = vshll.u32 %v9515_v41, 16  ;;  %v7283_v15 = vld [vmem:[%s8867_s16 + $0x54] sm:$0xf] }
  0x96   : > { %v2611_v20 = vor.u32 %v2610_v25, %v2606_v8  ;;  %v2624_v9 = vrot.slane %v2622_v3, 5  ;;  %v2630_v1 = vrot.slane %v2628_v19, 5  ;;  %v2634_v28 = vrot.slane %v2632_v47, 4  ;;  %v9568_v25 = vld [vmem:[%s8867_s16 + $0x50] sm:$0x1] }
  0x97   : > { %v2602_v7 = vrot.slane %v2601_v14, 4  ;;  %v2643_v2 = vshrl.u32 %v7274_v42, 16  ;;  %v2640_v62 = vrot.slane %v2638_v13, 5  ;;  %v2646_v44 = vshll.u32 %v7274_v42, 16  ;;  %v9575_v47 = vld [vmem:[%s8867_s16 + $0x58] sm:$0xf] }
  0x98   : > { %v2612_v34 = vrot.slane %v2611_v20, 4  ;;  %v2625_v56 = vor.u32 %v2624_v9, %v2621_v21  ;;  %v2635_v24 = vor.u32 %v2634_v28, %v2630_v1  ;;  %v2652_v6 = vshll.u32 %v9527_v5, 16 }
  0x99   : > { %v2607_v26 = vsel %vm8895_vm4, %v2602_v7, %v2606_v8  ;;  %v2645_v31 = vrot.slane %v2643_v2, 4  ;;  %8133 = vmatmul.mubr.msk.bf16.gmra.mxu0 %vm659_vm2, %v7173_v27  ;;  %v2648_v10 = vrot.slane %v2646_v44, 5  ;;  %v2656_v37 = vshrl.u32 %v9527_v5, 16 }
  0x9a   : > { %v2617_v49 = vsel %vm8895_vm4, %v2612_v34, %v2616_v12  ;;  %v2626_v60 = vrot.slane %v2625_v56, 4  ;;  %8160 = vmatprep.mubr.msk.bf16.mxu0 %vm659_vm2, %v8583_v55  ;;  %v2636_v53 = vrot.slane %v2635_v24, 4  ;;  %v2654_v35 = vrot.slane %v2652_v6, 5  ;;  %v7286_v6 = vld [vmem:[%s8867_s16 + $0x60] sm:$0xf] }
  0x9b   : > { %v7299_v17 = vcombine.low %v2607_v26, %v2617_v49  ;;  %v2662_v57 = vshll.u32 %v9535_v52, 16  ;;  %v2649_v45 = vor.u32 %v2648_v10, %v2645_v31  ;;  %v2658_v0 = vrot.slane %v2656_v37, 4  ;;  %v9594_v37 = vld [vmem:[%s8867_s16 + $0x64] sm:$0xf] }
  0x9c   : > { %v2631_v18 = vsel %vm8895_vm4, %v2626_v60, %v2630_v1  ;;  %v2667_v32 = vshrl.u32 %v7277_v23, 16  ;;  %v2641_v16 = vsel %vm8895_vm4, %v2636_v53, %v2640_v62  ;;  %v2670_v27 = vshll.u32 %v7277_v23, 16  ;;  %v9585_v62 = vld [vmem:[%s8867_s16 + $0x5c] sm:$0x1] }
  0x9d   : > { %8182 = vmatprep.mubr.msk.bf16.mxu1 %vm659_vm2, %v7299_v17  ;;  %v2664_v58 = vrot.slane %v2662_v57, 5  ;;  %v2676_v39 = vshll.u32 %v9539_v51, 16  ;;  %v7300_v54 = vcombine.low %v2631_v18, %v2641_v16  ;;  %v2650_v29 = vrot.slane %v2649_v45, 4  ;;  %v8586_v17 = vld [vmem:[%s8867_s16 + $0x3c] sm:$0xff]   ;;  %v8587_v18 = vld [vmem:[%s8867_s16 + $0x48] sm:$0xff]  }
  0x9e   : > { %v2659_v42 = vor.u32 %v2658_v0, %v2654_v35  ;;  %v2669_v59 = vrot.slane %v2667_v32, 4  ;;  %v2672_v63 = vrot.slane %v2670_v27, 5  ;;  %v2680_v30 = vshrl.u32 %v9539_v51, 16  ;;  %v9602_v16 = vld [vmem:[%s8867_s16 + $0x68] sm:$0x1] }
  0x9f   : > { %v2678_v22 = vrot.slane %v2676_v39, 5  ;;  %v2686_v8 = vshll.u32 %v9549_v33, 16  ;;  %8183 = vmatmul.mubr.msk.bf16.vlgmr.msra.gmra.mxu1 %vm659_vm2, %v7300_v54  ;;  %v2655_v3 = vsel %vm8895_vm4, %v2650_v29, %v2654_v35  ;;  %v2691_v12 = vshrl.u32 %v7280_v61, 16  ;;  %v7289_v54 = vld [vmem:[%s8867_s16 + $0x6c] sm:$0xf] }
  0xa0   : > { %v2660_v14 = vrot.slane %v2659_v42, 4  ;;  %v2694_v19 = vshll.u32 %v7280_v61, 16  ;;  %v2673_v55 = vor.u32 %v2672_v63, %v2669_v59  ;;  %v2682_v20 = vrot.slane %v2680_v30, 4 }
  0xa1   : > { %v2688_v21 = vrot.slane %v2686_v8, 5  ;;  %v2700_v9 = vshll.u32 %v9558_v38, 16  ;;  %8161 = vmatmul.mubr.msk.bf16.vlgmr.msra.gmra.mxu0 %vm659_vm2, %v8584_v43  ;;  %v2693_v7 = vrot.slane %v2691_v12, 4  ;;  %v2704_v28 = vshrl.u32 %v9558_v38, 16 }
  0xa2   : > { %v2665_v13 = vsel %vm8895_vm4, %v2660_v14, %v2664_v58  ;;  %v2696_v1 = vrot.slane %v2694_v19, 5  ;;  %8203 = vmatpush3.bf16.msra.mxu0 %v9512_v50  ;;  %8164 = vmatprep.mubr.msk.bf16.mxu0 %vm659_vm2, %v8585_v4  ;;  %v2674_v23 = vrot.slane %v2673_v55, 4  ;;  %v2683_v34 = vor.u32 %v2682_v20, %v2678_v22 }
  0xa3   : > { %v7301_v2 = vcombine.low %v2655_v3, %v2665_v13  ;;  %v2702_v56 = vrot.slane %v2700_v9, 5  ;;  %v2706_v26 = vrot.slane %v2704_v28, 4  ;;  %v2710_v24 = vshll.u32 %v9568_v25, 16  ;;  %v8588_v28 = vld [vmem:[%s8867_s16 + $0x54] sm:$0xff]  }
  0xa4   : > { %v2697_v44 = vor.u32 %v2696_v1, %v2693_v7  ;;  %v2715_v31 = vshrl.u32 %v7283_v15, 16  ;;  %v2679_v50 = vsel %vm8895_vm4, %v2674_v23, %v2678_v22  ;;  %v2684_v49 = vrot.slane %v2683_v34, 4  ;;  %v9609_v22 = vld [vmem:[%s8867_s16 + $0x70] sm:$0xf]  ;;  %v9620_v7 = vld [vmem:[%s8867_s16 + $0x74] sm:$0x1] }
  0xa5   : > { %8186 = vmatprep.mubr.msk.bf16.mxu1 %vm659_vm2, %v7301_v2  ;;  %v2718_v60 = vshll.u32 %v7283_v15, 16  ;;  %v2724_v10 = vshll.u32 %v9575_v47, 16  ;;  %v2707_v35 = vor.u32 %v2706_v26, %v2702_v56  ;;  %v2712_v57 = vrot.slane %v2710_v24, 5  ;;  %v7292_v1 = vld [vmem:[%s8867_s16 + $0x78] sm:$0xf] }
  0xa6   : > { %v2698_v53 = vrot.slane %v2697_v44, 4  ;;  %v2717_v61 = vrot.slane %v2715_v31, 4  ;;  %v2689_v43 = vsel %vm8895_vm4, %v2684_v49, %v2688_v21  ;;  %v2728_v32 = vshrl.u32 %v9575_v47, 16  ;;  %v9628_v44 = vld [vmem:[%s8867_s16 + $0x7c] sm:$0xf]  ;;  %v8589_v49 = vld [vmem:[%s8867_s16 + $0x60] sm:$0xff]  }
  0xa7   : > { %v2720_v45 = vrot.slane %v2718_v60, 5  ;;  %v2726_v0 = vrot.slane %v2724_v10, 5  ;;  %v7302_v4 = vcombine.low %v2679_v50, %v2689_v43  ;;  %v2708_v27 = vrot.slane %v2707_v35, 4  ;;  %v9636_v43 = vld [vmem:[%s8867_s16 + $0x80] sm:$0x1] }
  0xa8   : > { %v2703_v58 = vsel %vm8895_vm4, %v2698_v53, %v2702_v56  ;;  %v2734_v39 = vshll.u32 %v9585_v62, 16  ;;  %v2730_v42 = vrot.slane %v2728_v32, 4  ;;  %v2739_v59 = vshrl.u32 %v7286_v6, 16 }
  0xa9   : > { %v2721_v29 = vor.u32 %v2720_v45, %v2717_v61  ;;  %v2742_v63 = vshll.u32 %v7286_v6, 16  ;;  %8165 = vmatmul.mubr.msk.bf16.gmra.mxu0 %vm659_vm2, %v8586_v17  ;;  %8187 = vmatmul.mubr.msk.bf16.gmra.mxu1 %vm659_vm2, %v7302_v4  ;;  %v2713_v30 = vsel %vm8895_vm4, %v2708_v27, %v2712_v57  ;;  %v2748_v15 = vshll.u32 %v9594_v37, 16 }
  0xaa   : > { %v2736_v8 = vrot.slane %v2734_v39, 5  ;;  %v2752_v3 = vshrl.u32 %v9594_v37, 16  ;;  %8168 = vmatprep.mubr.msk.bf16.mxu0 %vm659_vm2, %v8587_v18  ;;  %v7303_v14 = vcombine.low %v2703_v58, %v2713_v30  ;;  %v2731_v19 = vor.u32 %v2730_v42, %v2726_v0  ;;  %v7295_v18 = vld [vmem:[%s8867_s16 + $0x84] sm:$0xf]  ;;  %v9641_v58 = vld [vmem:[%s8867_s16 + $0x88] sm:$0xf] }
  0xab   : > { %v2722_v12 = vrot.slane %v2721_v29, 4  ;;  %v2741_v55 = vrot.slane %v2739_v59, 4  ;;  %v2744_v20 = vrot.slane %v2742_v63, 5  ;;  %v2750_v21 = vrot.slane %v2748_v15, 5 }
  0xac   : > { %v2754_v9 = vrot.slane %v2752_v3, 4  ;;  %v2758_v13 = vshll.u32 %v9602_v16, 16  ;;  %8190 = vmatprep.mubr.msk.bf16.mxu1 %vm659_vm2, %v7303_v14  ;;  %v2732_v23 = vrot.slane %v2731_v19, 4  ;;  %v2763_v34 = vshrl.u32 %v7289_v54, 16  ;;  %v7319_v19 = vld [vmem:[%s8867_s16 + $0x18] sm:$0xe] }
  0xad   : > { %v2727_v2 = vsel %vm8895_vm4, %v2722_v12, %v2726_v0  ;;  %v2766_v56 = vshll.u32 %v7289_v54, 16  ;;  %v2745_v26 = vor.u32 %v2744_v20, %v2741_v55  ;;  %v2772_v6 = vshll.u32 %v9609_v22, 16  ;;  %v9653_v12 = vld [vmem:[%s8867_s16 + $0x8c] sm:$0x1] }
  0xae   : > { %v2755_v24 = vor.u32 %v2754_v9, %v2750_v21  ;;  %v2760_v31 = vrot.slane %v2758_v13, 5  ;;  %v2737_v50 = vsel %vm8895_vm4, %v2732_v23, %v2736_v8  ;;  %v2765_v60 = vrot.slane %v2763_v34, 4  ;;  %v8590_v13 = vld [vmem:[%s8867_s16 + $0x6c] sm:$0xff]  }
  0xaf   : > { %v2768_v10 = vrot.slane %v2766_v56, 5  ;;  %v2776_v17 = vshrl.u32 %v9609_v22, 16  ;;  %v7304_v53 = vcombine.low %v2727_v2, %v2737_v50  ;;  %v2746_v35 = vrot.slane %v2745_v26, 4  ;;  %v8591_v56 = vld [vmem:[%s8867_s16 + $0x78] sm:$0xff]  }
  0xb0   : > { %v2756_v57 = vrot.slane %v2755_v24, 4  ;;  %v2774_v61 = vrot.slane %v2772_v6, 5  ;;  %v2782_v32 = vshll.u32 %v9620_v7, 16  ;;  %v2787_v4 = vshrl.u32 %v7292_v1, 16 }
  0xb1   : > { %v2769_v45 = vor.u32 %v2768_v10, %v2765_v60  ;;  %v2778_v0 = vrot.slane %v2776_v17, 4  ;;  %8169 = vmatmul.mubr.msk.bf16.gmra.mxu0 %vm659_vm2, %v8588_v28  ;;  %8191 = vmatmul.mubr.msk.bf16.gmra.mxu1 %vm659_vm2, %v7304_v53  ;;  %v2751_v27 = vsel %vm8895_vm4, %v2746_v35, %v2750_v21  ;;  %v2790_v54 = vshll.u32 %v7292_v1, 16  ;;  %v7320_v10 = vld [vmem:[%s8867_s16 + $0x24] sm:$0xe] }
  0xb2   : > { %v2761_v39 = vsel %vm8895_vm4, %v2756_v57, %v2760_v31  ;;  %v2796_v29 = vshll.u32 %v9628_v44, 16  ;;  %8172 = vmatprep.mubr.msk.bf16.mxu0 %vm659_vm2, %v8589_v49  ;;  %v2784_v30 = vrot.slane %v2782_v32, 5  ;;  %v2789_v8 = vrot.slane %v2787_v4, 4 }
  0xb3   : > { %v7305_v42 = vcombine.low %v2751_v27, %v2761_v39  ;;  %v2770_v59 = vrot.slane %v2769_v45, 4  ;;  %v2779_v63 = vor.u32 %v2778_v0, %v2774_v61  ;;  %v2792_v15 = vrot.slane %v2790_v54, 5  ;;  %v7321_v39 = vld [vmem:[%s8867_s16 + $0x30] sm:$0xe] }
  0xb4   : > { %v2798_v3 = vrot.slane %v2796_v29, 5  ;;  %v2800_v14 = vshrl.u32 %v9628_v44, 16  ;;  %v2806_v21 = vshll.u32 %v9636_v43, 16  ;;  %v2811_v9 = vshrl.u32 %v7295_v18, 16 }
  0xb5   : > { %8194 = vmatprep.mubr.msk.bf16.mxu1 %vm659_vm2, %v7305_v42  ;;  %v2775_v55 = vsel %vm8895_vm4, %v2770_v59, %v2774_v61  ;;  %v2780_v20 = vrot.slane %v2779_v63, 4  ;;  %v2793_v1 = vor.u32 %v2792_v15, %v2789_v8  ;;  %v2814_v2 = vshll.u32 %v7295_v18, 16  ;;  %v8592_v63 = vld [vmem:[%s8867_s16 + $0x84] sm:$0xff]  }
  0xb6   : > { %v2802_v28 = vrot.slane %v2800_v14, 4  ;;  %v2820_v23 = vshll.u32 %v9641_v58, 16  ;;  %v2808_v26 = vrot.slane %v2806_v21, 5  ;;  %v2813_v24 = vrot.slane %v2811_v9, 4 }
  0xb7   : > { %v2785_v34 = vsel %vm8895_vm4, %v2780_v20, %v2784_v30  ;;  %v2824_v31 = vshrl.u32 %v9641_v58, 16  ;;  %v2794_v50 = vrot.slane %v2793_v1, 4  ;;  %v2816_v60 = vrot.slane %v2814_v2, 5 }
  0xb8   : > { %v7306_v6 = vcombine.low %v2775_v55, %v2785_v34  ;;  %v2803_v49 = vor.u32 %v2802_v28, %v2798_v3  ;;  %v2822_v17 = vrot.slane %v2820_v23, 5  ;;  %v2830_v35 = vshll.u32 %v9653_v12, 16  ;;  %v7322_v28 = vld [vmem:[%s8867_s16 + $0x3c] sm:$0xe]  ;;  %v7323_v23 = vld [vmem:[%s8867_s16 + $0x48] sm:$0xe] }
  0xb9   : > { %v2826_v53 = vrot.slane %v2824_v31, 4  ;;  %v7329_v57 = vrot.slane %v7319_v19, 9  ;;  %8173 = vmatmul.mubr.msk.bf16.gmra.mxu0 %vm659_vm2, %v8590_v13  ;;  %v2799_v61 = vsel %vm8895_vm4, %v2794_v50, %v2798_v3  ;;  %v2817_v45 = vor.u32 %v2816_v60, %v2813_v24  ;;  %v7325_v31 = vld [vmem:[%s8867_s16 + $0x60] sm:$0xe]  ;;  %v7326_v60 = vld [vmem:[%s8867_s16 + $0x6c] sm:$0xe] }
  0xba   : > { %8195 = vmatmul.mubr.msk.bf16.gmra.mxu1 %vm659_vm2, %v7306_v6  ;;  %v2804_v18 = vrot.slane %v2803_v49, 4  ;;  %v3074_v0 = vrot.slane %v9489_v11, 5  ;;  %8176 = vmatprep.mubr.msk.bf16.mxu0 %vm659_vm2, %v8591_v56  ;;  %v2832_v4 = vrot.slane %v2830_v35, 5  ;;  %v3077_v27 = vrot.slane %v9494_v36, 5  ;;  %v7327_v35 = vld [vmem:[%s8867_s16 + $0x78] sm:$0xe] }
  0xbb   : > { %v2827_v32 = vor.u32 %v2826_v53, %v2822_v17  ;;  %v2818_v29 = vrot.slane %v2817_v45, 4  ;;  %v7330_v11 = vrot.slane %v7320_v10, 9  ;;  %v3081_v15 = vrot.slane %v9506_v46, 5 }
  0xbc   : > { %v2809_v54 = vsel %vm8895_vm4, %v2804_v18, %v2808_v26  ;;  %v3075_v42 = vsel %vm9050_vm7, %v7329_v57, %v3074_v0  ;;  %v3076_v59 = vrot.slane %v3074_v0, 4  ;;  %v3084_v14 = vrot.slane %v9515_v41, 5  ;;  %v7324_v26 = vld [vmem:[%s8867_s16 + $0x54] sm:$0xe] }
  0xbd   : > { %v7307_v30 = vcombine.low %v2799_v61, %v2809_v54  ;;  %v2828_v8 = vrot.slane %v2827_v32, 4  ;;  %v2823_v3 = vsel %vm8895_vm4, %v2818_v29, %v2822_v17  ;;  %v3088_v19 = vrot.slane %v9527_v5, 5 }
  0xbe   : > { %v3078_v36 = vsel %vm9050_vm7, %v3076_v59, %v3077_v27  ;;  %v3083_v21 = vrot.slane %v3081_v15, 4  ;;  %v7331_v46 = vrot.slane %v7321_v39, 9  ;;  %v3091_v1 = vrot.slane %v9535_v52, 5 }
  0xbf   : > { %8198 = vmatprep.mubr.msk.bf16.mxu1 %vm659_vm2, %v7307_v30  ;;  %v2833_v55 = vsel %vm8895_vm4, %v2828_v8, %v2832_v4  ;;  %v7340_v20 = vcombine.low %v3075_v42, %v3078_v36  ;;  %v3090_v13 = vrot.slane %v3088_v19, 4  ;;  %v3095_v41 = vrot.slane %v9539_v51, 5 }
  0xc0   : > { %v7308_v9 = vcombine.low %v2823_v3, %v2833_v55  ;;  %v3082_v5 = vsel %vm9050_vm7, %v7330_v11, %v3081_v15  ;;  %v3085_v2 = vsel %vm9050_vm7, %v3083_v21, %v3084_v14  ;;  %v3089_v52 = vsel %vm9050_vm7, %v7331_v46, %v3088_v19  ;;  %v7328_v55 = vld [vmem:[%s8867_s16 + $0x84] sm:$0xe]  ;;  %s7012_s16 = sshll.u32 %s11756_s28, 5 }
  0xc1   : > { %8177 = vmatmul.mubr.msk.bf16.gmra.mxu0 %vm659_vm2, %v8592_v63  ;;  %v3092_v34 = vsel %vm9050_vm7, %v3090_v13, %v3091_v1  ;;  %v3102_v56 = vrot.slane %v9558_v38, 5  ;;  %v7332_v51 = vrot.slane %v7322_v28, 9  ;;  %v3098_v24 = vrot.slane %v9549_v33, 5  ;;  %s11488_s17 = sadd.s32 %s7012_s16, %s11758_s25 }
  0xc2   : > { %8199 = vmatmul.mubr.msk.bf16.gmra.mxu1 %vm659_vm2, %v7308_v9  ;;  %8204 = vmatprep.mubr.msk.bf16.mxu0 %vm659_vm2, %v7340_v20  ;;  %v7341_v6 = vcombine.low %v3082_v5, %v3085_v2  ;;  %v3097_v50 = vrot.slane %v3095_v41, 4  ;;  %v3109_v49 = vrot.slane %v9575_v47, 5  ;;  %v7342_v10 = vcombine.low %v3089_v52, %v3092_v34  ;;  %s7013_s18 = sshll.u32 %s11488_s17, 2 }
  0xc3   : > { %v7333_v17 = vrot.slane %v7323_v23, 9  ;;  %v3116_v53 = vrot.slane %v9594_v37, 5  ;;  %v3104_v57 = vrot.slane %v3102_v56, 4  ;;  %v3105_v61 = vrot.slane %v9568_v25, 5  ;;  %s11515_s21 = scalar_lea.vmem %s11595_s7, %s7013_s18 }
  0xc4   : > { %v7334_v18 = vrot.slane %v7324_v26, 9  ;;  %v3123_v38 = vrot.slane %v9609_v22, 5  ;;  %v3112_v45 = vrot.slane %v9585_v62, 5  ;;  %v3130_v33 = vrot.slane %v9628_v44, 5 }
  0xc5   : > { %v3096_v47 = vsel %vm9050_vm7, %v7332_v51, %v3095_v41  ;;  %v3099_v0 = vsel %vm9050_vm7, %v3097_v50, %v3098_v24  ;;  %v3111_v37 = vrot.slane %v3109_v49, 4  ;;  %v7335_v32 = vrot.slane %v7325_v31, 9 }
  0xc6   : > { %v3118_v25 = vrot.slane %v3116_v53, 4  ;;  %v3119_v4 = vrot.slane %v9602_v16, 5  ;;  %v7336_v22 = vrot.slane %v7326_v60, 9  ;;  %v3126_v62 = vrot.slane %v9620_v7, 5 }
  0xc7   : > { %v3103_v44 = vsel %vm9050_vm7, %v7333_v17, %v3102_v56  ;;  %v3106_v27 = vsel %vm9050_vm7, %v3104_v57, %v3105_v61  ;;  %v3125_v39 = vrot.slane %v3123_v38, 4  ;;  %v7337_v54 = vrot.slane %v7327_v35, 9 }
  0xc8   : > { %v3132_v29 = vrot.slane %v3130_v33, 4  ;;  %v3133_v42 = vrot.slane %v9636_v43, 5  ;;  %v7343_v59 = vcombine.low %v3096_v47, %v3099_v0  ;;  %v7344_v63 = vcombine.low %v3103_v44, %v3106_v27 }
  0xc9   : > { %8205 = vmatmul.mubr.msk.bf16.vlgmr.msra.gmra.mxu0 %vm659_vm2, %v7341_v6  ;;  %v3110_v16 = vsel %vm9050_vm7, %v7334_v18, %v3109_v49  ;;  %v3113_v7 = vsel %vm9050_vm7, %v3111_v37, %v3112_v45  ;;  %v3117_v30 = vsel %vm9050_vm7, %v7335_v32, %v3116_v53  ;;  %v3120_v8 = vsel %vm9050_vm7, %v3118_v25, %v3119_v4 }
  0xca   : > { %8208 = vmatprep.mubr.msk.bf16.mxu0 %vm659_vm2, %v7342_v10  ;;  %v7345_v43 = vcombine.low %v3110_v16, %v3113_v7  ;;  %v7346_v11 = vcombine.low %v3117_v30, %v3120_v8  ;;  %v3124_v15 = vsel %vm9050_vm7, %v7336_v22, %v3123_v38  ;;  %v3127_v3 = vsel %vm9050_vm7, %v3125_v39, %v3126_v62 }
  0xcb   : > { %v3137_v36 = vrot.slane %v9641_v58, 5  ;;  %v3131_v14 = vsel %vm9050_vm7, %v7337_v54, %v3130_v33  ;;  %v3134_v19 = vsel %vm9050_vm7, %v3132_v29, %v3133_v42  ;;  %v7347_v20 = vcombine.low %v3124_v15, %v3127_v3 }
  0xcc   : > { %v7348_v21 = vcombine.low %v3131_v14, %v3134_v19  ;;  %v7338_v46 = vrot.slane %v7328_v55, 9  ;;  %v3140_v13 = vrot.slane %v9653_v12, 5  ;;  %vm3789_vm13 = vsmask.f32 7938 }
  0xcd   : > { %v3139_v9 = vrot.slane %v3137_v36, 4  ;;  %vm3585_vm3 = vsmask.f32 256  ;;  %vm3586_vm5 = vsmask.f32 4368 }
  0xce   : > { %v3138_v58 = vsel %vm9050_vm7, %v7338_v46, %v3137_v36 }
  0xcf   : > { %v3141_v41 = vsel %vm9050_vm7, %v3139_v9, %v3140_v13 }
  0xd0   : > { %v7349_v23 = vcombine.low %v3138_v58, %v3141_v41  ;;  %v8595_v58 = vld [vmem:[%s11592_s4 + $0xb8] sm:$0xff]  }
  0xd1   : > { %8209 = vmatmul.mubr.msk.bf16.gmra.mxu0 %vm659_vm2, %v7343_v59  ;;  %8288 = vmatprep.subr.bf16.mxu0 %v8595_v58 }
  0xd2   : > { %8212 = vmatprep.mubr.msk.bf16.mxu0 %vm659_vm2, %v7344_v63  ;;  %8289 = vmatpush3.bf16.msra.mxu0 %v8595_v58 }
  0xd9   : > { %8213 = vmatmul.mubr.msk.bf16.gmra.mxu0 %vm659_vm2, %v7345_v43 }
  0xda   : > { %8216 = vmatprep.mubr.msk.bf16.mxu0 %vm659_vm2, %v7346_v11 }
  0xdf   : > { %v8052_v1 = vpop.f32.mrf.mxu1 }
  0xe1   : > { %8217 = vmatmul.mubr.msk.bf16.gmra.mxu0 %vm659_vm2, %v7347_v20  ;;  %v924_v28 = vpop.f32.mrf.mxu1 }
  0xe2   : > { %8220 = vmatprep.mubr.msk.bf16.mxu0 %vm659_vm2, %v7348_v21 }
  0xe3   : > { %v8053_v5 = vpop.f32.mrf.mxu1 }
  0xe5   : > { %v8030_v2 = vpop.f32.mrf.mxu0  ;;  %v9760_v52 = vpop.f32.mrf.mxu1 }
  0xe6   : > { %v933_v34 = vadd.f32 %v8052_v1, %v8030_v2  ;;  %v8731_v2 = vmov 0  }
  0xe7   : > { %v728_v56 = vpop.f32.mrf.mxu0  ;;  %v8056_v12 = vpop.f32.mrf.mxu1  ;;  %3498 = vst [vmem:[#allocation2 + $0xc] sm:$0xf] %v8731_v2  ;;  %3495 = vst [vmem:[#allocation2] sm:$0xf] %v8731_v2 }
  0xe8   : > { %v9762_v26 = vadd.f32 %v924_v28, %v728_v56  ;;  %3496 = vst [vmem:[#allocation2 + $0x4] sm:$0xf] %v8731_v2  ;;  %3497 = vst [vmem:[#allocation2 + $0x8] sm:$0x1] %v8731_v2 }
  0xe9   : > { %8221 = vmatmul.mubr.msk.bf16.gmra.mxu0 %vm659_vm2, %v7349_v23  ;;  %v8031_v51 = vpop.f32.mrf.mxu0  ;;  %v940_v24 = vpop.f32.mrf.mxu1  ;;  %3499 = vst [vmem:[#allocation2 + $0x10] sm:$0xf] %v8731_v2  ;;  %3500 = vst [vmem:[#allocation2 + $0x14] sm:$0x1] %v8731_v2 }
  0xea   : > { %v9765_v31 = vadd.f32 %v8053_v5, %v8031_v51  ;;  %3501 = vst [vmem:[#allocation2 + $0x18] sm:$0xf] %v8731_v2  ;;  %3502 = vst [vmem:[#allocation2 + $0x1c] sm:$0xf] %v8731_v2  ;;  %v8593_v51 = vld [vmem:[%s11592_s4 + $0x78] sm:$0xff]  }
  0xeb   : > { %v9767_v6 = vpop.f32.mrf.mxu0  ;;  %v8057_v50 = vpop.f32.mrf.mxu1  ;;  %3503 = vst [vmem:[#allocation2 + $0x20] sm:$0x1] %v8731_v2  ;;  %3504 = vst [vmem:[#allocation2 + $0x24] sm:$0xf] %v8731_v2  ;;  %8224 = vmatprep.subr.bf16.mxu1 %v8593_v51 }
  0xec   : > { %3505 = vst [vmem:[#allocation2 + $0x28] sm:$0xf] %v8731_v2  ;;  %3506 = vst [vmem:[#allocation2 + $0x2c] sm:$0x1] %v8731_v2  ;;  %8225 = vmatpush3.bf16.msra.mxu1 %v8593_v51 }
  0xed   : > { %v9769_v49 = vpop.f32.mrf.mxu1  ;;  %3507 = vst [vmem:[#allocation2 + $0x30] sm:$0xf] %v8731_v2  ;;  %3508 = vst [vmem:[#allocation2 + $0x34] sm:$0xf] %v8731_v2 }
  0xee   : > { %3509 = vst [vmem:[#allocation2 + $0x38] sm:$0x1] %v8731_v2  ;;  %3510 = vst [vmem:[#allocation2 + $0x3c] sm:$0xf] %v8731_v2 }
  0xef   : > { %v8034_v60 = vpop.f32.mrf.mxu0  ;;  %3511 = vst [vmem:[#allocation2 + $0x40] sm:$0xf] %v8731_v2  ;;  %3512 = vst [vmem:[#allocation2 + $0x44] sm:$0x1] %v8731_v2 }
  0xf0   : > { %v9771_v10 = vadd.f32 %v8056_v12, %v8034_v60  ;;  %3513 = vst [vmem:[#allocation2 + $0x48] sm:$0xf] %v8731_v2  ;;  %3514 = vst [vmem:[#allocation2 + $0x4c] sm:$0xf] %v8731_v2 }
  0xf1   : > { %v744_v17 = vpop.f32.mrf.mxu0  ;;  %v8060_v53 = vpop.f32.mrf.mxu1  ;;  %3515 = vst [vmem:[#allocation2 + $0x50] sm:$0x1] %v8731_v2  ;;  %3516 = vst [vmem:[#allocation2 + $0x54] sm:$0xf] %v8731_v2 }
  0xf2   : > { %v9773_v35 = vadd.f32 %v940_v24, %v744_v17  ;;  %3517 = vst [vmem:[#allocation2 + $0x58] sm:$0xf] %v8731_v2  ;;  %3518 = vst [vmem:[#allocation2 + $0x5c] sm:$0x1] %v8731_v2 }
  0xf3   : > { %v8035_v57 = vpop.f32.mrf.mxu0  ;;  %v956_v61 = vpop.f32.mrf.mxu1  ;;  %3519 = vst [vmem:[#allocation2 + $0x60] sm:$0xf] %v8731_v2  ;;  %3520 = vst [vmem:[#allocation2 + $0x64] sm:$0xf] %v8731_v2 }
  0xf4   : > { %v9775_v18 = vadd.f32 %v8057_v50, %v8035_v57  ;;  %3521 = vst [vmem:[#allocation2 + $0x68] sm:$0x1] %v8731_v2  ;;  %3522 = vst [vmem:[#allocation2 + $0x6c] sm:$0xf] %v8731_v2 }
  0xf5   : > { %v9777_v38 = vpop.f32.mrf.mxu0  ;;  %v8061_v45 = vpop.f32.mrf.mxu1  ;;  %3523 = vst [vmem:[#allocation2 + $0x70] sm:$0xf] %v8731_v2  ;;  %3524 = vst [vmem:[#allocation2 + $0x74] sm:$0x1] %v8731_v2 }
  0xf7   : > { %v8038_v33 = vpop.f32.mrf.mxu0  ;;  %v9779_v47 = vpop.f32.mrf.mxu1 }
  0xf8   : > { %v9781_v0 = vadd.f32 %v8060_v53, %v8038_v33 }
  0xf9   : > { %v760_v37 = vpop.f32.mrf.mxu0  ;;  %v8064_v32 = vpop.f32.mrf.mxu1 }
  0xfa   : > { %v9783_v25 = vadd.f32 %v956_v61, %v760_v37  ;;  %v8596_v61 = vld [vmem:[%s11592_s4 + $0xb0] sm:$0xff]  }
  0xfb   : > { %v8039_v4 = vpop.f32.mrf.mxu0  ;;  %v972_v22 = vpop.f32.mrf.mxu1  ;;  %8290 = vmatprep.subr.bf16.mxu0 %v8596_v61 }
  0xfc   : > { %v9785_v62 = vadd.f32 %v8061_v45, %v8039_v4  ;;  %8291 = vmatpush3.bf16.msra.mxu0 %v8596_v61 }
  0xfd   : > { %v9787_v44 = vpop.f32.mrf.mxu0  ;;  %v8065_v27 = vpop.f32.mrf.mxu1 }
  0xff   : > { %v9789_v39 = vpop.f32.mrf.mxu1 }
 0x101   : > { %v8042_v54 = vpop.f32.mrf.mxu0 }
 0x102   : > { %v9791_v29 = vadd.f32 %v8064_v32, %v8042_v54 }
 0x103   : > { %v776_v42 = vpop.f32.mrf.mxu0  ;;  %v8068_v59 = vpop.f32.mrf.mxu1 }
 0x104   : > { %v9793_v63 = vadd.f32 %v972_v22, %v776_v42 }
 0x105   : > { %v8043_v16 = vpop.f32.mrf.mxu0  ;;  %v988_v7 = vpop.f32.mrf.mxu1 }
 0x106   : > { %v9795_v30 = vadd.f32 %v8065_v27, %v8043_v16 }
 0x107   : > { %v9797_v8 = vpop.f32.mrf.mxu0  ;;  %v8069_v43 = vpop.f32.mrf.mxu1 }
 0x109   : > { %v8046_v11 = vpop.f32.mrf.mxu0  ;;  %v9799_v15 = vpop.f32.mrf.mxu1 }
 0x10a   : > { %v9801_v3 = vadd.f32 %v8068_v59, %v8046_v11 }
 0x10b   : > { %v792_v36 = vpop.f32.mrf.mxu0  ;;  %v8096_v14 = vpop.f32.mrf.mxu1 }
 0x10c   : > { %v9803_v19 = vadd.f32 %v988_v7, %v792_v36 }
 0x10d   : > { %v8047_v55 = vpop.f32.mrf.mxu0  ;;  %v1447_v20 = vpop.f32.mrf.mxu1 }
 0x10e   : > { %v9805_v21 = vadd.f32 %v8069_v43, %v8047_v55 }
 0x10f   : > { %v9807_v46 = vpop.f32.mrf.mxu0  ;;  %v8097_v9 = vpop.f32.mrf.mxu1 }
 0x111   : > { %v8074_v13 = vpop.f32.mrf.mxu0  ;;  %v9809_v1 = vpop.f32.mrf.mxu1 }
 0x112   : > { %v1286_v28 = vadd.f32 %v8074_v13, %v933_v34 }
 0x113   : > { %v1205_v41 = vpop.f32.mrf.mxu0  ;;  %v8100_v5 = vpop.f32.mrf.mxu1 }
 0x114   : > { %v1284_v23 = vadd.f32 %v1205_v41, %v9762_v26  ;;  %v9815_v34 = vadd.f32 %v8096_v14, %v1286_v28  ;;  %v8600_v28 = vld [vmem:[%s11592_s4 + $0xa0] sm:$0xff]  }
 0x115   : > { %v8075_v56 = vpop.f32.mrf.mxu0  ;;  %v1463_v12 = vpop.f32.mrf.mxu1 }
 0x116   : > { %v1287_v24 = vadd.f32 %v8075_v56, %v9765_v31  ;;  %v9821_v50 = vadd.f32 %v1447_v20, %v1284_v23  ;;  %v8594_v31 = vld [vmem:[%s11592_s4 + $0x70] sm:$0xff]   ;;  %v8599_v56 = vld [vmem:[%s11592_s4 + $0x60] sm:$0xff]  }
 0x117   : > { %v9823_v60 = vpop.f32.mrf.mxu0  ;;  %v8101_v17 = vpop.f32.mrf.mxu1  ;;  %8226 = vmatprep.subr.bf16.mxu1 %v8594_v31 }
 0x118   : > { %v9825_v53 = vadd.f32 %v8097_v9, %v1287_v24  ;;  %8227 = vmatpush3.bf16.msra.mxu1 %v8594_v31  ;;  %v8602_v24 = vld [vmem:[%s11592_s4 + $0x98] sm:$0xff]  }
 0x119   : > { %v8078_v26 = vpop.f32.mrf.mxu0  ;;  %v9827_v57 = vpop.f32.mrf.mxu1 }
 0x11a   : > { %v1290_v45 = vadd.f32 %v8078_v26, %v9771_v10 }
 0x11b   : > { %v1221_v33 = vpop.f32.mrf.mxu0  ;;  %v8104_v37 = vpop.f32.mrf.mxu1 }
 0x11c   : > { %v1288_v32 = vadd.f32 %v1221_v33, %v9773_v35  ;;  %v9837_v4 = vadd.f32 %v8100_v5, %v1290_v45  ;;  %v8598_v35 = vld [vmem:[%s11592_s4 + $0xa8] sm:$0xff]  }
 0x11d   : > { %v8079_v22 = vpop.f32.mrf.mxu0  ;;  %v1479_v27 = vpop.f32.mrf.mxu1  ;;  %8292 = vmatprep.subr.bf16.mxu0 %v8598_v35 }
 0x11e   : > { %v1291_v54 = vadd.f32 %v8079_v22, %v9775_v18  ;;  %v9840_v42 = vadd.f32 %v1463_v12, %v1288_v32  ;;  %v8597_v18 = vld [vmem:[%s11592_s4 + $0x68] sm:$0xff]   ;;  %8293 = vmatpush3.bf16.msra.mxu0 %v8598_v35  ;;  %v8601_v32 = vld [vmem:[%s11592_s4 + $0x58] sm:$0xff]  }
 0x11f   : > { %v9842_v10 = vpop.f32.mrf.mxu0  ;;  %v8105_v59 = vpop.f32.mrf.mxu1  ;;  %8228 = vmatprep.subr.bf16.mxu1 %v8597_v18  ;;  %8294 = vmatprep.subr.bf16.mxu0 %v8600_v28 }
 0x120   : > { %v9844_v16 = vadd.f32 %v8101_v17, %v1291_v54  ;;  %8229 = vmatpush3.bf16.msra.mxu1 %v8597_v18 }
 0x121   : > { %v8082_v7 = vpop.f32.mrf.mxu0  ;;  %v9846_v43 = vpop.f32.mrf.mxu1  ;;  %8230 = vmatprep.subr.bf16.mxu1 %v8599_v56 }
 0x122   : > { %v1294_v11 = vadd.f32 %v8082_v7, %v9781_v0  ;;  %8295 = vmatpush3.bf16.msra.mxu0 %v8600_v28  ;;  %v8604_v7 = vld [vmem:[%s11592_s4 + $0x90] sm:$0xff]   ;;  %v8605_v28 = vld [vmem:[%s11592_s4 + $0x88] sm:$0xff]  }
 0x123   : > { %v1237_v36 = vpop.f32.mrf.mxu0  ;;  %v8108_v14 = vpop.f32.mrf.mxu1  ;;  %8296 = vmatprep.subr.bf16.mxu0 %v8602_v24 }
 0x124   : > { %v1292_v55 = vadd.f32 %v1237_v36, %v9783_v25  ;;  %v9856_v20 = vadd.f32 %v8104_v37, %v1294_v11  ;;  %8231 = vmatpush3.bf16.msra.mxu1 %v8599_v56 }
 0x125   : > { %v8083_v9 = vpop.f32.mrf.mxu0  ;;  %v1495_v13 = vpop.f32.mrf.mxu1  ;;  %8232 = vmatprep.subr.bf16.mxu1 %v8601_v32 }
 0x126   : > { %v1295_v0 = vadd.f32 %v8083_v9, %v9785_v62  ;;  %v9862_v58 = vadd.f32 %v1479_v27, %v1292_v55  ;;  %8297 = vmatpush3.bf16.msra.mxu0 %v8602_v24 }
 0x127   : > { %v9864_v41 = vpop.f32.mrf.mxu0  ;;  %v8109_v5 = vpop.f32.mrf.mxu1  ;;  %8298 = vmatprep.subr.bf16.mxu0 %v8604_v7 }
 0x128   : > { %v9866_v25 = vadd.f32 %v8105_v59, %v1295_v0  ;;  %8233 = vmatpush3.bf16.msra.mxu1 %v8601_v32 }
 0x129   : > { %v8086_v2 = vpop.f32.mrf.mxu0  ;;  %v9868_v23 = vpop.f32.mrf.mxu1 }
 0x12a   : > { %v1298_v12 = vadd.f32 %v8086_v2, %v9791_v29  ;;  %8299 = vmatpush3.bf16.msra.mxu0 %v8604_v7 }
 0x12b   : > { %v1253_v62 = vpop.f32.mrf.mxu0  ;;  %v8112_v51 = vpop.f32.mrf.mxu1  ;;  %8300 = vmatprep.subr.bf16.mxu0 %v8605_v28 }
 0x12c   : > { %v1296_v17 = vadd.f32 %v1253_v62, %v9793_v63  ;;  %v9878_v26 = vadd.f32 %v8108_v14, %v1298_v12  ;;  %v8606_v62 = vld [vmem:[%s11592_s4 + $0x48] sm:$0xff]  }
 0x12d   : > { %v8087_v61 = vpop.f32.mrf.mxu0  ;;  %v1511_v45 = vpop.f32.mrf.mxu1 }
 0x12e   : > { %v1299_v31 = vadd.f32 %v8087_v61, %v9795_v30  ;;  %v9881_v33 = vadd.f32 %v1495_v13, %v1296_v17  ;;  %v8603_v13 = vld [vmem:[%s11592_s4 + $0x50] sm:$0xff]   ;;  %8301 = vmatpush3.bf16.msra.mxu0 %v8605_v28 }
 0x12f   : > { %v9883_v29 = vpop.f32.mrf.mxu0  ;;  %v8113_v37 = vpop.f32.mrf.mxu1  ;;  %8234 = vmatprep.subr.bf16.mxu1 %v8603_v13 }
 0x130   : > { %v9888_v22 = vadd.f32 %v8109_v5, %v1299_v31  ;;  %8235 = vmatpush3.bf16.msra.mxu1 %v8603_v13 }
 0x131   : > { %v8090_v63 = vpop.f32.mrf.mxu0  ;;  %v9890_v27 = vpop.f32.mrf.mxu1  ;;  %8236 = vmatprep.subr.bf16.mxu1 %v8606_v62 }
 0x132   : > { %v1302_v54 = vadd.f32 %v8090_v63, %v9801_v3 }
 0x133   : > { %v1269_v30 = vpop.f32.mrf.mxu0  ;;  %v9893_v59 = vpop.f32.mrf.mxu1 }
 0x134   : > { %v1300_v35 = vadd.f32 %v1269_v30, %v9803_v19  ;;  %v9899_v11 = vadd.f32 %v8112_v51, %v1302_v54  ;;  %v8607_v51 = vld [vmem:[%s11592_s4 + $0x80] sm:$0xff]   ;;  %8237 = vmatpush3.bf16.msra.mxu1 %v8606_v62 }
 0x135   : > { %v8091_v36 = vpop.f32.mrf.mxu0  ;;  %v9901_v14 = vpop.f32.mrf.mxu1  ;;  %8302 = vmatprep.subr.bf16.mxu0 %v8607_v51  ;;  %v8608_v54 = vld [vmem:[%s11592_s4 + $0x40] sm:$0xff]  }
 0x136   : > { %v1303_v18 = vadd.f32 %v8091_v36, %v9805_v21  ;;  %v9904_v55 = vadd.f32 %v1511_v45, %v1300_v35  ;;  %8303 = vmatpush3.bf16.msra.mxu0 %v8607_v51  ;;  %8238 = vmatprep.subr.bf16.mxu1 %v8608_v54 }
 0x137   : > { %v9906_v3 = vpop.f32.mrf.mxu0  ;;  %v9908_v9 = vpop.f32.mrf.mxu1  ;;  %8352 = vmatprep.subr.bf16.mxu0 %v8609_v40 }
 0x138   : > { %v9913_v19 = vadd.f32 %v8113_v37, %v1303_v18  ;;  %8239 = vmatpush3.bf16.msra.mxu1 %v8608_v54 }
 0x139   : > { %v8118_v0 = vpop.f32.mrf.mxu0  ;;  %v9918_v5 = vpop.f32.mrf.mxu1 }
 0x13a   : > { %v9921_v21 = vadd.f32 %v8118_v0, %v9815_v34 }
 0x13b   : > { %v1915_v2 = vpop.f32.mrf.mxu0  ;;  %v9923_v56 = vpop.f32.mrf.mxu1 }
 0x13c   : > { %v9926_v12 = vadd.f32 %v1915_v2, %v9821_v50 }
 0x13d   : > { %v8119_v24 = vpop.f32.mrf.mxu0  ;;  %v9934_v34 = vpop.f32.mrf.mxu1 }
 0x13e   : > { %v9937_v17 = vadd.f32 %v8119_v24, %v9825_v53 }
 0x13f   : > { %v9939_v61 = vpop.f32.mrf.mxu0  ;;  %v9941_v50 = vpop.f32.mrf.mxu1 }
 0x141   : > { %v8122_v45 = vpop.f32.mrf.mxu0  ;;  %v9943_v31 = vpop.f32.mrf.mxu1 }
 0x142   : > { %v9946_v37 = vadd.f32 %v8122_v45, %v9837_v4 }
 0x143   : > { %v1931_v32 = vpop.f32.mrf.mxu0  ;;  %v9948_v63 = vpop.f32.mrf.mxu1 }
 0x144   : > { %v9951_v53 = vadd.f32 %v1931_v32, %v9840_v42 }
 0x145   : > { %v8123_v30 = vpop.f32.mrf.mxu0  ;;  %v9956_v7 = vpop.f32.mrf.mxu1 }
 0x146   : > { %v9959_v35 = vadd.f32 %v8123_v30, %v9844_v16 }
 0x147   : > { %v9961_v36 = vpop.f32.mrf.mxu0  ;;  %v9963_v4 = vpop.f32.mrf.mxu1 }
 0x149   : > { %v8126_v18 = vpop.f32.mrf.mxu0  ;;  %v9965_v13 = vpop.f32.mrf.mxu1 }
 0x14a   : > { %v9968_v42 = vadd.f32 %v8126_v18, %v9856_v20 }
 0x14b   : > { %v1947_v28 = vpop.f32.mrf.mxu0  ;;  %v9970_v0 = vpop.f32.mrf.mxu1 }
 0x14c   : > { %v9973_v2 = vadd.f32 %v1947_v28, %v9862_v58 }
 0x14d   : > { %v8127_v16 = vpop.f32.mrf.mxu0  ;;  %v9975_v62 = vpop.f32.mrf.mxu1 }
 0x14e   : > { %v9978_v51 = vadd.f32 %v8127_v16, %v9866_v25 }
 0x14f   : > { %v9980_v24 = vpop.f32.mrf.mxu0  ;;  %v9982_v45 = vpop.f32.mrf.mxu1 }
 0x151   : > { %v8130_v32 = vpop.f32.mrf.mxu0  ;;  %v9984_v54 = vpop.f32.mrf.mxu1 }
 0x152   : > { %11608 = vst [vmem:[#allocation5_spill] sm:$0xff] %v9984_v54  ;;  %v9987_v20 = vadd.f32 %v8130_v32, %v9878_v26 }
 0x153   : > { %v1963_v30 = vpop.f32.mrf.mxu0 }
 0x154   : > { %v9990_v58 = vadd.f32 %v1963_v30, %v9881_v33  ;;  %v9992_v18 = vpop.f32.mrf.mxu1 }
 0x155   : > { %11609 = vst [vmem:[#allocation6_spill] sm:$0xff] %v9992_v18  ;;  %v8131_v28 = vpop.f32.mrf.mxu0 }
 0x156   : > { %v9995_v25 = vadd.f32 %v8131_v28, %v9888_v22  ;;  %v9997_v16 = vpop.f32.mrf.mxu1  ;;  %v8610_v28 = vld [vmem:[%s11592_s4 + $0x38] sm:$0xff]  }
 0x157   : > { %11610 = vst [vmem:[#allocation7_spill] sm:$0xff] %v9997_v16  ;;  %v10002_v48 = vpop.f32.mrf.mxu0  ;;  %8256 = vmatprep.subr.bf16.mxu1 %v8610_v28 }
 0x158   : > { %v10004_v26 = vpop.f32.mrf.mxu1 }
 0x159   : > { %11611 = vst [vmem:[#allocation8_spill] sm:$0xff] %v10004_v26  ;;  %v8134_v32 = vpop.f32.mrf.mxu0 }
 0x15a   : > { %v10007_v33 = vadd.f32 %v8134_v32, %v9899_v11  ;;  %v10009_v18 = vpop.f32.mrf.mxu1 }
 0x15b   : > { %v1979_v30 = vpop.f32.mrf.mxu0  ;;  %11613 = vst [vmem:[#allocation10_spill] sm:$0xff] %v10009_v18 }
 0x15c   : > { %11612 = vst [vmem:[#allocation9_spill] sm:$0xff] %v10007_v33  ;;  %v10012_v22 = vadd.f32 %v1979_v30, %v9904_v55 }
 0x15d   : > { %v8135_v16 = vpop.f32.mrf.mxu0 }
 0x15e   : > { %11614 = vst [vmem:[#allocation11_spill] sm:$0xff] %v10012_v22  ;;  %v10018_v54 = vadd.f32 %v8135_v16, %v9913_v19 }
 0x15f   : > { %v10020_v40 = vpop.f32.mrf.mxu0  ;;  %v10022_v26 = vpop.f32.mrf.mxu1 }
 0x160   : > { %11615 = vst [vmem:[#allocation12_spill] sm:$0xff] %v10018_v54  ;;  %11616 = vst [vmem:[#allocation13_spill] sm:$0xff] %v10022_v26 }
 0x161   : > { %v10024_v11 = vpop.f32.mrf.mxu0  ;;  %v10026_v32 = vpop.f32.mrf.mxu1 }
 0x162   : > { %11617 = vst [vmem:[#allocation14_spill] sm:$0xff] %v10026_v32 }
 0x163   : > { %v10028_v18 = vpop.f32.mrf.mxu0  ;;  %v10030_v55 = vpop.f32.mrf.mxu1 }
 0x164   : > { %11618 = vst [vmem:[#allocation15_spill] sm:$0xff] %v10028_v18  ;;  %11619 = vst [vmem:[#allocation16_spill] sm:$0xff] %v10030_v55 }
 0x165   : > { %v10032_v30 = vpop.f32.mrf.mxu0  ;;  %v10034_v22 = vpop.f32.mrf.mxu1 }
 0x166   : > { %11620 = vst [vmem:[#allocation17_spill] sm:$0xff] %v10032_v30  ;;  %11621 = vst [vmem:[#allocation18_spill] sm:$0xff] %v10034_v22 }
 0x167   : > { %v10036_v19 = vpop.f32.mrf.mxu0 }
 0x168   : > { %11622 = vst [vmem:[#allocation19_spill] sm:$0xff] %v10036_v19 }
 0x169   : > { %v10038_v16 = vpop.f32.mrf.mxu0  ;;  %v10040_v28 = vpop.f32.mrf.mxu1 }
 0x16a   : > { %11623 = vst [vmem:[#allocation20_spill] sm:$0xff] %v10038_v16  ;;  %11624 = vst [vmem:[#allocation21_spill] sm:$0xff] %v10040_v28 }
 0x16b   : > { %v10042_v26 = vpop.f32.mrf.mxu0  ;;  %v10044_v54 = vpop.f32.mrf.mxu1 }
 0x16c   : > { %11625 = vst [vmem:[#allocation22_spill] sm:$0xff] %v10044_v54  ;;  %v928_v54 = vadd.f32 %v9760_v52, %v9767_v6  ;;  %v976_v52 = vadd.f32 %v9789_v39, %v9797_v8  ;;  %v992_v6 = vadd.f32 %v9799_v15, %v9807_v46 }
 0x16d   : > { %v10046_v32 = vpop.f32.mrf.mxu0  ;;  %v10048_v33 = vpop.f32.mrf.mxu1 }
 0x16e   : > { %11626 = vst [vmem:[#allocation23_spill] sm:$0xff] %v10046_v32  ;;  %11627 = vst [vmem:[#allocation24_spill] sm:$0xff] %v10048_v33  ;;  %v944_v33 = vadd.f32 %v9769_v49, %v9777_v38 }
 0x16f   : > { %v10050_v55 = vpop.f32.mrf.mxu0  ;;  %v10052_v18 = vpop.f32.mrf.mxu1 }
 0x170   : > { %11628 = vst [vmem:[#allocation25_spill] sm:$0xff] %v10052_v18  ;;  %v960_v18 = vadd.f32 %v9779_v47, %v9787_v44  ;;  %v10088_v47 = vstv %s7362_s13 }
 0x171   : > { %v10054_v30 = vpop.f32.mrf.mxu0  ;;  %v10056_v22 = vpop.f32.mrf.mxu1  ;;  %v10099_v15 = vadd.s32 1, %v10088_v47  ;;  %vm3425_vm10 = vcmp.ge.s32.totalorder %v10088_v47, 0  ;;  %vm3435_vm11 = vcmp.lt.s32.totalorder %v10088_v47, 16 }
 0x172   : > { %11629 = vst [vmem:[#allocation26_spill] sm:$0xff] %v10054_v30  ;;  %11630 = vst [vmem:[#allocation27_spill] sm:$0xff] %v10056_v22  ;;  %v1285_v22 = vadd.f32 %v9823_v60, %v928_v54  ;;  %v1289_v30 = vadd.f32 %v9842_v10, %v944_v33  ;;  %v1293_v49 = vadd.f32 %v9864_v41, %v960_v18 }
 0x173   : > { %v10058_v19 = vpop.f32.mrf.mxu0  ;;  %v10060_v16 = vpop.f32.mrf.mxu1  ;;  %v1297_v60 = vadd.f32 %v9883_v29, %v976_v52  ;;  %v1301_v10 = vadd.f32 %v9906_v3, %v992_v6  ;;  %v10108_v29 = vadd.s32 3, %v10088_v47  ;;  %v10111_v3 = vadd.s32 2, %v10088_v47  ;;  %vm10273_vm6 = vmand %vm3425_vm10, %vm3435_vm11 }
 0x174   : > { %11631 = vst [vmem:[#allocation28_spill] sm:$0xff] %v10058_v19  ;;  %11632 = vst [vmem:[#allocation29_spill] sm:$0xff] %v10060_v16  ;;  %v1527_v44 = vadd.f32 %v9809_v1, %v1285_v22  ;;  %v1531_v8 = vadd.f32 %v9827_v57, %v1289_v30  ;;  %v1535_v46 = vadd.f32 %v9846_v43, %v1293_v49  ;;  %v10115_v57 = vadd.s32 5, %v10088_v47 }
 0x175   : > { %v10065_v28 = vpop.f32.mrf.mxu0  ;;  %v10067_v32 = vpop.f32.mrf.mxu1  ;;  %v10118_v22 = vadd.s32 4, %v10088_v47  ;;  %v10121_v43 = vadd.s32 7, %v10088_v47  ;;  %v1543_v30 = vadd.f32 %v9890_v27, %v1301_v10  ;;  %v10129_v49 = vadd.s32 6, %v10088_v47 }
 0x176   : > { %11633 = vst [vmem:[#allocation30_spill] sm:$0xff] %v10067_v32  ;;  %v1995_v41 = vadd.f32 %v9939_v61, %v1527_v44  ;;  %v1999_v33 = vadd.f32 %v9961_v36, %v1531_v8  ;;  %v1539_v61 = vadd.f32 %v9868_v23, %v1297_v60  ;;  %v2003_v52 = vadd.f32 %v9980_v24, %v1535_v46  ;;  %v11642_v46 = vld [vmem:[#allocation23_spill] sm:$0xff] }
 0x177   : > { %v10074_v19 = vpop.f32.mrf.mxu0  ;;  %v10076_v16 = vpop.f32.mrf.mxu1  ;;  %11634 = vst [vmem:[#allocation31_spill] sm:$0xff] %v10121_v43  ;;  %v2304_v36 = vadd.f32 %v9893_v59, %v9921_v21  ;;  %v2302_v44 = vadd.f32 %v9901_v14, %v9926_v12  ;;  %v2305_v8 = vadd.f32 %v9908_v9, %v9937_v17  ;;  %v10140_v23 = vadd.s32 9, %v10088_v47 }
 0x178   : > { %v2303_v27 = vadd.f32 %v9918_v5, %v1995_v41  ;;  %v2308_v24 = vadd.f32 %v9923_v56, %v9946_v37  ;;  %v2306_v60 = vadd.f32 %v9934_v34, %v9951_v53  ;;  %v10150_v14 = vadd.s32 8, %v10088_v47 }
 0x179   : > { %v10084_v38 = vpop.f32.mrf.mxu0  ;;  %v2309_v9 = vadd.f32 %v9941_v50, %v9959_v35  ;;  %v2307_v21 = vadd.f32 %v9943_v31, %v1999_v33  ;;  %v2312_v12 = vadd.f32 %v9948_v63, %v9968_v42  ;;  %v2007_v5 = vadd.f32 %v10002_v48, %v1539_v61  ;;  %v11635_v35 = vld [vmem:[#allocation15_spill] sm:$0xff] }
 0x17a   : > { %v10086_v32 = vpop.f32.mrf.mxu1  ;;  %v2310_v56 = vadd.f32 %v9956_v7, %v9973_v2  ;;  %v2313_v34 = vadd.f32 %v9963_v4, %v9978_v51  ;;  %v2311_v17 = vadd.f32 %v9965_v13, %v2003_v52  ;;  %v2316_v37 = vadd.f32 %v9970_v0, %v9987_v20  ;;  %v11636_v13 = vld [vmem:[#allocation17_spill] sm:$0xff]  ;;  %v11637_v0 = vld [vmem:[#allocation19_spill] sm:$0xff]  ;;  %v11645_v52 = vld [vmem:[#allocation12_spill] sm:$0xff] }
 0x17b   : > { %v10093_v54 = vpop.f32.mrf.mxu0  ;;  %v2314_v50 = vadd.f32 %v9975_v62, %v9990_v58  ;;  %v2317_v31 = vadd.f32 %v9982_v45, %v9995_v25  ;;  %v2011_v48 = vadd.f32 %v10020_v40, %v1543_v30  ;;  %v2546_v63 = vadd.f32 %v10024_v11, %v2304_v36  ;;  %v11638_v62 = vld [vmem:[#allocation20_spill] sm:$0xff]  ;;  %v11639_v45 = vld [vmem:[#allocation5_spill] sm:$0xff]  ;;  %v11641_v40 = vld [vmem:[#allocation6_spill] sm:$0xff] }
 0x17c   : > { %v10095_v39 = vpop.f32.mrf.mxu1  ;;  %vm3426_vm8 = vcmp.ge.s32.totalorder %v10099_v15, 0  ;;  %vm3436_vm9 = vcmp.lt.s32.totalorder %v10099_v15, 16  ;;  %v2544_v4 = vadd.f32 %v11635_v35, %v2302_v44  ;;  %v2547_v42 = vadd.f32 %v11636_v13, %v2305_v8  ;;  %v11640_v25 = vld [vmem:[#allocation9_spill] sm:$0xff]  ;;  %v11643_v33 = vld [vmem:[#allocation11_spill] sm:$0xff]  ;;  %v11646_v36 = vld [vmem:[#allocation8_spill] sm:$0xff] }
 0x17d   : > { %v10103_v18 = vpop.f32.mrf.mxu0  ;;  %v2545_v2 = vadd.f32 %v11637_v0, %v2303_v27  ;;  %v2550_v51 = vadd.f32 %v11638_v62, %v2308_v24  ;;  %v2315_v58 = vadd.f32 %v11639_v45, %v2007_v5  ;;  %v2320_v11 = vadd.f32 %v11641_v40, %v11640_v25  ;;  %v11644_v61 = vld [vmem:[#allocation7_spill] sm:$0xff]  ;;  %v11647_v27 = vld [vmem:[#allocation26_spill] sm:$0xff]  ;;  %vm10252_vm2 = vmand %vm3426_vm8, %vm3436_vm9 }
 0x17e   : > { %v10105_v1 = vpop.f32.mrf.mxu1  ;;  %v2548_v10 = vadd.f32 %v10042_v26, %v2306_v60  ;;  %v2551_v41 = vadd.f32 %v11642_v46, %v2309_v9  ;;  %v2318_v30 = vadd.f32 %v11644_v61, %v11643_v33  ;;  %v2321_v44 = vadd.f32 %v11646_v36, %v11645_v52  ;;  %v11648_v35 = vld [vmem:[#allocation10_spill] sm:$0xff]  ;;  %v11649_v26 = vld [vmem:[#allocation13_spill] sm:$0xff]  ;;  %v11650_v9 = vld [vmem:[#allocation28_spill] sm:$0xff] }
 0x17f   : > { %v10126_v6 = vpop.f32.mrf.mxu0  ;;  %v2549_v8 = vadd.f32 %v10050_v55, %v2307_v21  ;;  %v2554_v24 = vadd.f32 %v11647_v27, %v2312_v12  ;;  %v2319_v13 = vadd.f32 %v11648_v35, %v2011_v48  ;;  %v3014_v60 = vadd.f32 %v11649_v26, %v2546_v63  ;;  %v11651_v25 = vld [vmem:[#allocation14_spill] sm:$0xff]  ;;  %v11652_v46 = vld [vmem:[#allocation16_spill] sm:$0xff]  ;;  %v11654_v36 = vld [vmem:[#allocation21_spill] sm:$0xff] }
 0x180   : > { %v10137_v43 = vpop.f32.mrf.mxu1  ;;  %v2552_v0 = vadd.f32 %v11650_v9, %v2310_v56  ;;  %v2555_v62 = vadd.f32 %v10065_v28, %v2313_v34  ;;  %v3012_v40 = vadd.f32 %v11651_v25, %v2544_v4  ;;  %v3015_v33 = vadd.f32 %v11652_v46, %v2547_v42  ;;  %v11653_v61 = vld [vmem:[#allocation18_spill] sm:$0xff]  ;;  %v10203_v12 = vld [vmem:[%s11590_s2] ss:$0 sm:$0xff]  ;;  %v11657_v4 = vld [vmem:[#allocation25_spill] sm:$0xff] }
 0x181   : > { %v10147_v59 = vpop.f32.mrf.mxu0  ;;  %v3013_v52 = vadd.f32 %v11653_v61, %v2545_v2  ;;  %v3018_v55 = vadd.f32 %v11654_v36, %v2550_v51  ;;  %v11655_v48 = vld [vmem:[#allocation22_spill] sm:$0xff]  ;;  %v11656_v56 = vld [vmem:[#allocation24_spill] sm:$0xff]  ;;  %v2553_v28 = vadd.f32 %v10074_v19, %v2311_v17  ;;  %v10211_v42 = vadd.f32 %v11657_v4, %v2549_v8  ;;  %v11658_v2 = vld [vmem:[#allocation27_spill] sm:$0xff] }
 0x182   : > { %v10171_v7 = vpop.f32.mrf.mxu1  ;;  %v3016_v63 = vadd.f32 %v11655_v48, %v2548_v10  ;;  %v10207_v27 = vadd.f32 %v11656_v56, %v2551_v41  ;;  %v10214_v35 = vadd.f32 %v11658_v2, %v2554_v24  ;;  %v2558_v51 = vadd.f32 %v10084_v38, %v2316_v37  ;;  %v10221_v10 = vld [vmem:[%s11591_s3] ss:$0 sm:$0xff]  ;;  %v11659_v9 = vld [vmem:[#allocation29_spill] sm:$0xff]  ;;  %v11660_v19 = vld [vmem:[#allocation30_spill] sm:$0xff] }
 0x183   : > { %v2529_v53 = vpop.f32.mrf.mxu0  ;;  %v2556_v26 = vadd.f32 %v10093_v54, %v2314_v50  ;;  %v10224_v25 = vadd.f32 %v11659_v9, %v2552_v0  ;;  %v10227_v17 = vadd.f32 %v11660_v19, %v2555_v62  ;;  %v2559_v54 = vadd.f32 %v10103_v18, %v2317_v31  ;;  %vm10295_vm9 = vmand %vm3788_vm12, %vm3789_vm13 }
 0x184   : > { %v2997_v45 = vpop.f32.mrf.mxu1  ;;  %v2557_v37 = vadd.f32 %v10126_v6, %v2315_v58  ;;  %v2562_v50 = vadd.f32 %v10147_v59, %v2320_v11  ;;  %vm3428_vm14 = vcmp.ge.s32.totalorder %v10108_v29, 0  ;;  %vm3438_vm15 = vcmp.lt.s32.totalorder %v10108_v29, 16  ;;  %vm10324_vm12 = vmor %vm3585_vm3, %vm3586_vm5 }
 0x185   : > { %v8179_v20 = vpop.f32.mrf.mxu0  ;;  %v10236_v0 = vadd.f32 %v10076_v16, %v2553_v28  ;;  %vm3427_vm0 = vcmp.ge.s32.totalorder %v10111_v3, 0  ;;  %vm3437_vm1 = vcmp.lt.s32.totalorder %v10111_v3, 16  ;;  %v10243_v18 = vadd.f32 %v10086_v32, %v2558_v51  ;;  %vm10306_vm10 = vmand %vm3428_vm14, %vm3438_vm15 }
 0x186   : > { %v8201_v8 = vpop.f32.mrf.mxu1  ;;  %v10246_v6 = vadd.f32 %v10095_v39, %v2556_v26  ;;  %v2563_v59 = vadd.f32 %v8179_v20, %v2321_v44  ;;  %v10259_v20 = vadd.f32 %v10105_v1, %v2559_v54  ;;  %v10262_v44 = vadd.f32 %v10137_v43, %v2557_v37  ;;  %vm10316_vm11 = vmand %vm3427_vm0, %vm3437_vm1 }
 0x187   : > { %v2532_v5 = vpop.f32.mrf.mxu0  ;;  %v10265_v15 = vadd.f32 %v10171_v7, %v2562_v50  ;;  %vm3795_vm8 = vcmask 1040384   ;;  %vm3430_vm14 = vcmp.ge.s32.totalorder %v10115_v57, 0  ;;  %vm3440_vm15 = vcmp.lt.s32.totalorder %v10115_v57, 16 }
 0x188   : > { %v3000_v58 = vpop.f32.mrf.mxu1  ;;  %vm10330_vm13 = vmand %vm3795_vm8, %vm3585_vm3  ;;  %vm3429_vm0 = vcmp.ge.s32.totalorder %v10118_v22, 0  ;;  %vm3439_vm1 = vcmp.lt.s32.totalorder %v10118_v22, 16  ;;  %vm3431_vm8 = vcmp.ge.s32.totalorder %v10129_v49, 0 }
 0x189   : > { %v8206_v21 = vpop.f32.mrf.mxu0 }
 0x18a   : > { %v3322_v34 = vadd.f32 %v8206_v21, %v3014_v60  ;;  %v2560_v60 = vadd.f32 %v2529_v53, %v2318_v30  ;;  %v2561_v53 = vadd.f32 %v2532_v5, %v2319_v13 }
 0x18b   : > { %v3241_v41 = vpop.f32.mrf.mxu0 }
 0x18c   : > { %v3349_v24 = vmul.f32 %v10203_v12, %v3322_v34  ;;  %v3320_v38 = vadd.f32 %v3241_v41, %v3012_v40  ;;  %v10267_v5 = vadd.f32 %v2997_v45, %v2560_v60  ;;  %v10281_v45 = vadd.f32 %v8201_v8, %v2563_v59 }
 0x18d   : > { %v8207_v46 = vpop.f32.mrf.mxu0  ;;  %v10283_v36 = vadd.f32 %v3000_v58, %v2561_v53 }
 0x18e   : > { %v3376_v62 = vadd.f32 %v10221_v10, %v3349_v24  ;;  %v3347_v61 = vmul.f32 %v10203_v12, %v3320_v38  ;;  %v3323_v40 = vadd.f32 %v8207_v46, %v3015_v33  ;;  %v3800_v46 = vld [vmem:[#allocation2 + $0xc] sm:$0xf] }
 0x18f   : > { %v3244_v31 = vpop.f32.mrf.mxu0 }
 0x190   : > { %v3396_v11 = vmax.f32 %v3376_v62, 0.0  ;;  %v3374_v30 = vadd.f32 %v10221_v10, %v3347_v61  ;;  %v3350_v32 = vmul.f32 %v10203_v12, %v3323_v40  ;;  %v3321_v39 = vadd.f32 %v3244_v31, %v3013_v52 }
 0x191   : > { %v8210_v33 = vpop.f32.mrf.mxu0 }
 0x192   : > { %v3477_v1 = vsel %vm10252_vm2, %v3396_v11, 0.0  ;;  %v3394_v43 = vmax.f32 %v3374_v30, 0.0  ;;  %v3377_v52 = vadd.f32 %v10221_v10, %v3350_v32  ;;  %v3348_v7 = vmul.f32 %v10203_v12, %v3321_v39  ;;  %v3791_v30 = vld [vmem:[#allocation2] sm:$0xf] }
 0x193   : > { %v7702_v21 = vpack.c.bf16 %v3477_v1, %v3477_v1  ;;  %v3326_v47 = vadd.f32 %v8210_v33, %v3018_v55  ;;  %v3257_v48 = vpop.f32.mrf.mxu0 }
 0x194   : > { %v3475_v56 = vsel %vm10273_vm6, %v3394_v43, 0.0  ;;  %v3397_v28 = vmax.f32 %v3377_v52, 0.0  ;;  %v3375_v34 = vadd.f32 %v10221_v10, %v3348_v7  ;;  %v3324_v4 = vadd.f32 %v3257_v48, %v3016_v63  ;;  %v3804_v48 = vld [vmem:[#allocation2 + $0x14] sm:$0x1]  ;;  %v8689_v7 = vld [vmem:[%s11592_s4 + $0x138] sm:$0xff]  }
 0x195   : > { %v3606_v2 = vshrl.u32 %v7702_v21, 16  ;;  %v3609_v51 = vshll.u32 %v7702_v21, 16  ;;  %v7700_v26 = vpack.c.bf16 %v3475_v56, %v3475_v56  ;;  %v3353_v41 = vmul.f32 %v10203_v12, %v3326_v47  ;;  %v8211_v9 = vpop.f32.mrf.mxu0 }
 0x196   : > { %v3478_v19 = vsel %vm10252_vm2, %v3397_v28, 0.0  ;;  %v3395_v8 = vmax.f32 %v3375_v34, 0.0  ;;  %v3351_v55 = vmul.f32 %v10203_v12, %v3324_v4  ;;  %v3327_v24 = vadd.f32 %v8211_v9, %v10207_v27  ;;  %vm10380_vm2 = vmand %vm3430_vm14, %vm3440_vm15 }
 0x197   : > { %v3608_v38 = vrot.slane %v3606_v2, 7  ;;  %v3589_v63 = vshrl.u32 %v7700_v26, 16  ;;  %v3592_v37 = vshll.u32 %v7700_v26, 16  ;;  %v7703_v50 = vpack.c.bf16 %v3478_v19, %v3478_v19  ;;  %v3260_v60 = vpop.f32.mrf.mxu0 }
 0x198   : > { %v3476_v62 = vsel %vm10273_vm6, %v3395_v8, 0.0  ;;  %v3380_v61 = vadd.f32 %v10221_v10, %v3353_v41  ;;  %v3378_v40 = vadd.f32 %v10221_v10, %v3351_v55  ;;  %v3354_v59 = vmul.f32 %v10203_v12, %v3327_v24  ;;  %vm10395_vm6 = vmand %vm3429_vm0, %vm3439_vm1 }
 0x199   : > { %v3611_v53 = vor.u32 %v3609_v51, %v3608_v38  ;;  %v3612_v16 = vrot.slane %v3608_v38, 4  ;;  %v3591_v31 = vrot.slane %v3589_v63, 7  ;;  %v3614_v58 = vshrl.u32 %v7703_v50, 16  ;;  %v8214_v29 = vpop.f32.mrf.mxu0 }
 0x19a   : > { %v3617_v32 = vshll.u32 %v7703_v50, 16  ;;  %v7701_v39 = vpack.c.bf16 %v3476_v62, %v3476_v62  ;;  %v3400_v13 = vmax.f32 %v3380_v61, 0.0  ;;  %v3398_v33 = vmax.f32 %v3378_v40, 0.0 }
 0x19b   : > { %v3801_v1 = vsel %vm10295_vm9, %v3611_v53, %v3800_v46  ;;  %v3594_v43 = vor.u32 %v3592_v37, %v3591_v31  ;;  %v3595_v52 = vrot.slane %v3591_v31, 4  ;;  %v3616_v3 = vrot.slane %v3614_v58, 7  ;;  %v3273_v21 = vpop.f32.mrf.mxu0  ;;  %v3797_v37 = vld [vmem:[#allocation2 + $0x8] sm:$0x1] }
 0x19c   : > { %3802 = vst [vmem:[#allocation2 + $0xc] sm:$0xf] %v3801_v1  ;;  %v3597_v56 = vshrl.u32 %v7701_v39, 16  ;;  %v3600_v28 = vshll.u32 %v7701_v39, 16  ;;  %v3481_v34 = vsel %vm10306_vm10, %v3400_v13, 0.0  ;;  %v3479_v4 = vsel %vm10316_vm11, %v3398_v33, 0.0 }
 0x19d   : > { %v3792_v2 = vsel %vm10295_vm9, %v3594_v43, %v3791_v30  ;;  %v3619_v51 = vor.u32 %v3617_v32, %v3616_v3  ;;  %v3621_v26 = vrot.slane %v3616_v3, 4  ;;  %v7706_v41 = vpack.c.bf16 %v3481_v34, %v3481_v34  ;;  %v8215_v9 = vpop.f32.mrf.mxu0  ;;  %v3814_v39 = vld [vmem:[#allocation2 + $0x24] sm:$0xf]  ;;  %v3807_v3 = vld [vmem:[#allocation2 + $0x18] sm:$0xf] }
 0x19e   : > { %3793 = vst [vmem:[#allocation2] sm:$0xf] %v3792_v2  ;;  %v3599_v19 = vrot.slane %v3597_v56, 7  ;;  %v7704_v8 = vpack.c.bf16 %v3479_v4, %v3479_v4  ;;  %v3381_v55 = vadd.f32 %v10221_v10, %v3354_v59  ;;  %v3325_v24 = vadd.f32 %v3260_v60, %v10211_v42 }
 0x19f   : > { %v3620_v38 = vsel %vm10324_vm12, %v3612_v16, %v3619_v51  ;;  %v3805_v63 = vsel %vm10330_vm13, %v3621_v26, %v3804_v48  ;;  %v3640_v50 = vshrl.u32 %v7706_v41, 16  ;;  %v3643_v46 = vshll.u32 %v7706_v41, 16  ;;  %v3276_v62 = vpop.f32.mrf.mxu0 }
 0x1a0   : > { %3803 = vst [vmem:[#allocation2 + $0x10] sm:$0xf] %v3620_v38  ;;  %3806 = vst [vmem:[#allocation2 + $0x14] sm:$0x1] %v3805_v63  ;;  %v3602_v61 = vor.u32 %v3600_v28, %v3599_v19  ;;  %v3604_v40 = vrot.slane %v3599_v19, 4  ;;  %v3623_v53 = vshrl.u32 %v7704_v8, 16  ;;  %v3352_v42 = vmul.f32 %v10203_v12, %v3325_v24 }
 0x1a1   : > { %v3626_v31 = vshll.u32 %v7704_v8, 16  ;;  %v3642_v58 = vrot.slane %v3640_v50, 7  ;;  %v3401_v59 = vmax.f32 %v3381_v55, 0.0  ;;  %v3330_v60 = vadd.f32 %v8214_v29, %v10214_v35  ;;  %v8218_v16 = vpop.f32.mrf.mxu0  ;;  %v11677_v38 = vld [vmem:[#allocation31_spill] sm:$0xff] }
 0x1a2   : > { %v3603_v30 = vsel %vm10324_vm12, %v3595_v52, %v3602_v61  ;;  %v3798_v32 = vsel %vm10330_vm13, %v3604_v40, %v3797_v37  ;;  %v10356_v13 = vrot.slane %v3623_v53, 7  ;;  %v3328_v33 = vadd.f32 %v3273_v21, %v10224_v25 }
 0x1a3   : > { %3794 = vst [vmem:[#allocation2 + $0x4] sm:$0xf] %v3603_v30  ;;  %3799 = vst [vmem:[#allocation2 + $0x8] sm:$0x1] %v3798_v32  ;;  %v3645_v1 = vor.u32 %v3643_v46, %v3642_v58  ;;  %v3646_v43 = vrot.slane %v3642_v58, 4  ;;  %v3482_v35 = vsel %vm10306_vm10, %v3401_v59, 0.0  ;;  %v3379_v29 = vadd.f32 %v10221_v10, %v3352_v42  ;;  %v3289_v48 = vpop.f32.mrf.mxu0 }
 0x1a4   : > { %v3628_v52 = vor.u32 %v3626_v31, %v10356_v13  ;;  %v3629_v56 = vrot.slane %v10356_v13, 4  ;;  %v7707_v28 = vpack.c.bf16 %v3482_v35, %v3482_v35  ;;  %v3357_v34 = vmul.f32 %v10203_v12, %v3330_v60 }
 0x1a5   : > { %v3815_v25 = vsel %vm10295_vm9, %v3645_v1, %v3814_v39  ;;  %v3399_v21 = vmax.f32 %v3379_v29, 0.0  ;;  %v3355_v4 = vmul.f32 %v10203_v12, %v3328_v33  ;;  %v3331_v2 = vadd.f32 %v8215_v9, %v10227_v17  ;;  %v10369_v27 = vpop.f32.mrf.mxu0  ;;  %v3811_v1 = vld [vmem:[#allocation2 + $0x20] sm:$0x1]  ;;  %v3821_v17 = vld [vmem:[#allocation2 + $0x30] sm:$0xf] }
 0x1a6   : > { %3816 = vst [vmem:[#allocation2 + $0x24] sm:$0xf] %v3815_v25  ;;  %v3808_v51 = vsel %vm10295_vm9, %v3628_v52, %v3807_v3  ;;  %v3648_v26 = vshrl.u32 %v7707_v28, 16  ;;  %v3651_v41 = vshll.u32 %v7707_v28, 16  ;;  %v3384_v19 = vadd.f32 %v10221_v10, %v3357_v34 }
 0x1a7   : > { %3809 = vst [vmem:[#allocation2 + $0x18] sm:$0xf] %v3808_v51  ;;  %v3480_v8 = vsel %vm10316_vm11, %v3399_v21, 0.0  ;;  %v3382_v9 = vadd.f32 %v10221_v10, %v3355_v4  ;;  %v3358_v55 = vmul.f32 %v10203_v12, %v3331_v2  ;;  %v3329_v24 = vadd.f32 %v3276_v62, %v10236_v0  ;;  %v10389_v11 = vpop.f32.mrf.mxu0  ;;  %v3818_v0 = vld [vmem:[#allocation2 + $0x2c] sm:$0x1] }
 0x1a8   : > { %vm3432_vm3 = vcmp.ge.s32.totalorder %v11677_v38, 0  ;;  %vm3442_vm5 = vcmp.lt.s32.totalorder %v11677_v38, 16  ;;  %v3650_v63 = vrot.slane %v3648_v26, 7  ;;  %v7705_v37 = vpack.c.bf16 %v3480_v8, %v3480_v8  ;;  %v3828_v8 = vld [vmem:[#allocation2 + $0x3c] sm:$0xf] }
 0x1a9   : > { %v3404_v50 = vmax.f32 %v3384_v19, 0.0  ;;  %v3334_v46 = vadd.f32 %v8218_v16, %v10243_v18  ;;  %v3402_v62 = vmax.f32 %v3382_v9, 0.0  ;;  %v3385_v61 = vadd.f32 %v10221_v10, %v3358_v55  ;;  %v10408_v16 = vpop.f32.mrf.mxu0  ;;  %vm10432_vm11 = vmand %vm3432_vm3, %vm3442_vm5 }
 0x1aa   : > { %v3356_v40 = vmul.f32 %v10203_v12, %v3329_v24  ;;  %v3332_v53 = vadd.f32 %v3289_v48, %v10246_v6  ;;  %v3653_v31 = vor.u32 %v3651_v41, %v3650_v63  ;;  %v3655_v58 = vrot.slane %v3650_v63, 4 }
 0x1ab   : > { %v3631_v59 = vshrl.u32 %v7705_v37, 16  ;;  %v3634_v42 = vshll.u32 %v7705_v37, 16  ;;  %v3485_v22 = vsel %vm10380_vm2, %v3404_v50, 0.0  ;;  %v3483_v60 = vsel %vm10395_vm6, %v3402_v62, 0.0  ;;  %v3305_v51 = vpop.f32.mrf.mxu0 }
 0x1ac   : > { %v3405_v30 = vmax.f32 %v3385_v61, 0.0  ;;  %v3383_v18 = vadd.f32 %v10221_v10, %v3356_v40  ;;  %v3654_v32 = vsel %vm10324_vm12, %v3646_v43, %v3653_v31  ;;  %v3819_v6 = vsel %vm10330_vm13, %v3655_v58, %v3818_v0 }
 0x1ad   : > { %v3633_v39 = vrot.slane %v3631_v59, 7  ;;  %v7710_v33 = vpack.c.bf16 %v3485_v22, %v3485_v22  ;;  %3817 = vst [vmem:[#allocation2 + $0x28] sm:$0xf] %v3654_v32  ;;  %3820 = vst [vmem:[#allocation2 + $0x2c] sm:$0x1] %v3819_v6  ;;  %v7708_v3 = vpack.c.bf16 %v3483_v60, %v3483_v60  ;;  %v3361_v48 = vmul.f32 %v10203_v12, %v3334_v46  ;;  %v8223_v31 = vpop.f32.mrf.mxu0 }
 0x1ae   : > { %v3486_v35 = vsel %vm10380_vm2, %v3405_v30, 0.0  ;;  %v3403_v29 = vmax.f32 %v3383_v18, 0.0  ;;  %vm3441_vm10 = vcmp.lt.s32.totalorder %v10129_v49, 16  ;;  %vm3434_vm14 = vcmp.ge.s32.totalorder %v10140_v23, 0  ;;  %v3832_v59 = vld [vmem:[#allocation2 + $0x44] sm:$0x1] }
 0x1af   : > { %v3636_v43 = vor.u32 %v3634_v42, %v3633_v39  ;;  %v3638_v52 = vrot.slane %v3633_v39, 4  ;;  %v3674_v28 = vshrl.u32 %v7710_v33, 16  ;;  %v3677_v34 = vshll.u32 %v7710_v33, 16  ;;  %v3825_v32 = vld [vmem:[#allocation2 + $0x38] sm:$0x1]  ;;  %vm10465_vm2 = vmand %vm3431_vm8, %vm3441_vm10 }
 0x1b0   : > { %v3657_v25 = vshrl.u32 %v7708_v3, 16  ;;  %v3660_v21 = vshll.u32 %v7708_v3, 16  ;;  %v7711_v4 = vpack.c.bf16 %v3486_v35, %v3486_v35  ;;  %v3484_v2 = vsel %vm10395_vm6, %v3403_v29, 0.0  ;;  %v3308_v29 = vpop.f32.mrf.mxu0 }
 0x1b1   : > { %v3637_v26 = vsel %vm10324_vm12, %v3629_v56, %v3636_v43  ;;  %v3812_v41 = vsel %vm10330_vm13, %v3638_v52, %v3811_v1  ;;  %v3676_v19 = vrot.slane %v3674_v28, 7  ;;  %v7709_v9 = vpack.c.bf16 %v3484_v2, %v3484_v2 }
 0x1b2   : > { %3810 = vst [vmem:[#allocation2 + $0x1c] sm:$0xf] %v3637_v26  ;;  %3813 = vst [vmem:[#allocation2 + $0x20] sm:$0x1] %v3812_v41  ;;  %v3659_v55 = vrot.slane %v3657_v25, 7  ;;  %v3682_v24 = vshrl.u32 %v7711_v4, 16  ;;  %v3388_v37 = vadd.f32 %v10221_v10, %v3361_v48  ;;  %v3359_v38 = vmul.f32 %v10203_v12, %v3332_v53 }
 0x1b3   : > { %v3685_v63 = vshll.u32 %v7711_v4, 16  ;;  %v3679_v50 = vor.u32 %v3677_v34, %v3676_v19  ;;  %v3680_v57 = vrot.slane %v3676_v19, 4  ;;  %v3665_v13 = vshrl.u32 %v7709_v9, 16  ;;  %v3842_v41 = vld [vmem:[#allocation2 + $0x54] sm:$0xf] }
 0x1b4   : > { %v3668_v46 = vshll.u32 %v7709_v9, 16  ;;  %v3662_v0 = vor.u32 %v3660_v21, %v3659_v55  ;;  %v3663_v62 = vrot.slane %v3659_v55, 4  ;;  %v3684_v61 = vrot.slane %v3682_v24, 7 }
 0x1b5   : > { %v3408_v40 = vmax.f32 %v3388_v37, 0.0  ;;  %vm3444_vm15 = vcmp.lt.s32.totalorder %v10140_v23, 16  ;;  %v3829_v58 = vsel %vm10295_vm9, %v3679_v50, %v3828_v8  ;;  %v3667_v42 = vrot.slane %v3665_v13, 7 }
 0x1b6   : > { %v3335_v22 = vadd.f32 %v10369_v27, %v10259_v20  ;;  %3830 = vst [vmem:[#allocation2 + $0x3c] sm:$0xf] %v3829_v58  ;;  %v3822_v60 = vsel %vm10295_vm9, %v3662_v0, %v3821_v17  ;;  %v3687_v30 = vor.u32 %v3685_v63, %v3684_v61  ;;  %v3689_v18 = vrot.slane %v3684_v61, 4  ;;  %vm10491_vm3 = vmand %vm3434_vm14, %vm3444_vm15 }
 0x1b7   : > { %v3489_v6 = vsel %vm10432_vm11, %v3408_v40, 0.0  ;;  %vm3433_vm0 = vcmp.ge.s32.totalorder %v10150_v14, 0  ;;  %vm3443_vm1 = vcmp.lt.s32.totalorder %v10150_v14, 16  ;;  %3823 = vst [vmem:[#allocation2 + $0x30] sm:$0xf] %v3822_v60  ;;  %v3670_v39 = vor.u32 %v3668_v46, %v3667_v42 }
 0x1b8   : > { %v3672_v53 = vrot.slane %v3667_v42, 4  ;;  %v7714_v33 = vpack.c.bf16 %v3489_v6, %v3489_v6  ;;  %v3386_v20 = vadd.f32 %v10221_v10, %v3359_v38  ;;  %v3688_v27 = vsel %vm10324_vm12, %v3680_v57, %v3687_v30  ;;  %vm10503_vm5 = vmand %vm3433_vm0, %vm3443_vm1 }
 0x1b9   : > { %v3833_v1 = vsel %vm10330_vm13, %v3689_v18, %v3832_v59  ;;  %v3362_v3 = vmul.f32 %v10203_v12, %v3335_v22  ;;  %v3333_v35 = vadd.f32 %v10389_v11, %v10262_v44  ;;  %3831 = vst [vmem:[#allocation2 + $0x40] sm:$0xf] %v3688_v27  ;;  %v3671_v48 = vsel %vm10324_vm12, %v3663_v62, %v3670_v39  ;;  %v3835_v59 = vld [vmem:[#allocation2 + $0x48] sm:$0xf]  ;;  %v3846_v39 = vld [vmem:[#allocation2 + $0x5c] sm:$0x1] }
 0x1ba   : > { %3834 = vst [vmem:[#allocation2 + $0x44] sm:$0x1] %v3833_v1  ;;  %v3826_v43 = vsel %vm10330_vm13, %v3672_v53, %v3825_v32  ;;  %v3708_v52 = vshrl.u32 %v7714_v33, 16  ;;  %v3711_v28 = vshll.u32 %v7714_v33, 16  ;;  %3824 = vst [vmem:[#allocation2 + $0x34] sm:$0xf] %v3671_v48  ;;  %v3338_v21 = vadd.f32 %v10408_v16, %v10265_v15 }
 0x1bb   : > { %3827 = vst [vmem:[#allocation2 + $0x38] sm:$0x1] %v3826_v43  ;;  %v3406_v44 = vmax.f32 %v3386_v20, 0.0  ;;  %v3389_v11 = vadd.f32 %v10221_v10, %v3362_v3  ;;  %v3360_v25 = vmul.f32 %v10203_v12, %v3333_v35  ;;  %v3336_v2 = vadd.f32 %v3305_v51, %v10267_v5 }
 0x1bc   : > { %v3710_v4 = vrot.slane %v3708_v52, 7  ;;  %v3339_v26 = vadd.f32 %v8223_v31, %v10281_v45  ;;  %v3337_v49 = vadd.f32 %v3308_v29, %v10283_v36  ;;  %v3365_v9 = vmul.f32 %v10203_v12, %v3338_v21  ;;  %v10520_v21 = vld [vmem:[#allocation2 + $0x4] sm:$0xf] }
 0x1bd   : > { %v3487_v19 = vsel %vm10465_vm2, %v3406_v44, 0.0  ;;  %v3409_v8 = vmax.f32 %v3389_v11, 0.0  ;;  %v3387_v17 = vadd.f32 %v10221_v10, %v3360_v25  ;;  %v3363_v15 = vmul.f32 %v10203_v12, %v3336_v2  ;;  %v3856_v25 = vld [vmem:[#allocation2 + $0x6c] sm:$0xf] }
 0x1be   : > { %v3713_v55 = vor.u32 %v3711_v28, %v3710_v4  ;;  %v3714_v24 = vrot.slane %v3710_v4, 4  ;;  %v7712_v63 = vpack.c.bf16 %v3487_v19, %v3487_v19  ;;  %v3392_v36 = vadd.f32 %v10221_v10, %v3365_v9  ;;  %v4482_v4 = vld [vmem:[#allocation2] sm:$0xe]  ;;  %v10522_v19 = vld [vmem:[#allocation2 + $0x8] sm:$0x1] }
 0x1bf   : > { %v3490_v5 = vsel %vm10432_vm11, %v3409_v8, 0.0  ;;  %v3407_v45 = vmax.f32 %v3387_v17, 0.0  ;;  %v3366_v16 = vmul.f32 %v10203_v12, %v3339_v26  ;;  %v3390_v0 = vadd.f32 %v10221_v10, %v3363_v15  ;;  %v3849_v9 = vld [vmem:[#allocation2 + $0x60] sm:$0xf] }
 0x1c0   : > { %v3843_v51 = vsel %vm10295_vm9, %v3713_v55, %v3842_v41  ;;  %v3691_v37 = vshrl.u32 %v7712_v63, 16  ;;  %v3694_v50 = vshll.u32 %v7712_v63, 16  ;;  %v7715_v57 = vpack.c.bf16 %v3490_v5, %v3490_v5  ;;  %v4483_v63 = vld [vmem:[#allocation2 + $0xc] sm:$0xe] }
 0x1c1   : > { %3844 = vst [vmem:[#allocation2 + $0x54] sm:$0xf] %v3843_v51  ;;  %v3488_v46 = vsel %vm10465_vm2, %v3407_v45, 0.0  ;;  %v3412_v56 = vmax.f32 %v3392_v36, 0.0  ;;  %v3393_v62 = vadd.f32 %v10221_v10, %v3366_v16  ;;  %v3410_v38 = vmax.f32 %v3390_v0, 0.0 }
 0x1c2   : > { %v3693_v61 = vrot.slane %v3691_v37, 7  ;;  %v3716_v40 = vshrl.u32 %v7715_v57, 16  ;;  %v3719_v31 = vshll.u32 %v7715_v57, 16  ;;  %v7713_v58 = vpack.c.bf16 %v3488_v46, %v3488_v46  ;;  %v3860_v16 = vld [vmem:[#allocation2 + $0x74] sm:$0x1] }
 0x1c3   : > { %v3493_v42 = vsel %vm10491_vm3, %v3412_v56, 0.0  ;;  %v3413_v22 = vmax.f32 %v3393_v62, 0.0  ;;  %v3364_v60 = vmul.f32 %v10203_v12, %v3337_v49  ;;  %v3491_v14 = vsel %vm10503_vm5, %v3410_v38, 0.0  ;;  %v3839_v12 = vld [vmem:[#allocation2 + $0x50] sm:$0x1] }
 0x1c4   : > { %v3696_v30 = vor.u32 %v3694_v50, %v3693_v61  ;;  %v3697_v18 = vrot.slane %v3693_v61, 4  ;;  %v3718_v32 = vrot.slane %v3716_v40, 7  ;;  %v3699_v6 = vshrl.u32 %v7713_v58, 16  ;;  %v10529_v51 = vld [vmem:[#allocation2 + $0x10] sm:$0xf] }
 0x1c5   : > { %v3702_v53 = vshll.u32 %v7713_v58, 16  ;;  %v7718_v33 = vpack.c.bf16 %v3493_v42, %v3493_v42  ;;  %v3494_v20 = vsel %vm10491_vm3, %v3413_v22, 0.0  ;;  %v7716_v43 = vpack.c.bf16 %v3491_v14, %v3491_v14  ;;  %v10531_v37 = vld [vmem:[#allocation2 + $0x14] sm:$0x1]  ;;  %v10541_v42 = vld [vmem:[#allocation2] sm:$0xf] }
 0x1c6   : > { %v3836_v27 = vsel %vm10295_vm9, %v3696_v30, %v3835_v59  ;;  %v3721_v1 = vor.u32 %v3719_v31, %v3718_v32  ;;  %v3723_v3 = vrot.slane %v3718_v32, 4  ;;  %v3701_v35 = vrot.slane %v3699_v6, 7  ;;  %v10554_v14 = vld [vmem:[#allocation2 + $0xc] sm:$0xf] }
 0x1c7   : > { %3837 = vst [vmem:[#allocation2 + $0x48] sm:$0xf] %v3836_v27  ;;  %v3742_v29 = vshrl.u32 %v7718_v33, 16  ;;  %v3745_v48 = vshll.u32 %v7718_v33, 16  ;;  %v7719_v52 = vpack.c.bf16 %v3494_v20, %v3494_v20  ;;  %v3725_v26 = vshrl.u32 %v7716_v43, 16 }
 0x1c8   : > { %v3722_v28 = vsel %vm10324_vm12, %v3714_v24, %v3721_v1  ;;  %v3847_v34 = vsel %vm10330_vm13, %v3723_v3, %v3846_v39  ;;  %v3704_v44 = vor.u32 %v3702_v53, %v3701_v35  ;;  %v3706_v11 = vrot.slane %v3701_v35, 4 }
 0x1c9   : > { %3845 = vst [vmem:[#allocation2 + $0x58] sm:$0xf] %v3722_v28  ;;  %3848 = vst [vmem:[#allocation2 + $0x5c] sm:$0x1] %v3847_v34  ;;  %v3744_v2 = vrot.slane %v3742_v29, 7  ;;  %v3728_v49 = vshll.u32 %v7716_v43, 16  ;;  %v3391_v24 = vadd.f32 %v10221_v10, %v3364_v60 }
 0x1ca   : > { %v3750_v41 = vshrl.u32 %v7719_v52, 16  ;;  %v3705_v8 = vsel %vm10324_vm12, %v3697_v18, %v3704_v44  ;;  %v3840_v17 = vsel %vm10330_vm13, %v3706_v11, %v3839_v12  ;;  %v3753_v55 = vshll.u32 %v7719_v52, 16  ;;  %v3853_v43 = vld [vmem:[#allocation2 + $0x68] sm:$0x1]  ;;  %v8611_v11 = vld [vmem:[%s11592_s4 + $0x130] sm:$0xff]  }
 0x1cb   : > { %3838 = vst [vmem:[#allocation2 + $0x4c] sm:$0xf] %v3705_v8  ;;  %3841 = vst [vmem:[#allocation2 + $0x50] sm:$0x1] %v3840_v17  ;;  %v3747_v15 = vor.u32 %v3745_v48, %v3744_v2  ;;  %v3748_v5 = vrot.slane %v3744_v2, 4  ;;  %v3727_v45 = vrot.slane %v3725_v26, 7 }
 0x1cc   : > { %v3752_v36 = vrot.slane %v3750_v41, 7  ;;  %v3411_v50 = vmax.f32 %v3391_v24, 0.0  ;;  %v7431_v57 = vrot.slane %v4482_v4, 9  ;;  %v4508_v13 = vrot.slane %v10520_v21, 5  ;;  %v4484_v41 = vld [vmem:[#allocation2 + $0x18] sm:$0xe] }
 0x1cd   : > { %v4511_v46 = vrot.slane %v10522_v19, 5  ;;  %v3857_v10 = vsel %vm10295_vm9, %v3747_v15, %v3856_v25  ;;  %v3730_v56 = vor.u32 %v3728_v49, %v3727_v45  ;;  %v3731_v0 = vrot.slane %v3727_v45, 4  ;;  %v10568_v49 = vld [vmem:[#allocation2 + $0x1c] sm:$0xf]  ;;  %v4485_v45 = vld [vmem:[#allocation2 + $0x24] sm:$0xe] }
 0x1ce   : > { %v3755_v62 = vor.u32 %v3753_v55, %v3752_v36  ;;  %3858 = vst [vmem:[#allocation2 + $0x6c] sm:$0xf] %v3857_v10  ;;  %v3757_v61 = vrot.slane %v3752_v36, 4  ;;  %v3492_v40 = vsel %vm10503_vm5, %v3411_v50, 0.0  ;;  %v4509_v58 = vsel %vm9050_vm7, %v7431_v57, %v4508_v13  ;;  %v8613_v36 = vld [vmem:[%s11592_s4 + $0x128] sm:$0xff]  }
 0x1cf   : > { %v4510_v59 = vrot.slane %v4508_v13, 4  ;;  %v3850_v38 = vsel %vm10295_vm9, %v3730_v56, %v3849_v9  ;;  %v7717_v60 = vpack.c.bf16 %v3492_v40, %v3492_v40  ;;  %v7432_v30 = vrot.slane %v4483_v63, 9  ;;  %v10586_v13 = vld [vmem:[#allocation2 + $0x28] sm:$0xf]  ;;  %v10590_v10 = vld [vmem:[#allocation2 + $0x18] sm:$0xf] }
 0x1d0   : > { %v3756_v22 = vsel %vm10324_vm12, %v3748_v5, %v3755_v62  ;;  %3851 = vst [vmem:[#allocation2 + $0x60] sm:$0xf] %v3850_v38  ;;  %v3861_v23 = vsel %vm10330_vm13, %v3757_v61, %v3860_v16  ;;  %v4515_v32 = vrot.slane %v10529_v51, 5  ;;  %v4518_v6 = vrot.slane %v10531_v37, 5  ;;  %v10576_v5 = vld [vmem:[#allocation2 + $0x20] sm:$0x1] }
 0x1d1   : > { %3859 = vst [vmem:[#allocation2 + $0x70] sm:$0xf] %v3756_v22  ;;  %v4512_v18 = vsel %vm9050_vm7, %v4510_v59, %v4511_v46  ;;  %3862 = vst [vmem:[#allocation2 + $0x74] sm:$0x1] %v3861_v23  ;;  %v3733_v54 = vshrl.u32 %v7717_v60, 16  ;;  %v3736_v39 = vshll.u32 %v7717_v60, 16 }
 0x1d2   : > { %v7455_v53 = vcombine.low %v4509_v58, %v4512_v18  ;;  %v3904_v33 = vshrl.u32 %v10541_v42, 16  ;;  %v4516_v20 = vsel %vm9050_vm7, %v7432_v30, %v4515_v32  ;;  %v4517_v27 = vrot.slane %v4515_v32, 4  ;;  %v10588_v46 = vld [vmem:[#allocation2 + $0x2c] sm:$0x1] }
 0x1d3   : > { %v3907_v1 = vshll.u32 %v10541_v42, 16  ;;  %v3913_v3 = vshll.u32 %v10520_v21, 16  ;;  %v3735_v35 = vrot.slane %v3733_v54, 7  ;;  %v3917_v29 = vshrl.u32 %v10520_v21, 16 }
 0x1d4   : > { %8304 = vmatprep.mubr.bf16.mxu0 %v7455_v53  ;;  %v3906_v12 = vrot.slane %v3904_v33, 4  ;;  %v3923_v48 = vshll.u32 %v10522_v19, 16  ;;  %v4519_v52 = vsel %vm9050_vm7, %v4517_v27, %v4518_v6  ;;  %v3928_v44 = vshrl.u32 %v10554_v14, 16  ;;  %v8615_v27 = vld [vmem:[%s11592_s4 + $0x120] sm:$0xff]  }
 0x1d5   : > { %v3909_v28 = vrot.slane %v3907_v1, 5  ;;  %v3915_v34 = vrot.slane %v3913_v3, 5  ;;  %v3738_v25 = vor.u32 %v3736_v39, %v3735_v35  ;;  %v3740_v4 = vrot.slane %v3735_v35, 4 }
 0x1d6   : > { %v7456_v2 = vcombine.low %v4516_v20, %v4519_v52  ;;  %v3919_v26 = vrot.slane %v3917_v29, 4  ;;  %v3925_v8 = vrot.slane %v3923_v48, 5  ;;  %v3930_v17 = vrot.slane %v3928_v44, 4  ;;  %v10611_v29 = vld [vmem:[#allocation2 + $0x24] sm:$0xf]  ;;  %v8612_v48 = vld [vmem:[%s11592_s4 + $0x30] sm:$0xff]  }
 0x1d7   : > { %v3910_v19 = vor.u32 %v3909_v28, %v3906_v12  ;;  %v3931_v9 = vshll.u32 %v10554_v14, 16  ;;  %v3739_v55 = vsel %vm10324_vm12, %v3731_v0, %v3738_v25  ;;  %v3854_v24 = vsel %vm10330_vm13, %v3740_v4, %v3853_v43 }
 0x1d8   : > { %8305 = vmatmul.mubr.bf16.vlgmr.msra.gmra.mxu0 %v7456_v2  ;;  %v3920_v63 = vor.u32 %v3919_v26, %v3915_v34  ;;  %v3937_v15 = vshll.u32 %v10529_v51, 16  ;;  %3852 = vst [vmem:[#allocation2 + $0x64] sm:$0xf] %v3739_v55  ;;  %3855 = vst [vmem:[#allocation2 + $0x68] sm:$0x1] %v3854_v24  ;;  %v3941_v50 = vshrl.u32 %v10529_v51, 16 }
 0x1d9   : > { %8353 = vmatpush3.bf16.msra.mxu0 %v8689_v7  ;;  %v3911_v47 = vrot.slane %v3910_v19, 4  ;;  %v3933_v16 = vrot.slane %v3931_v9, 5  ;;  %v3947_v57 = vshll.u32 %v10531_v37, 16  ;;  %v7433_v62 = vrot.slane %v4484_v41, 9  ;;  %v4486_v2 = vld [vmem:[#allocation2 + $0x30] sm:$0xe] }
 0x1da   : > { %v3921_v56 = vrot.slane %v3920_v63, 4  ;;  %v3939_v0 = vrot.slane %v3937_v15, 5  ;;  %8354 = vmatprep.subr.bf16.mxu0 %v8611_v11  ;;  %v4522_v61 = vrot.slane %v10568_v49, 5  ;;  %v3943_v38 = vrot.slane %v3941_v50, 4  ;;  %v8617_v26 = vld [vmem:[%s11592_s4 + $0x118] sm:$0xff]  }
 0x1db   : > { %v3916_v58 = vsel %vm8895_vm4, %v3911_v47, %v3915_v34  ;;  %v3934_v59 = vor.u32 %v3933_v16, %v3930_v17  ;;  %v3949_v22 = vrot.slane %v3947_v57, 5  ;;  %v4525_v23 = vrot.slane %v10576_v5, 5  ;;  %v10629_v15 = vld [vmem:[#allocation2 + $0x34] sm:$0xf]  ;;  %v10634_v47 = vld [vmem:[#allocation2 + $0x38] sm:$0x1] }
 0x1dc   : > { %v3926_v37 = vsel %vm8895_vm4, %v3921_v56, %v3925_v8  ;;  %v4523_v60 = vsel %vm9050_vm7, %v7433_v62, %v4522_v61  ;;  %v4524_v30 = vrot.slane %v4522_v61, 4  ;;  %v3944_v6 = vor.u32 %v3943_v38, %v3939_v0  ;;  %v4487_v16 = vld [vmem:[#allocation2 + $0x3c] sm:$0xe] }
 0x1dd   : > { %v7399_v18 = vcombine.low %v3916_v58, %v3926_v37  ;;  %v3935_v32 = vrot.slane %v3934_v59, 4  ;;  %8355 = vmatpush3.bf16.msra.mxu0 %v8611_v11  ;;  %v7434_v54 = vrot.slane %v4485_v45, 9  ;;  %v4529_v53 = vrot.slane %v10586_v13, 5  ;;  %v8690_v50 = vld [vmem:[%s11592_s4 + $0x38] sm:$0xff]   ;;  %v10643_v58 = vld [vmem:[#allocation2 + $0x40] sm:$0xf] }
 0x1de   : > { %v4526_v39 = vsel %vm9050_vm7, %v4524_v30, %v4525_v23  ;;  %v4532_v33 = vrot.slane %v10588_v46, 5  ;;  %8356 = vmatprep.subr.bf16.mxu0 %v8613_v36  ;;  %v3952_v20 = vshrl.u32 %v10590_v10, 16  ;;  %v3945_v3 = vrot.slane %v3944_v6, 4 }
 0x1df   : > { %8240 = vmatprep.mubr.bf16.mxu1 %v7399_v18  ;;  %v3940_v1 = vsel %vm8895_vm4, %v3935_v32, %v3939_v0  ;;  %v7457_v35 = vcombine.low %v4523_v60, %v4526_v39  ;;  %v3955_v12 = vshll.u32 %v10590_v10, 16  ;;  %v4530_v43 = vsel %vm9050_vm7, %v7434_v54, %v4529_v53  ;;  %v8614_v0 = vld [vmem:[%s11592_s4 + $0x28] sm:$0xff]   ;;  %v10646_v60 = vld [vmem:[#allocation2 + $0x44] sm:$0x1] }
 0x1e0   : > { %v4531_v52 = vrot.slane %v4529_v53, 4  ;;  %v3954_v28 = vrot.slane %v3952_v20, 4  ;;  %v3961_v34 = vshll.u32 %v10568_v49, 16  ;;  %v3950_v44 = vsel %vm8895_vm4, %v3945_v3, %v3949_v22 }
 0x1e1   : > { %8308 = vmatprep.mubr.bf16.mxu0 %v7457_v35  ;;  %8357 = vmatpush3.bf16.msra.mxu0 %v8613_v36  ;;  %v3957_v11 = vrot.slane %v3955_v12, 5  ;;  %v3965_v25 = vshrl.u32 %v10568_v49, 16  ;;  %v3971_v4 = vshll.u32 %v10576_v5, 16  ;;  %v7400_v41 = vcombine.low %v3940_v1, %v3950_v44 }
 0x1e2   : > { %v4533_v19 = vsel %vm9050_vm7, %v4531_v52, %v4532_v33  ;;  %v3963_v8 = vrot.slane %v3961_v34, 5  ;;  %v3976_v17 = vshrl.u32 %v10611_v29, 16  ;;  %8358 = vmatprep.subr.bf16.mxu0 %v8615_v27  ;;  %v3979_v45 = vshll.u32 %v10611_v29, 16  ;;  %v10656_v33 = vld [vmem:[#allocation2 + $0x30] sm:$0xf]  ;;  %v8616_v52 = vld [vmem:[%s11592_s4 + $0x20] sm:$0xff]  }
 0x1e3   : > { %v7458_v9 = vcombine.low %v4530_v43, %v4533_v19  ;;  %v3958_v55 = vor.u32 %v3957_v11, %v3954_v28  ;;  %v3967_v24 = vrot.slane %v3965_v25, 4  ;;  %v3973_v63 = vrot.slane %v3971_v4, 5  ;;  %8241 = vmatmul.mubr.bf16.vlgmr.msra.gmra.mxu1 %v7400_v41  ;;  %v8621_v25 = vld [vmem:[%s11592_s4 + $0x108] sm:$0xff]   ;;  %v10679_v19 = vld [vmem:[#allocation2 + $0x3c] sm:$0xf] }
 0x1e4   : > { %v3978_v5 = vrot.slane %v3976_v17, 4  ;;  %v3985_v36 = vshll.u32 %v10586_v13, 16  ;;  %v3989_v7 = vshrl.u32 %v10586_v13, 16  ;;  %8257 = vmatpush3.bf16.msra.mxu1 %v8690_v50  ;;  %v3995_v62 = vshll.u32 %v10588_v46, 16  ;;  %v8619_v46 = vld [vmem:[%s11592_s4 + $0x110] sm:$0xff]  }
 0x1e5   : > { %8309 = vmatmul.mubr.bf16.gmra.mxu0 %v7458_v9  ;;  %v3959_v57 = vrot.slane %v3958_v55, 4  ;;  %v3968_v56 = vor.u32 %v3967_v24, %v3963_v8  ;;  %v7435_v61 = vrot.slane %v4486_v2, 9  ;;  %8258 = vmatprep.subr.bf16.mxu1 %v8612_v48  ;;  %v3981_v59 = vrot.slane %v3979_v45, 5  ;;  %v8618_v24 = vld [vmem:[%s11592_s4 + $0x18] sm:$0xff]  }
 0x1e6   : > { %v3987_v38 = vrot.slane %v3985_v36, 5  ;;  %v3991_v22 = vrot.slane %v3989_v7, 4  ;;  %8359 = vmatpush3.bf16.msra.mxu0 %v8615_v27  ;;  %v4536_v37 = vrot.slane %v10629_v15, 5  ;;  %v3997_v18 = vrot.slane %v3995_v62, 5  ;;  %v4488_v7 = vld [vmem:[#allocation2 + $0x48] sm:$0xe] }
 0x1e7   : > { %v3964_v30 = vsel %vm8895_vm4, %v3959_v57, %v3963_v8  ;;  %v3969_v23 = vrot.slane %v3968_v56, 4  ;;  %v4539_v32 = vrot.slane %v10634_v47, 5  ;;  %8360 = vmatprep.subr.bf16.mxu0 %v8617_v26  ;;  %v3982_v6 = vor.u32 %v3981_v59, %v3978_v5  ;;  %v10694_v62 = vld [vmem:[#allocation2 + $0x4c] sm:$0xf] }
 0x1e8   : > { %v3992_v54 = vor.u32 %v3991_v22, %v3987_v38  ;;  %v4537_v39 = vsel %vm9050_vm7, %v7435_v61, %v4536_v37  ;;  %v4538_v53 = vrot.slane %v4536_v37, 4  ;;  %8259 = vmatpush3.bf16.msra.mxu1 %v8612_v48  ;;  %v7436_v27 = vrot.slane %v4487_v16, 9  ;;  %v8623_v16 = vld [vmem:[%s11592_s4 + $0x100] sm:$0xff]   ;;  %v4489_v61 = vld [vmem:[#allocation2 + $0x54] sm:$0xe] }
 0x1e9   : > { %v3974_v20 = vsel %vm8895_vm4, %v3969_v23, %v3973_v63  ;;  %v4543_v1 = vrot.slane %v10643_v58, 5  ;;  %v4546_v3 = vrot.slane %v10646_v60, 5  ;;  %8260 = vmatprep.subr.bf16.mxu1 %v8614_v0  ;;  %v3983_v12 = vrot.slane %v3982_v6, 4  ;;  %v10698_v37 = vld [vmem:[#allocation2 + $0x50] sm:$0x1] }
 0x1ea   : > { %v7401_v35 = vcombine.low %v3964_v30, %v3974_v20  ;;  %v3993_v43 = vrot.slane %v3992_v54, 4  ;;  %v4540_v28 = vsel %vm9050_vm7, %v4538_v53, %v4539_v32  ;;  %8361 = vmatpush3.bf16.msra.mxu0 %v8617_v26  ;;  %v4000_v11 = vshrl.u32 %v10656_v33, 16  ;;  %v8620_v53 = vld [vmem:[%s11592_s4 + $0x10] sm:$0xff]  }
 0x1eb   : > { %v7459_v48 = vcombine.low %v4537_v39, %v4540_v28  ;;  %v4544_v34 = vsel %vm9050_vm7, %v7436_v27, %v4543_v1  ;;  %v4545_v44 = vrot.slane %v4543_v1, 4  ;;  %8362 = vmatprep.subr.bf16.mxu0 %v8619_v46  ;;  %v3988_v4 = vsel %vm8895_vm4, %v3983_v12, %v3987_v38 }
 0x1ec   : > { %8244 = vmatprep.mubr.bf16.mxu1 %v7401_v35  ;;  %v3998_v2 = vsel %vm8895_vm4, %v3993_v43, %v3997_v18  ;;  %v4003_v26 = vshll.u32 %v10656_v33, 16  ;;  %v4009_v41 = vshll.u32 %v10629_v15, 16  ;;  %8261 = vmatpush3.bf16.msra.mxu1 %v8614_v0  ;;  %v4002_v9 = vrot.slane %v4000_v11, 4  ;;  %v10710_v35 = vld [vmem:[%s11592_s4 + $0x1b8] sm:$0xff]  }
 0x1ed   : > { %v7402_v8 = vcombine.low %v3988_v4, %v3998_v2  ;;  %8312 = vmatprep.mubr.bf16.mxu0 %v7459_v48  ;;  %v4547_v17 = vsel %vm9050_vm7, %v4545_v44, %v4546_v3  ;;  %v4013_v55 = vshrl.u32 %v10629_v15, 16  ;;  %8262 = vmatprep.subr.bf16.mxu1 %v8616_v52  ;;  %v4019_v36 = vshll.u32 %v10634_v47, 16  ;;  %v10721_v2 = vld [vmem:[#allocation2 + $0x10] sm:$0xf] }
 0x1ee   : > { %v7460_v63 = vcombine.low %v4544_v34, %v4547_v17  ;;  %v4005_v5 = vrot.slane %v4003_v26, 5  ;;  %v4011_v45 = vrot.slane %v4009_v41, 5  ;;  %8363 = vmatpush3.bf16.msra.mxu0 %v8619_v46  ;;  %v4024_v57 = vshrl.u32 %v10679_v19, 16  ;;  %v10700_v46 = vld [vmem:[#allocation2 + $0x58] sm:$0xf] }
 0x1ef   : > { %8245 = vmatmul.mubr.bf16.gmra.mxu1 %v7402_v8  ;;  %v4015_v50 = vrot.slane %v4013_v55, 4  ;;  %v4027_v56 = vshll.u32 %v10679_v19, 16  ;;  %v4033_v0 = vshll.u32 %v10643_v58, 16  ;;  %8364 = vmatprep.subr.bf16.mxu0 %v8621_v25  ;;  %v4021_v59 = vrot.slane %v4019_v36, 5  ;;  %v5015_v34 = vld [vmem:[#allocation2 + $0xc] sm:$0xf] }
 0x1f0   : > { %8313 = vmatmul.mubr.bf16.gmra.mxu0 %v7460_v63  ;;  %v4006_v47 = vor.u32 %v4005_v5, %v4002_v9  ;;  %v4037_v38 = vshrl.u32 %v10643_v58, 16  ;;  %v4043_v22 = vshll.u32 %v10646_v60, 16  ;;  %8263 = vmatpush3.bf16.msra.mxu1 %v8616_v52  ;;  %v4026_v23 = vrot.slane %v4024_v57, 4  ;;  %v10714_v52 = vld [vmem:[#allocation2 + $0x5c] sm:$0x1]  ;;  %v8622_v9 = vld [vmem:[%s11592_s4 + $0x8] sm:$0xff]  }
 0x1f1   : > { %v4016_v30 = vor.u32 %v4015_v50, %v4011_v45  ;;  %v4029_v18 = vrot.slane %v4027_v56, 5  ;;  %v4035_v32 = vrot.slane %v4033_v0, 5  ;;  %8264 = vmatprep.subr.bf16.mxu1 %v8618_v24  ;;  %v7437_v20 = vrot.slane %v4488_v7, 9  ;;  %v10733_v5 = vld [vmem:[#allocation2 + $0x14] sm:$0x1] }
 0x1f2   : > { %v4007_v6 = vrot.slane %v4006_v47, 4  ;;  %v4039_v54 = vrot.slane %v4037_v38, 4  ;;  %v4045_v39 = vrot.slane %v4043_v22, 5  ;;  %8365 = vmatpush3.bf16.msra.mxu0 %v8621_v25  ;;  %v4550_v1 = vrot.slane %v10694_v62, 5  ;;  %v10739_v57 = vld [vmem:[#allocation2 + $0x48] sm:$0xf] }
 0x1f3   : > { %v4017_v60 = vrot.slane %v4016_v30, 4  ;;  %v4030_v27 = vor.u32 %v4029_v18, %v4026_v23  ;;  %v4553_v3 = vrot.slane %v10698_v37, 5  ;;  %8366 = vmatprep.subr.bf16.mxu0 %v8623_v16  ;;  %v7438_v28 = vrot.slane %v4489_v61, 9  ;;  %v8625_v23 = vld [vmem:[%s11592_s4] sm:$0xff]  }
 0x1f4   : > { %v4012_v12 = vsel %vm8895_vm4, %v4007_v6, %v4011_v45  ;;  %v4040_v43 = vor.u32 %v4039_v54, %v4035_v32  ;;  %v4557_v48 = vrot.slane %v10700_v46, 5  ;;  %8265 = vmatpush3.bf16.msra.mxu1 %v8618_v24  ;;  %v4551_v25 = vsel %vm9050_vm7, %v7437_v20, %v4550_v1 }
 0x1f5   : > { %v4022_v44 = vsel %vm8895_vm4, %v4017_v60, %v4021_v59  ;;  %v4031_v11 = vrot.slane %v4030_v27, 4  ;;  %v4552_v4 = vrot.slane %v4550_v1, 4  ;;  %8266 = vmatprep.subr.bf16.mxu1 %v8620_v53  ;;  %v4560_v63 = vrot.slane %v10714_v52, 5 }
 0x1f6   : > { %v7403_v26 = vcombine.low %v4012_v12, %v4022_v44  ;;  %v4041_v41 = vrot.slane %v4040_v43, 4  ;;  %v4558_v8 = vsel %vm9050_vm7, %v7438_v28, %v4557_v48  ;;  %v4559_v17 = vrot.slane %v4557_v48, 4  ;;  %8367 = vmatpush3.bf16.msra.mxu0 %v8623_v16 }
 0x1f7   : > { %v4036_v55 = vsel %vm8895_vm4, %v4031_v11, %v4035_v32  ;;  %v4554_v24 = vsel %vm9050_vm7, %v4552_v4, %v4553_v3  ;;  %v5040_v45 = vshrl.u32 %v5015_v34, 16  ;;  %8416 = vmatprep.subr.bf16.mxu0 %v10710_v35  ;;  %v5043_v50 = vshll.u32 %v5015_v34, 16  ;;  %v10759_v11 = vld [vmem:[%s11592_s4 + $0xf8] sm:$0xff]  }
 0x1f8   : > { %8248 = vmatprep.mubr.bf16.mxu1 %v7403_v26  ;;  %v4046_v36 = vsel %vm8895_vm4, %v4041_v41, %v4045_v39  ;;  %v7461_v7 = vcombine.low %v4551_v25, %v4554_v24  ;;  %v5049_v16 = vshll.u32 %v10721_v2, 16  ;;  %8267 = vmatpush3.bf16.msra.mxu1 %v8620_v53  ;;  %v4561_v0 = vsel %vm9050_vm7, %v4559_v17, %v4560_v63  ;;  %v10751_v39 = vld [vmem:[#allocation2 + $0x54] sm:$0xf] }
 0x1f9   : > { %v7404_v56 = vcombine.low %v4036_v55, %v4046_v36  ;;  %v5042_v61 = vrot.slane %v5040_v45, 4  ;;  %v5053_v47 = vshrl.u32 %v10721_v2, 16  ;;  %v7462_v59 = vcombine.low %v4558_v8, %v4561_v0  ;;  %8268 = vmatprep.subr.bf16.mxu1 %v8622_v9  ;;  %v5018_v55 = vld [vmem:[#allocation2 + $0x18] sm:$0xf]  ;;  %v10769_v0 = vld [vmem:[#allocation2 + $0x1c] sm:$0xf] }
 0x1fa   : > { %8316 = vmatprep.mubr.bf16.mxu0 %v7461_v7  ;;  %v5045_v38 = vrot.slane %v5043_v50, 5  ;;  %v5051_v22 = vrot.slane %v5049_v16, 5  ;;  %v5059_v30 = vshll.u32 %v10733_v5, 16  ;;  %v4048_v32 = vshrl.u32 %v10739_v57, 16 }
 0x1fb   : > { %8249 = vmatmul.mubr.bf16.gmra.mxu1 %v7404_v56  ;;  %v5055_v18 = vrot.slane %v5053_v47, 4  ;;  %v4051_v6 = vshll.u32 %v10739_v57, 16  ;;  %v4057_v54 = vshll.u32 %v10694_v62, 16  ;;  %8317 = vmatmul.mubr.bf16.gmra.mxu0 %v7462_v59  ;;  %v4061_v60 = vshrl.u32 %v10694_v62, 16 }
 0x1fc   : > { %v5046_v53 = vor.u32 %v5045_v38, %v5042_v61  ;;  %v5061_v20 = vrot.slane %v5059_v30, 5  ;;  %v4067_v27 = vshll.u32 %v10698_v37, 16  ;;  %v4050_v3 = vrot.slane %v4048_v32, 4  ;;  %8269 = vmatpush3.bf16.msra.mxu1 %v8622_v9 }
 0x1fd   : > { %v5056_v1 = vor.u32 %v5055_v18, %v5051_v22  ;;  %v4053_v12 = vrot.slane %v4051_v6, 5  ;;  %v4059_v43 = vrot.slane %v4057_v54, 5  ;;  %v4063_v48 = vrot.slane %v4061_v60, 4  ;;  %8270 = vmatprep.subr.bf16.mxu1 %v8625_v23  ;;  %v5021_v18 = vld [vmem:[#allocation2 + $0x24] sm:$0xf] }
 0x1fe   : > { %v5047_v28 = vrot.slane %v5046_v53, 4  ;;  %v4069_v34 = vrot.slane %v4067_v27, 5  ;;  %v4072_v44 = vshrl.u32 %v10751_v39, 16  ;;  %v4075_v37 = vshll.u32 %v10751_v39, 16 }
 0x1ff   : > { %v5057_v25 = vrot.slane %v5056_v1, 4  ;;  %v4054_v4 = vor.u32 %v4053_v12, %v4050_v3  ;;  %v4081_v26 = vshll.u32 %v10700_v46, 16  ;;  %v4064_v8 = vor.u32 %v4063_v48, %v4059_v43  ;;  %v10782_v3 = vld [vmem:[#allocation2 + $0x28] sm:$0xf] }
 0x200   : > { %v5052_v41 = vsel %vm8895_vm4, %v5047_v28, %v5051_v22  ;;  %v4074_v17 = vrot.slane %v4072_v44, 4  ;;  %v4085_v9 = vshrl.u32 %v10700_v46, 16  ;;  %v4077_v45 = vrot.slane %v4075_v37, 5  ;;  %8271 = vmatpush3.bf16.msra.mxu1 %v8625_v23  ;;  %v10778_v23 = vld [vmem:[#allocation2 + $0x20] sm:$0x1] }
 0x201   : > { %v5062_v24 = vsel %vm8895_vm4, %v5057_v25, %v5061_v20  ;;  %v4055_v63 = vrot.slane %v4054_v4, 4  ;;  %v4083_v36 = vrot.slane %v4081_v26, 5  ;;  %v4065_v50 = vrot.slane %v4064_v8, 4  ;;  %8320 = vmatprep.subr.bf16.mxu1 %v10759_v11  ;;  %v5024_v8 = vld [vmem:[#allocation2 + $0x30] sm:$0xf] }
 0x202   : > { %v7519_v7 = vcombine.low %v5052_v41, %v5062_v24  ;;  %v4087_v16 = vrot.slane %v4085_v9, 4  ;;  %v4091_v56 = vshll.u32 %v10714_v52, 16  ;;  %v4078_v47 = vor.u32 %v4077_v45, %v4074_v17 }
 0x203   : > { %v4060_v61 = vsel %vm8895_vm4, %v4055_v63, %v4059_v43  ;;  %v5064_v59 = vshrl.u32 %v5018_v55, 16  ;;  %v4070_v38 = vsel %vm8895_vm4, %v4065_v50, %v4069_v34  ;;  %v7415_v30 = vcombine.low %v10541_v42, %v10520_v21  ;;  %v10785_v42 = vld [vmem:[#allocation2 + $0x2c] sm:$0x1]  ;;  %v10794_v63 = vld [vmem:[#allocation2 + $0x34] sm:$0xf] }
 0x204   : > { %8368 = vmatprep.mubr.bf16.mxu0 %v7519_v7  ;;  %v4088_v22 = vor.u32 %v4087_v16, %v4083_v36  ;;  %v5067_v52 = vshll.u32 %v5018_v55, 16  ;;  %v7405_v32 = vcombine.low %v4060_v61, %v4070_v38  ;;  %v4079_v6 = vrot.slane %v4078_v47, 4 }
 0x205   : > { %v5066_v54 = vrot.slane %v5064_v59, 4  ;;  %v5073_v53 = vshll.u32 %v10769_v0, 16  ;;  %v4093_v60 = vrot.slane %v4091_v56, 5  ;;  %v5077_v1 = vshrl.u32 %v10769_v0, 16  ;;  %v10802_v59 = vld [vmem:[#allocation2 + $0x38] sm:$0x1] }
 0x206   : > { %v4089_v20 = vrot.slane %v4088_v22, 4  ;;  %v5069_v27 = vrot.slane %v5067_v52, 5  ;;  %8252 = vmatprep.mubr.bf16.mxu1 %v7405_v32  ;;  %v5083_v21 = vshll.u32 %v10778_v23, 16  ;;  %v5088_v43 = vshrl.u32 %v5021_v18, 16 }
 0x207   : > { %v5075_v12 = vrot.slane %v5073_v53, 5  ;;  %v5091_v28 = vshll.u32 %v5021_v18, 16  ;;  %v4084_v48 = vsel %vm8895_vm4, %v4079_v6, %v4083_v36  ;;  %v5079_v25 = vrot.slane %v5077_v1, 4  ;;  %v5027_v6 = vld [vmem:[#allocation2 + $0x3c] sm:$0xf] }
 0x208   : > { %v4094_v34 = vsel %vm8895_vm4, %v4089_v20, %v4093_v60  ;;  %v5070_v44 = vor.u32 %v5069_v27, %v5066_v54  ;;  %v5090_v37 = vrot.slane %v5088_v43, 4  ;;  %v5097_v41 = vshll.u32 %v10782_v3, 16  ;;  %v10808_v54 = vld [vmem:[#allocation2 + $0x40] sm:$0xf]  ;;  %v10814_v27 = vld [vmem:[#allocation2 + $0x44] sm:$0x1] }
 0x209   : > { %v7406_v4 = vcombine.low %v4084_v48, %v4094_v34  ;;  %v5093_v26 = vrot.slane %v5091_v28, 5  ;;  %v5080_v9 = vor.u32 %v5079_v25, %v5075_v12  ;;  %v5101_v55 = vshrl.u32 %v10782_v3, 16  ;;  %v8631_v28 = vld [vmem:[%s11592_s4 + $0xf0] sm:$0xff]  }
 0x20a   : > { %v5071_v17 = vrot.slane %v5070_v44, 4  ;;  %v5107_v24 = vshll.u32 %v10785_v42, 16  ;;  %v5085_v45 = vrot.slane %v5083_v21, 5  ;;  %v5099_v7 = vrot.slane %v5097_v41, 5 }
 0x20b   : > { %8253 = vmatmul.mubr.bf16.gmra.mxu1 %v7406_v4  ;;  %v5094_v36 = vor.u32 %v5093_v26, %v5090_v37  ;;  %v7416_v50 = vcombine.low %v10554_v14, %v10529_v51  ;;  %v5081_v56 = vrot.slane %v5080_v9, 4  ;;  %v5103_v61 = vrot.slane %v5101_v55, 4  ;;  %v8632_v55 = vld [vmem:[%s11592_s4 + $0x1a8] sm:$0xff]  }
 0x20c   : > { %8272 = vmatprep.mubr.bf16.mxu1 %v7415_v30  ;;  %v5076_v16 = vsel %vm8895_vm4, %v5071_v17, %v5075_v12  ;;  %v7417_v47 = vcombine.low %v10590_v10, %v10568_v49  ;;  %v5112_v22 = vshrl.u32 %v5024_v8, 16  ;;  %v5115_v52 = vshll.u32 %v5024_v8, 16  ;;  %v8629_v49 = vld [vmem:[%s11592_s4 + $0x1b0] sm:$0xff]   ;;  %v5030_v8 = vld [vmem:[#allocation2 + $0x48] sm:$0xf] }
 0x20d   : > { %v5095_v38 = vrot.slane %v5094_v36, 4  ;;  %v5121_v18 = vshll.u32 %v10794_v63, 16  ;;  %v5086_v32 = vsel %vm8895_vm4, %v5081_v56, %v5085_v45  ;;  %v5104_v51 = vor.u32 %v5103_v61, %v5099_v7  ;;  %v10831_v56 = vld [vmem:[#allocation2 + $0x4c] sm:$0xf] }
 0x20e   : > { %v5109_v14 = vrot.slane %v5107_v24, 5  ;;  %v5125_v30 = vshrl.u32 %v10794_v63, 16  ;;  %v7520_v53 = vcombine.low %v5076_v16, %v5086_v32  ;;  %v5114_v10 = vrot.slane %v5112_v22, 4  ;;  %v8633_v22 = vld [vmem:[%s11592_s4 + $0xe8] sm:$0xff]   ;;  %v10842_v32 = vld [vmem:[#allocation2 + $0x50] sm:$0x1] }
 0x20f   : > { %v5117_v20 = vrot.slane %v5115_v52, 5  ;;  %v5131_v60 = vshll.u32 %v10802_v59, 16  ;;  %v5100_v1 = vsel %vm8895_vm4, %v5095_v38, %v5099_v7  ;;  %v5105_v12 = vrot.slane %v5104_v51, 4 }
 0x210   : > { %v5123_v21 = vrot.slane %v5121_v18, 5  ;;  %v5127_v43 = vrot.slane %v5125_v30, 4  ;;  %8369 = vmatmul.mubr.bf16.vlgmr.msra.gmra.mxu0 %v7520_v53  ;;  %v5136_v34 = vshrl.u32 %v5027_v6, 16  ;;  %v5139_v44 = vshll.u32 %v5027_v6, 16  ;;  %v8635_v53 = vld [vmem:[%s11592_s4 + $0x1a0] sm:$0xff]  }
 0x211   : > { %v5118_v48 = vor.u32 %v5117_v20, %v5114_v10  ;;  %v5145_v25 = vshll.u32 %v10808_v54, 16  ;;  %v5110_v4 = vsel %vm8895_vm4, %v5105_v12, %v5109_v14  ;;  %8417 = vmatpush3.bf16.msra.mxu0 %v10710_v35  ;;  %v5149_v26 = vshrl.u32 %v10808_v54, 16  ;;  %v5033_v14 = vld [vmem:[#allocation2 + $0x54] sm:$0xf]  ;;  %v8637_v12 = vld [vmem:[%s11592_s4 + $0xe0] sm:$0xff]  }
 0x212   : > { %v5128_v37 = vor.u32 %v5127_v43, %v5123_v21  ;;  %v5155_v41 = vshll.u32 %v10814_v27, 16  ;;  %v7521_v17 = vcombine.low %v5100_v1, %v5110_v4  ;;  %8418 = vmatprep.subr.bf16.mxu0 %v8629_v49  ;;  %v5138_v24 = vrot.slane %v5136_v34, 4  ;;  %v10851_v1 = vld [vmem:[#allocation2 + $0x58] sm:$0xf] }
 0x213   : > { %8273 = vmatmul.mubr.bf16.vlgmr.msra.gmra.mxu1 %v7416_v50  ;;  %v5119_v9 = vrot.slane %v5118_v48, 4  ;;  %v5141_v45 = vrot.slane %v5139_v44, 5  ;;  %v5133_v36 = vrot.slane %v5131_v60, 5  ;;  %v5147_v7 = vrot.slane %v5145_v25, 5  ;;  %v10861_v25 = vld [vmem:[#allocation2 + $0x5c] sm:$0x1] }
 0x214   : > { %8321 = vmatpush3.bf16.msra.mxu1 %v10759_v11  ;;  %8276 = vmatprep.mubr.bf16.mxu1 %v7417_v47  ;;  %v5129_v35 = vrot.slane %v5128_v37, 4  ;;  %v5151_v16 = vrot.slane %v5149_v26, 4  ;;  %v5157_v38 = vrot.slane %v5155_v41, 5  ;;  %v5160_v52 = vshrl.u32 %v5030_v8, 16  ;;  %v8638_v37 = vld [vmem:[%s11592_s4 + $0x198] sm:$0xff]  }
 0x215   : > { %8372 = vmatprep.mubr.bf16.mxu0 %v7521_v17  ;;  %8322 = vmatprep.subr.bf16.mxu1 %v8631_v28  ;;  %v5124_v50 = vsel %vm8895_vm4, %v5119_v9, %v5123_v21  ;;  %v5142_v61 = vor.u32 %v5141_v45, %v5138_v24  ;;  %v7418_v18 = vcombine.low %v10611_v29, %v10586_v13  ;;  %v5163_v51 = vshll.u32 %v5030_v8, 16  ;;  %v5036_v24 = vld [vmem:[#allocation2 + $0x60] sm:$0xf]  ;;  %v10868_v45 = vld [vmem:[#allocation2 + $0x64] sm:$0xf] }
 0x216   : > { %8419 = vmatpush3.bf16.msra.mxu0 %v8629_v49  ;;  %v5134_v11 = vsel %vm8895_vm4, %v5129_v35, %v5133_v36  ;;  %v5152_v47 = vor.u32 %v5151_v16, %v5147_v7  ;;  %v5162_v10 = vrot.slane %v5160_v52, 4  ;;  %v5169_v49 = vshll.u32 %v10831_v56, 16  ;;  %v8639_v16 = vld [vmem:[%s11592_s4 + $0xd8] sm:$0xff]  }
 0x217   : > { %v7522_v30 = vcombine.low %v5124_v50, %v5134_v11  ;;  %8420 = vmatprep.subr.bf16.mxu0 %v8632_v55  ;;  %v5143_v6 = vrot.slane %v5142_v61, 4  ;;  %v7419_v60 = vcombine.low %v10656_v33, %v10629_v15  ;;  %v5165_v13 = vrot.slane %v5163_v51, 5  ;;  %v10878_v11 = vld [vmem:[#allocation2 + $0x68] sm:$0x1] }
 0x218   : > { %8323 = vmatpush3.bf16.msra.mxu1 %v8631_v28  ;;  %v5153_v20 = vrot.slane %v5152_v47, 4  ;;  %v5173_v29 = vshrl.u32 %v10831_v56, 16  ;;  %v5171_v21 = vrot.slane %v5169_v49, 5  ;;  %v5179_v43 = vshll.u32 %v10842_v32, 16  ;;  %v8643_v49 = vld [vmem:[%s11592_s4 + $0xd0] sm:$0xff]  }
 0x219   : > { %8373 = vmatmul.mubr.bf16.gmra.mxu0 %v7522_v30  ;;  %8324 = vmatprep.subr.bf16.mxu1 %v8633_v22  ;;  %v5184_v48 = vshrl.u32 %v5033_v14, 16  ;;  %v5187_v28 = vshll.u32 %v5033_v14, 16  ;;  %v5148_v34 = vsel %vm8895_vm4, %v5143_v6, %v5147_v7  ;;  %v5166_v33 = vor.u32 %v5165_v13, %v5162_v10 }
 0x21a   : > { %v5158_v15 = vsel %vm8895_vm4, %v5153_v20, %v5157_v38  ;;  %8421 = vmatpush3.bf16.msra.mxu0 %v8632_v55  ;;  %v5175_v44 = vrot.slane %v5173_v29, 4  ;;  %v5193_v8 = vshll.u32 %v10851_v1, 16  ;;  %v5197_v55 = vshrl.u32 %v10851_v1, 16 }
 0x21b   : > { %v7523_v4 = vcombine.low %v5148_v34, %v5158_v15  ;;  %8277 = vmatmul.mubr.bf16.gmra.mxu1 %v7418_v18  ;;  %8422 = vmatprep.subr.bf16.mxu0 %v8635_v53  ;;  %v5186_v26 = vrot.slane %v5184_v48, 4  ;;  %v5189_v41 = vrot.slane %v5187_v28, 5  ;;  %v5167_v17 = vrot.slane %v5166_v33, 4  ;;  %v8644_v28 = vld [vmem:[%s11592_s4 + $0x188] sm:$0xff]  }
 0x21c   : > { %8325 = vmatpush3.bf16.msra.mxu1 %v8633_v22  ;;  %8280 = vmatprep.mubr.bf16.mxu1 %v7419_v60  ;;  %v5176_v9 = vor.u32 %v5175_v44, %v5171_v21  ;;  %v5195_v36 = vrot.slane %v5193_v8, 5  ;;  %v5203_v7 = vshll.u32 %v10861_v25, 16  ;;  %v5181_v61 = vrot.slane %v5179_v43, 5  ;;  %v5441_v44 = vld [vmem:[#allocation2 + $0xc] sm:$0xe] }
 0x21d   : > { %8376 = vmatprep.mubr.bf16.mxu0 %v7523_v4  ;;  %8326 = vmatprep.subr.bf16.mxu1 %v8637_v12  ;;  %v5190_v35 = vor.u32 %v5189_v41, %v5186_v26  ;;  %v5199_v38 = vrot.slane %v5197_v55, 4  ;;  %v7420_v22 = vcombine.low %v10679_v19, %v10643_v58  ;;  %v5172_v52 = vsel %vm8895_vm4, %v5167_v17, %v5171_v21  ;;  %v8641_v58 = vld [vmem:[%s11592_s4 + $0x190] sm:$0xff]  }
 0x21e   : > { %8423 = vmatpush3.bf16.msra.mxu0 %v8635_v53  ;;  %v5177_v50 = vrot.slane %v5176_v9, 4  ;;  %v5208_v47 = vshrl.u32 %v5036_v24, 16  ;;  %v5211_v18 = vshll.u32 %v5036_v24, 16  ;;  %v5217_v51 = vshll.u32 %v10868_v45, 16 }
 0x21f   : > { %8424 = vmatprep.subr.bf16.mxu0 %v8638_v37  ;;  %v5191_v30 = vrot.slane %v5190_v35, 4  ;;  %v5200_v6 = vor.u32 %v5199_v38, %v5195_v36  ;;  %v5221_v19 = vshrl.u32 %v10868_v45, 16  ;;  %v5205_v10 = vrot.slane %v5203_v7, 5  ;;  %v8645_v7 = vld [vmem:[#allocation2 + $0x18] sm:$0xff]  }
 0x220   : > { %8327 = vmatpush3.bf16.msra.mxu1 %v8637_v12  ;;  %v5182_v14 = vsel %vm8895_vm4, %v5177_v50, %v5181_v61  ;;  %v5210_v20 = vrot.slane %v5208_v47, 4  ;;  %v5213_v60 = vrot.slane %v5211_v18, 5  ;;  %v5219_v29 = vrot.slane %v5217_v51, 5  ;;  %v5442_v61 = vld [vmem:[#allocation2 + $0x18] sm:$0xe] }
 0x221   : > { %v7524_v53 = vcombine.low %v5172_v52, %v5182_v14  ;;  %8328 = vmatprep.subr.bf16.mxu1 %v8639_v16  ;;  %v5201_v13 = vrot.slane %v5200_v6, 4  ;;  %v5223_v12 = vrot.slane %v5221_v19, 4  ;;  %v5227_v21 = vshll.u32 %v10878_v11, 16  ;;  %v5443_v52 = vld [vmem:[#allocation2 + $0x24] sm:$0xe]  ;;  %v8654_v47 = vld [vmem:[%s11592_s4 + $0x178] sm:$0xff]  }
 0x222   : > { %8425 = vmatpush3.bf16.msra.mxu0 %v8638_v37  ;;  %v7421_v43 = vcombine.low %v10739_v57, %v10694_v62  ;;  %v5214_v48 = vor.u32 %v5213_v60, %v5210_v20  ;;  %v5196_v34 = vsel %vm8895_vm4, %v5191_v30, %v5195_v36  ;;  %v8646_v62 = vld [vmem:[%s11592_s4 + $0xc8] sm:$0xff]   ;;  %v5475_v41 = vrot.slane %v10721_v2, 5  ;;  %v8648_v2 = vld [vmem:[%s11592_s4 + $0x180] sm:$0xff]  }
 0x223   : > { %8377 = vmatmul.mubr.bf16.gmra.mxu0 %v7524_v53  ;;  %8281 = vmatmul.mubr.bf16.gmra.mxu1 %v7420_v22  ;;  %v5206_v15 = vsel %vm8895_vm4, %v5201_v13, %v5205_v10  ;;  %v5224_v33 = vor.u32 %v5223_v12, %v5219_v29  ;;  %v5229_v26 = vrot.slane %v5227_v21, 5  ;;  %v7535_v8 = vrot.slane %v5441_v44, 9  ;;  %v8651_v10 = vld [vmem:[#allocation2 + $0x24] sm:$0xff]   ;;  %v8653_v13 = vld [vmem:[#allocation2 + $0x30] sm:$0xff]  }
 0x224   : > { %8329 = vmatpush3.bf16.msra.mxu1 %v8639_v16  ;;  %8426 = vmatprep.subr.bf16.mxu0 %v8641_v58  ;;  %v7525_v4 = vcombine.low %v5196_v34, %v5206_v15  ;;  %v5215_v37 = vrot.slane %v5214_v48, 4  ;;  %v5477_v55 = vrot.slane %v5475_v41, 4  ;;  %v5478_v24 = vrot.slane %v10733_v5, 5  ;;  %v8650_v16 = vld [vmem:[%s11592_s4 + $0xc0] sm:$0xff]   ;;  %v8660_v44 = vld [vmem:[%s11592_s4 + $0x228] sm:$0xff]  }
 0x225   : > { %8284 = vmatprep.mubr.bf16.mxu1 %v7421_v43  ;;  %8330 = vmatprep.subr.bf16.mxu1 %v8643_v49  ;;  %v5225_v57 = vrot.slane %v5224_v33, 4  ;;  %v7422_v36 = vcombine.low %v10751_v39, %v10700_v46  ;;  %v10919_v50 = vsel %vm9050_vm7, %v7535_v8, %v5475_v41  ;;  %v8649_v46 = vld [vmem:[#allocation2 + $0xc] sm:$0xff]   ;;  %v8652_v39 = vld [vmem:[%s11592_s4 + $0x238] sm:$0xff]   ;;  %v5482_v22 = vrot.slane %v10769_v0, 5  ;;  %v8657_v48 = vld [vmem:[#allocation2 + $0x24] sm:$0xff]  }
 0x226   : > { %8427 = vmatpush3.bf16.msra.mxu0 %v8641_v58  ;;  %8380 = vmatprep.mubr.bf16.mxu0 %v7525_v4  ;;  %v5220_v17 = vsel %vm8895_vm4, %v5215_v37, %v5219_v29  ;;  %v10923_v5 = vsel %vm9050_vm7, %v5477_v55, %v5478_v24  ;;  %v7536_v18 = vrot.slane %v5442_v61, 9  ;;  %v5485_v14 = vrot.slane %v10778_v23, 5  ;;  %v8656_v23 = vld [vmem:[%s11592_s4 + $0x230] sm:$0xff]   ;;  %v5445_v43 = vld [vmem:[#allocation2 + $0x3c] sm:$0xe] }
 0x227   : > { %8428 = vmatprep.subr.bf16.mxu0 %v8644_v28  ;;  %v5230_v9 = vsel %vm8895_vm4, %v5225_v57, %v5229_v26  ;;  %v7559_v38 = vcombine.low %v10919_v50, %v10923_v5  ;;  %v5484_v51 = vrot.slane %v5482_v22, 4  ;;  %v5489_v30 = vrot.slane %v10782_v3, 5  ;;  %v8658_v29 = vld [vmem:[%s11592_s4 + $0x170] sm:$0xff]   ;;  %v8664_v26 = vld [vmem:[%s11592_s4 + $0x220] sm:$0xff]  }
 0x228   : > { %8331 = vmatpush3.bf16.msra.mxu1 %v8643_v49  ;;  %v7526_v35 = vcombine.low %v5220_v17, %v5230_v9  ;;  %v7537_v6 = vrot.slane %v5443_v52, 9  ;;  %v10938_v0 = vsel %vm9050_vm7, %v7536_v18, %v5482_v22  ;;  %v5492_v53 = vrot.slane %v10785_v42, 5  ;;  %v8655_v49 = vld [vmem:[#allocation2 + $0x18] sm:$0xff]   ;;  %v5444_v42 = vld [vmem:[#allocation2 + $0x30] sm:$0xe] }
 0x229   : > { %8332 = vmatprep.subr.bf16.mxu1 %v8646_v62  ;;  %v10942_v58 = vsel %vm9050_vm7, %v5484_v51, %v5485_v14  ;;  %v5491_v19 = vrot.slane %v5489_v30, 4  ;;  %v5496_v21 = vrot.slane %v10794_v63, 5  ;;  %v5499_v15 = vrot.slane %v10802_v59, 5  ;;  %v8662_v63 = vld [vmem:[%s11592_s4 + $0x168] sm:$0xff]   ;;  %v8659_v9 = vld [vmem:[#allocation2 + $0x3c] sm:$0xff]  }
 0x22a   : > { %8429 = vmatpush3.bf16.msra.mxu0 %v8644_v28  ;;  %v7560_v3 = vcombine.low %v10938_v0, %v10942_v58  ;;  %v10952_v20 = vsel %vm9050_vm7, %v7537_v6, %v5489_v30  ;;  %v7538_v28 = vrot.slane %v5444_v42, 9  ;;  %v5503_v33 = vrot.slane %v10808_v54, 5  ;;  %v5446_v17 = vld [vmem:[#allocation2 + $0x48] sm:$0xe]  ;;  %v11002_v22 = vld [vmem:[#allocation2 + $0x1c] sm:$0xf] }
 0x22b   : > { %8381 = vmatmul.mubr.bf16.gmra.mxu0 %v7526_v35  ;;  %8285 = vmatmul.mubr.bf16.gmra.mxu1 %v7422_v36  ;;  %v10956_v60 = vsel %vm9050_vm7, %v5491_v19, %v5492_v53  ;;  %v5498_v34 = vrot.slane %v5496_v21, 4  ;;  %v7539_v4 = vrot.slane %v5445_v43, 9  ;;  %v5510_v24 = vrot.slane %v10831_v56, 5  ;;  %v5447_v35 = vld [vmem:[#allocation2 + $0x54] sm:$0xe]  ;;  %v8661_v36 = vld [vmem:[#allocation2 + $0x48] sm:$0xff]  }
 0x22c   : > { %8432 = vmatprep.mubr.bf16.mxu0 %v8645_v7  ;;  %8333 = vmatpush3.bf16.msra.mxu1 %v8646_v62  ;;  %v7561_v12 = vcombine.low %v10952_v20, %v10956_v60  ;;  %v10974_v37 = vsel %vm9050_vm7, %v7538_v28, %v5496_v21  ;;  %v5505_v54 = vrot.slane %v5503_v33, 4  ;;  %v5506_v62 = vrot.slane %v10814_v27, 5  ;;  %v8663_v27 = vld [vmem:[#allocation2 + $0x30] sm:$0xff]   ;;  %v8668_v52 = vld [vmem:[%s11592_s4 + $0x218] sm:$0xff]   ;;  %v5448_v30 = vld [vmem:[#allocation2 + $0x60] sm:$0xe] }
 0x22d   : > { %8430 = vmatprep.subr.bf16.mxu0 %v8648_v2  ;;  %8336 = vmatprep.mubr.bf16.mxu1 %v8649_v46  ;;  %v10978_v59 = vsel %vm9050_vm7, %v5498_v34, %v5499_v15  ;;  %v10988_v41 = vsel %vm9050_vm7, %v7539_v4, %v5503_v33  ;;  %v7540_v7 = vrot.slane %v5446_v17, 9  ;;  %v5513_v61 = vrot.slane %v10842_v32, 5  ;;  %v8670_v51 = vld [vmem:[%s11592_s4 + $0x158] sm:$0xff]   ;;  %v8672_v42 = vld [vmem:[%s11592_s4 + $0x210] sm:$0xff]   ;;  %v8669_v43 = vld [vmem:[#allocation2 + $0x60] sm:$0xff]  }
 0x22e   : > { %8431 = vmatpush3.bf16.msra.mxu0 %v8648_v2  ;;  %8334 = vmatprep.subr.bf16.mxu1 %v8650_v16  ;;  %v7562_v57 = vcombine.low %v10974_v37, %v10978_v59  ;;  %v10992_v8 = vsel %vm9050_vm7, %v5505_v54, %v5506_v62  ;;  %v8666_v2 = vld [vmem:[%s11592_s4 + $0x160] sm:$0xff]   ;;  %v5517_v46 = vrot.slane %v10851_v1, 5  ;;  %v7541_v56 = vrot.slane %v5447_v35, 9  ;;  %v11042_v34 = vld [vmem:[#allocation2 + $0x28] sm:$0xf]  ;;  %v8673_v33 = vld [vmem:[#allocation2 + $0x54] sm:$0xff]  }
 0x22f   : > { %8480 = vmatprep.subr.bf16.mxu0 %v8652_v39  ;;  %v7563_v55 = vcombine.low %v10988_v41, %v10992_v8  ;;  %v5520_v18 = vrot.slane %v10861_v25, 5  ;;  %v6442_v6 = vrot.slane %v11002_v22, 5  ;;  %v5524_v25 = vrot.slane %v10868_v45, 5  ;;  %v8674_v45 = vld [vmem:[%s11592_s4 + $0x150] sm:$0xff]   ;;  %v8676_v54 = vld [vmem:[%s11592_s4 + $0x208] sm:$0xff]  }
 0x230   : > { %8335 = vmatpush3.bf16.msra.mxu1 %v8650_v16  ;;  %v5512_v16 = vrot.slane %v5510_v24, 4  ;;  %v5519_v1 = vrot.slane %v5517_v46, 4  ;;  %v11024_v19 = vsel %vm9050_vm7, %v7541_v56, %v5517_v46  ;;  %v5527_v21 = vrot.slane %v10878_v11, 5  ;;  %v11052_v4 = vld [vmem:[#allocation2 + $0x34] sm:$0xf]  ;;  %v8675_v35 = vld [vmem:[#allocation2 + $0x6c] sm:$0xff]  }
 0x231   : > { %8384 = vmatprep.subr.bf16.mxu1 %v8654_v47  ;;  %v6444_v28 = vrot.slane %v6442_v6, 4  ;;  %v6449_v17 = vrot.slane %v11042_v34, 5  ;;  %v11101_v5 = vld [vmem:[#allocation2 + $0x44] sm:$0x1]  ;;  %v5982_v0 = vld [vmem:[#allocation2 + $0x18] sm:$0xf] }
 0x232   : > { %v11013_v32 = vsel %vm9050_vm7, %v5512_v16, %v5513_v61  ;;  %v11028_v53 = vsel %vm9050_vm7, %v5519_v1, %v5520_v18  ;;  %v11072_v16 = vld [vmem:[#allocation2 + $0x2c] sm:$0x1]  ;;  %v11074_v61 = vld [vmem:[#allocation2 + $0x38] sm:$0x1]  ;;  %v6409_v18 = vld [vmem:[#allocation2 + $0x24] sm:$0xe] }
 0x233   : > { %8433 = vmatmul.mubr.bf16.vlgmr.msra.gmra.mxu0 %v8651_v10  ;;  %8337 = vmatmul.mubr.bf16.vlgmr.msra.gmra.mxu1 %v8655_v49  ;;  %v8667_v10 = vld [vmem:[#allocation2 + $0x54] sm:$0xff]   ;;  %v8671_v49 = vld [vmem:[#allocation2 + $0x48] sm:$0xff]   ;;  %v6451_v56 = vrot.slane %v6449_v17, 4  ;;  %v6020_v20 = vshrl.u32 %v11002_v22, 16 }
 0x234   : > { %8436 = vmatprep.mubr.bf16.mxu0 %v8653_v13  ;;  %8481 = vmatpush3.bf16.msra.mxu0 %v8652_v39  ;;  %v8665_v39 = vld [vmem:[#allocation2 + $0x3c] sm:$0xff]   ;;  %v7542_v13 = vrot.slane %v5448_v30, 9  ;;  %v11081_v1 = vld [vmem:[#allocation2 + $0x4c] sm:$0xf]  ;;  %v6452_v30 = vrot.slane %v11072_v16, 5 }
 0x235   : > { %8385 = vmatpush3.bf16.msra.mxu1 %v8654_v47  ;;  %8482 = vmatprep.subr.bf16.mxu0 %v8656_v23  ;;  %v11009_v47 = vsel %vm9050_vm7, %v7540_v7, %v5510_v24  ;;  %v6456_v24 = vrot.slane %v11052_v4, 5  ;;  %v8679_v7 = vld [vmem:[%s11592_s4 + $0x200] sm:$0xff]   ;;  %v6413_v58 = vld [vmem:[#allocation2 + $0x54] sm:$0xe] }
 0x236   : > { %8340 = vmatprep.mubr.bf16.mxu1 %v8657_v48  ;;  %8386 = vmatprep.subr.bf16.mxu1 %v8658_v29  ;;  %v7564_v14 = vcombine.low %v11009_v47, %v11013_v32  ;;  %v11040_v48 = vld [vmem:[#allocation2 + $0x20] sm:$0x1]  ;;  %v11046_v15 = vsel %vm9050_vm7, %v7542_v13, %v5524_v25  ;;  %v6453_v13 = vsel %vm9050_vm7, %v6451_v56, %v6452_v30  ;;  %v6016_v30 = vshll.u32 %v11002_v22, 16  ;;  %v8687_v47 = vld [vmem:[%s11592_s4 + $0x1c8] sm:$0xff]  }
 0x237   : > { %v6445_v62 = vrot.slane %v11040_v48, 5  ;;  %v8684_v22 = vld [vmem:[%s11592_s4 + $0x1e0] sm:$0xff]  }
 0x238   : > { %8483 = vmatpush3.bf16.msra.mxu0 %v8656_v23  ;;  %v7565_v23 = vcombine.low %v11024_v19, %v11028_v53 }
 0x239   : > { %8387 = vmatpush3.bf16.msra.mxu1 %v8658_v29  ;;  %8484 = vmatprep.subr.bf16.mxu0 %v8660_v44  ;;  %v5526_v29 = vrot.slane %v5524_v25, 4  ;;  %v6459_v25 = vrot.slane %v11074_v61, 5 }
 0x23a   : > { %8388 = vmatprep.subr.bf16.mxu1 %v8662_v63 }
 0x23b   : > { %8437 = vmatmul.mubr.bf16.gmra.mxu0 %v8659_v9  ;;  %8341 = vmatmul.mubr.bf16.gmra.mxu1 %v8663_v27  ;;  %v11050_v11 = vsel %vm9050_vm7, %v5526_v29, %v5527_v21  ;;  %v6446_v27 = vsel %vm9050_vm7, %v6444_v28, %v6445_v62  ;;  %v8681_v29 = vld [vmem:[%s11592_s4 + $0x1f8] sm:$0xff]  }
 0x23c   : > { %8440 = vmatprep.mubr.bf16.mxu0 %v8661_v36  ;;  %8485 = vmatpush3.bf16.msra.mxu0 %v8660_v44  ;;  %v6408_v44 = vld [vmem:[#allocation2 + $0x18] sm:$0xe]  ;;  %v8678_v36 = vld [vmem:[#allocation2 + $0x60] sm:$0xff]  }
 0x23d   : > { %8389 = vmatpush3.bf16.msra.mxu1 %v8662_v63  ;;  %8486 = vmatprep.subr.bf16.mxu0 %v8664_v26  ;;  %v7566_v63 = vcombine.low %v11046_v15, %v11050_v11  ;;  %v7639_v9 = vrot.slane %v6408_v44, 9 }
 0x23e   : > { %8344 = vmatprep.mubr.bf16.mxu1 %v8665_v39  ;;  %8390 = vmatprep.subr.bf16.mxu1 %v8666_v2  ;;  %v8680_v39 = vld [vmem:[%s11592_s4 + $0x140] sm:$0xff]  }
 0x240   : > { %8487 = vmatpush3.bf16.msra.mxu0 %v8664_v26  ;;  %v8677_v26 = vld [vmem:[%s11592_s4 + $0x148] sm:$0xff]  }
 0x241   : > { %8391 = vmatpush3.bf16.msra.mxu1 %v8666_v2  ;;  %8488 = vmatprep.subr.bf16.mxu0 %v8668_v52  ;;  %v6443_v2 = vsel %vm9050_vm7, %v7639_v9, %v6442_v6  ;;  %v6410_v6 = vld [vmem:[#allocation2 + $0x30] sm:$0xe]  ;;  %v6411_v9 = vld [vmem:[#allocation2 + $0x3c] sm:$0xe] }
 0x242   : > { %8392 = vmatprep.subr.bf16.mxu1 %v8670_v51  ;;  %v7663_v46 = vcombine.low %v6443_v2, %v6446_v27  ;;  %v7641_v21 = vrot.slane %v6410_v6, 9  ;;  %v6412_v27 = vld [vmem:[#allocation2 + $0x48] sm:$0xe]  ;;  %v11113_v2 = vld [vmem:[#allocation2 + $0x64] sm:$0xf] }
 0x243   : > { %8441 = vmatmul.mubr.bf16.gmra.mxu0 %v8667_v10  ;;  %8345 = vmatmul.mubr.bf16.gmra.mxu1 %v8671_v49  ;;  %v6470_v49 = vrot.slane %v11081_v1, 5 }
 0x244   : > { %8444 = vmatprep.mubr.bf16.mxu0 %v8669_v43  ;;  %8489 = vmatpush3.bf16.msra.mxu0 %v8668_v52  ;;  %v11079_v52 = vld [vmem:[#allocation2 + $0x40] sm:$0xf] }
 0x245   : > { %8393 = vmatpush3.bf16.msra.mxu1 %v8670_v51  ;;  %8490 = vmatprep.subr.bf16.mxu0 %v8672_v42  ;;  %v6458_v51 = vrot.slane %v6456_v24, 4  ;;  %v6463_v10 = vrot.slane %v11079_v52, 5  ;;  %v6088_v19 = vshll.u32 %v11079_v52, 16  ;;  %v6092_v53 = vshrl.u32 %v11079_v52, 16  ;;  %v8688_v52 = vld [vmem:[%s11592_s4 + $0x1c0] sm:$0xff]  }
 0x246   : > { %8348 = vmatprep.mubr.bf16.mxu1 %v8673_v33  ;;  %8394 = vmatprep.subr.bf16.mxu1 %v8674_v45  ;;  %v6457_v33 = vsel %vm9050_vm7, %v7641_v21, %v6456_v24  ;;  %v8683_v24 = vld [vmem:[%s11592_s4 + $0x1e8] sm:$0xff]  }
 0x247   : > { %v6460_v43 = vsel %vm9050_vm7, %v6458_v51, %v6459_v25  ;;  %v6465_v44 = vrot.slane %v6463_v10, 4  ;;  %v6484_v51 = vrot.slane %v11113_v2, 5  ;;  %v11138_v25 = vld [vmem:[#allocation2 + $0x70] sm:$0xf] }
 0x248   : > { %8491 = vmatpush3.bf16.msra.mxu0 %v8672_v42  ;;  %v7640_v42 = vrot.slane %v6409_v18, 9  ;;  %v7665_v62 = vcombine.low %v6457_v33, %v6460_v43  ;;  %v11128_v18 = vld [vmem:[#allocation2 + $0x5c] sm:$0x1]  ;;  %v7644_v43 = vrot.slane %v6413_v58, 9  ;;  %v11147_v33 = vrot.slane %v6016_v30, 5 }
 0x249   : > { %8395 = vmatpush3.bf16.msra.mxu1 %v8674_v45  ;;  %8492 = vmatprep.subr.bf16.mxu0 %v8676_v54  ;;  %v11097_v45 = vld [vmem:[#allocation2 + $0x58] sm:$0xf]  ;;  %v6480_v6 = vrot.slane %v11128_v18, 5 }
 0x24a   : > { %8396 = vmatprep.subr.bf16.mxu1 %v8677_v26  ;;  %v6450_v50 = vsel %vm9050_vm7, %v7640_v42, %v6449_v17  ;;  %v6477_v17 = vrot.slane %v11097_v45, 5  ;;  %v6007_v42 = vshrl.u32 %v5982_v0, 16  ;;  %v6136_v11 = vshll.u32 %v11097_v45, 16 }
 0x24b   : > { %8445 = vmatmul.mubr.bf16.gmra.mxu0 %v8675_v35  ;;  %8349 = vmatmul.mubr.bf16.gmra.mxu1 %v8678_v36  ;;  %v7664_v28 = vcombine.low %v6450_v50, %v6453_v13  ;;  %v6466_v35 = vrot.slane %v11101_v5, 5  ;;  %v6010_v13 = vshll.u32 %v5982_v0, 16  ;;  %v11140_v50 = vld [vmem:[#allocation2 + $0x68] sm:$0x1] }
 0x24c   : > { %8493 = vmatpush3.bf16.msra.mxu0 %v8676_v54  ;;  %8496 = vmatprep.mubr.bf16.mxu0 %v7663_v46  ;;  %v6472_v54 = vrot.slane %v6470_v49, 4 }
 0x24d   : > { %8397 = vmatpush3.bf16.msra.mxu1 %v8677_v26  ;;  %8494 = vmatprep.subr.bf16.mxu0 %v8679_v7  ;;  %v8682_v26 = vld [vmem:[%s11592_s4 + $0x1f0] sm:$0xff]   ;;  %v6467_v46 = vsel %vm9050_vm7, %v6465_v44, %v6466_v35  ;;  %v6022_v44 = vrot.slane %v6020_v20, 4  ;;  %v6044_v35 = vshrl.u32 %v11042_v34, 16 }
 0x24e   : > { %8400 = vmatprep.mubr.bf16.mxu1 %v7559_v38  ;;  %8398 = vmatprep.subr.bf16.mxu1 %v8680_v39  ;;  %v11103_v38 = vld [vmem:[#allocation2 + $0x50] sm:$0x1] }
 0x24f   : > { %v6473_v36 = vrot.slane %v11103_v38, 5  ;;  %v6046_v30 = vrot.slane %v6044_v35, 4 }
 0x250   : > { %8495 = vmatpush3.bf16.msra.mxu0 %v8679_v7  ;;  %v7642_v7 = vrot.slane %v6411_v9, 9  ;;  %v6491_v9 = vrot.slane %v11138_v25, 5 }
 0x251   : > { %8399 = vmatpush3.bf16.msra.mxu1 %v8680_v39  ;;  %v7643_v39 = vrot.slane %v6412_v27, 9  ;;  %v6474_v56 = vsel %vm9050_vm7, %v6472_v54, %v6473_v36  ;;  %v5985_v54 = vld [vmem:[#allocation2 + $0x24] sm:$0xf]  ;;  %v6040_v27 = vshll.u32 %v11042_v34, 16 }
 0x252   : > { %8448 = vmatprep.subr.bf16.mxu1 %v8681_v29  ;;  %v6464_v60 = vsel %vm9050_vm7, %v7642_v7, %v6463_v10  ;;  %v6487_v7 = vrot.slane %v11140_v50, 5  ;;  %v6031_v0 = vshrl.u32 %v5985_v54, 16  ;;  %v6034_v34 = vshll.u32 %v5985_v54, 16 }
 0x253   : > { %8497 = vmatmul.mubr.bf16.vlgmr.msra.gmra.mxu0 %v7664_v28  ;;  %v6414_v28 = vld [vmem:[#allocation2 + $0x60] sm:$0xe]  ;;  %v6493_v41 = vrot.slane %v6491_v9, 4 }
 0x254   : > { %8500 = vmatprep.mubr.bf16.mxu0 %v7665_v62  ;;  %8401 = vmatmul.mubr.bf16.vlgmr.msra.gmra.mxu1 %v7560_v3  ;;  %v6479_v3 = vrot.slane %v6477_v17, 4  ;;  %v6478_v62 = vsel %vm9050_vm7, %v7644_v43, %v6477_v17  ;;  %v7645_v36 = vrot.slane %v6414_v28, 9  ;;  %v8686_v43 = vld [vmem:[%s11592_s4 + $0x1d0] sm:$0xff]  }
 0x255   : > { %8449 = vmatpush3.bf16.msra.mxu1 %v8681_v29  ;;  %8404 = vmatprep.mubr.bf16.mxu1 %v7561_v12  ;;  %v6471_v12 = vsel %vm9050_vm7, %v7643_v39, %v6470_v49  ;;  %v7666_v29 = vcombine.low %v6464_v60, %v6467_v46  ;;  %v6486_v49 = vrot.slane %v6484_v51, 4  ;;  %v11158_v46 = vld [vmem:[#allocation2 + $0x74] sm:$0x1]  ;;  %v6009_v39 = vrot.slane %v6007_v42, 4 }
 0x256   : > { %8450 = vmatprep.subr.bf16.mxu1 %v8682_v26  ;;  %v7667_v21 = vcombine.low %v6471_v12, %v6474_v56  ;;  %v6481_v10 = vsel %vm9050_vm7, %v6479_v3, %v6480_v6  ;;  %v6012_v56 = vrot.slane %v6010_v13, 5  ;;  %v6485_v37 = vsel %vm9050_vm7, %v7645_v36, %v6484_v51  ;;  %v5988_v3 = vld [vmem:[#allocation2 + $0x30] sm:$0xf] }
 0x257   : > { %v7668_v17 = vcombine.low %v6478_v62, %v6481_v10  ;;  %v6488_v59 = vsel %vm9050_vm7, %v6486_v49, %v6487_v7  ;;  %v6494_v8 = vrot.slane %v11158_v46, 5  ;;  %v6026_v51 = vshll.u32 %v11040_v48, 16 }
 0x258   : > { %v6013_v20 = vor.u32 %v6012_v56, %v6009_v39  ;;  %v6064_v60 = vshll.u32 %v11052_v4, 16  ;;  %v6068_v12 = vshrl.u32 %v11052_v4, 16  ;;  %v6033_v6 = vrot.slane %v6031_v0, 4 }
 0x259   : > { %8451 = vmatpush3.bf16.msra.mxu1 %v8682_v26  ;;  %v6415_v26 = vld [vmem:[#allocation2 + $0x6c] sm:$0xe]  ;;  %v6036_v42 = vrot.slane %v6034_v34, 5  ;;  %v6055_v13 = vshrl.u32 %v5988_v3, 16  ;;  %v6495_v10 = vsel %vm9050_vm7, %v6493_v41, %v6494_v8  ;;  %v6112_v56 = vshll.u32 %v11081_v1, 16 }
 0x25a   : > { %8452 = vmatprep.subr.bf16.mxu1 %v8683_v24  ;;  %v7646_v58 = vrot.slane %v6415_v26, 9  ;;  %v6014_v49 = vrot.slane %v6013_v20, 4  ;;  %v11188_v54 = vrot.slane %v6064_v60, 5  ;;  %v6070_v62 = vrot.slane %v6068_v12, 4 }
 0x25b   : > { %8501 = vmatmul.mubr.bf16.gmra.mxu0 %v7666_v29  ;;  %v6058_v29 = vshll.u32 %v5988_v3, 16  ;;  %v6037_v31 = vor.u32 %v6036_v42, %v6033_v6  ;;  %v6050_v26 = vshll.u32 %v11072_v16, 16  ;;  %v11213_v41 = vrot.slane %v6088_v19, 5 }
 0x25c   : > { %8504 = vmatprep.mubr.bf16.mxu0 %v7667_v21  ;;  %8405 = vmatmul.mubr.bf16.gmra.mxu1 %v7562_v57  ;;  %v8685_v57 = vld [vmem:[%s11592_s4 + $0x1d8] sm:$0xff]   ;;  %v7669_v21 = vcombine.low %v6485_v37, %v6488_v59  ;;  %v6492_v48 = vsel %vm9050_vm7, %v7646_v58, %v6491_v9  ;;  %v6057_v9 = vrot.slane %v6055_v13, 4  ;;  %v6019_v16 = vsel %vm8895_vm4, %v6014_v49, %v11147_v33 }
 0x25d   : > { %8453 = vmatpush3.bf16.msra.mxu1 %v8683_v24  ;;  %8408 = vmatprep.mubr.bf16.mxu1 %v7563_v55  ;;  %v6023_v24 = vor.u32 %v6022_v44, %v11147_v33  ;;  %v11172_v55 = vrot.slane %v6040_v27, 5  ;;  %v6028_v44 = vrot.slane %v6026_v51, 5  ;;  %v6060_v27 = vrot.slane %v6058_v29, 5  ;;  %v5997_v29 = vld [vmem:[#allocation2 + $0x54] sm:$0xf] }
 0x25e   : > { %8454 = vmatprep.subr.bf16.mxu1 %v8684_v22  ;;  %v7670_v35 = vcombine.low %v6492_v48, %v6495_v10  ;;  %v6071_v39 = vor.u32 %v6070_v62, %v11188_v54  ;;  %v6038_v0 = vrot.slane %v6037_v31, 4  ;;  %v6052_v34 = vrot.slane %v6050_v26, 5 }
 0x25f   : > { %v6024_v28 = vrot.slane %v6023_v24, 4  ;;  %v6047_v4 = vor.u32 %v6046_v30, %v11172_v55  ;;  %v6061_v37 = vor.u32 %v6060_v27, %v6057_v9  ;;  %v6074_v59 = vshll.u32 %v11074_v61, 16 }
 0x260   : > { %v6094_v8 = vrot.slane %v6092_v53, 4  ;;  %v6072_v61 = vrot.slane %v6071_v39, 4  ;;  %v11218_v30 = vrot.slane %v6112_v56, 5  ;;  %v6043_v51 = vsel %vm8895_vm4, %v6038_v0, %v11172_v55 }
 0x261   : > { %8455 = vmatpush3.bf16.msra.mxu1 %v8684_v22  ;;  %v5991_v22 = vld [vmem:[#allocation2 + $0x3c] sm:$0xf]  ;;  %v6029_v32 = vsel %vm8895_vm4, %v6024_v28, %v6028_v44  ;;  %v6048_v36 = vrot.slane %v6047_v4, 4  ;;  %v6062_v60 = vrot.slane %v6061_v37, 4  ;;  %v6076_v6 = vrot.slane %v6074_v59, 5 }
 0x262   : > { %8456 = vmatprep.subr.bf16.mxu1 %v8685_v57  ;;  %v6082_v7 = vshll.u32 %v5991_v22, 16  ;;  %v6095_v15 = vor.u32 %v6094_v8, %v11213_v41  ;;  %v6160_v48 = vshll.u32 %v11113_v2, 16  ;;  %v6164_v10 = vshrl.u32 %v11113_v2, 16 }
 0x263   : > { %8505 = vmatmul.mubr.bf16.gmra.mxu0 %v7668_v17  ;;  %v6116_v17 = vshrl.u32 %v11081_v1, 16  ;;  %v6053_v3 = vsel %vm8895_vm4, %v6048_v36, %v6052_v34  ;;  %v6077_v28 = vsel %vm8895_vm4, %v6072_v61, %v6076_v6  ;;  %v6067_v4 = vsel %vm8895_vm4, %v6062_v60, %v11188_v54 }
 0x264   : > { %8508 = vmatprep.mubr.bf16.mxu0 %v7669_v21  ;;  %8409 = vmatmul.mubr.bf16.gmra.mxu1 %v7564_v14  ;;  %v6079_v14 = vshrl.u32 %v5991_v22, 16  ;;  %v6084_v1 = vrot.slane %v6082_v7, 5  ;;  %v7624_v12 = vcombine.low %v6043_v51, %v6053_v3  ;;  %v6098_v22 = vshll.u32 %v11101_v5, 16 }
 0x265   : > { %8457 = vmatpush3.bf16.msra.mxu1 %v8685_v57  ;;  %8412 = vmatprep.mubr.bf16.mxu1 %v7565_v23  ;;  %v5994_v23 = vld [vmem:[#allocation2 + $0x48] sm:$0xf]  ;;  %v7623_v57 = vcombine.low %v6019_v16, %v6029_v32  ;;  %v6118_v20 = vrot.slane %v6116_v17, 4  ;;  %v6127_v49 = vshrl.u32 %v5997_v29, 16  ;;  %v6130_v44 = vshll.u32 %v5997_v29, 16 }
 0x266   : > { %8458 = vmatprep.subr.bf16.mxu1 %v8686_v43  ;;  %v6081_v58 = vrot.slane %v6079_v14, 4  ;;  %v6103_v33 = vshrl.u32 %v5994_v23, 16  ;;  %v6106_v24 = vshll.u32 %v5994_v23, 16  ;;  %v6122_v62 = vshll.u32 %v11103_v38, 16  ;;  %v6003_v38 = vld [vmem:[#allocation2 + $0x6c] sm:$0xf] }
 0x267   : > { %v6119_v55 = vor.u32 %v6118_v20, %v11218_v30  ;;  %v7625_v9 = vcombine.low %v6067_v4, %v6077_v28  ;;  %v6096_v27 = vrot.slane %v6095_v15, 4  ;;  %v6162_v14 = vrot.slane %v6160_v48, 5 }
 0x268   : > { %v6105_v42 = vrot.slane %v6103_v33, 4  ;;  %v6108_v13 = vrot.slane %v6106_v24, 5  ;;  %v6085_v21 = vor.u32 %v6084_v1, %v6081_v58  ;;  %v6166_v36 = vrot.slane %v6164_v10, 4 }
 0x269   : > { %8459 = vmatpush3.bf16.msra.mxu1 %v8686_v43  ;;  %v6000_v43 = vld [vmem:[#allocation2 + $0x60] sm:$0xf]  ;;  %v6120_v32 = vrot.slane %v6119_v55, 4  ;;  %v6100_v54 = vrot.slane %v6098_v22, 5  ;;  %v6129_v7 = vrot.slane %v6127_v49, 4  ;;  %v6132_v5 = vrot.slane %v6130_v44, 5 }
 0x26a   : > { %8460 = vmatprep.subr.bf16.mxu1 %v8687_v47  ;;  %v6151_v31 = vshrl.u32 %v6000_v43, 16  ;;  %v6154_v26 = vshll.u32 %v6000_v43, 16  ;;  %v6086_v2 = vrot.slane %v6085_v21, 4  ;;  %v6124_v53 = vrot.slane %v6122_v62, 5 }
 0x26b   : > { %8509 = vmatmul.mubr.bf16.gmra.mxu0 %v7670_v35  ;;  %v6138_v35 = vrot.slane %v6136_v11, 5  ;;  %v6101_v39 = vsel %vm8895_vm4, %v6096_v27, %v6100_v54  ;;  %v6184_v17 = vshll.u32 %v11138_v25, 16  ;;  %v6188_v0 = vshrl.u32 %v11138_v25, 16 }
 0x26c   : > { %8413 = vmatmul.mubr.bf16.gmra.mxu1 %v7566_v63  ;;  %v6140_v63 = vshrl.u32 %v11097_v45, 16  ;;  %v6109_v45 = vor.u32 %v6108_v13, %v6105_v42  ;;  %v6153_v23 = vrot.slane %v6151_v31, 4  ;;  %v6156_v16 = vrot.slane %v6154_v26, 5 }
 0x26d   : > { %8461 = vmatpush3.bf16.msra.mxu1 %v8687_v47  ;;  %8464 = vmatprep.mubr.bf16.mxu1 %v7623_v57  ;;  %v6091_v34 = vsel %vm8895_vm4, %v6086_v2, %v11213_v41  ;;  %v6125_v37 = vsel %vm8895_vm4, %v6120_v32, %v6124_v53  ;;  %v6167_v59 = vor.u32 %v6166_v36, %v6162_v14  ;;  %v6175_v58 = vshrl.u32 %v6003_v38, 16 }
 0x26e   : > { %8462 = vmatprep.subr.bf16.mxu1 %v8688_v52  ;;  %v6142_v47 = vrot.slane %v6140_v63, 4  ;;  %v6110_v19 = vrot.slane %v6109_v45, 4  ;;  %v6133_v57 = vor.u32 %v6132_v5, %v6129_v7  ;;  %v6178_v33 = vshll.u32 %v6003_v38, 16 }
 0x26f   : > { %v7626_v24 = vcombine.low %v6091_v34, %v6101_v39  ;;  %v6157_v1 = vor.u32 %v6156_v16, %v6153_v23  ;;  %v6170_v25 = vshll.u32 %v11140_v50, 16  ;;  %v6186_v41 = vrot.slane %v6184_v17, 5 }
 0x270   : > { %v6143_v56 = vor.u32 %v6142_v47, %v6138_v35  ;;  %v6115_v3 = vsel %vm8895_vm4, %v6110_v19, %v11218_v30  ;;  %v6190_v20 = vrot.slane %v6188_v0, 4  ;;  %v6168_v51 = vrot.slane %v6167_v59, 4 }
 0x271   : > { %8463 = vmatpush3.bf16.msra.mxu1 %v8688_v52  ;;  %v6146_v52 = vshll.u32 %v11128_v18, 16  ;;  %v7627_v8 = vcombine.low %v6115_v3, %v6125_v37  ;;  %v6134_v60 = vrot.slane %v6133_v57, 4  ;;  %v6177_v18 = vrot.slane %v6175_v58, 4 }
 0x272   : > { %v6144_v61 = vrot.slane %v6143_v56, 4  ;;  %v6180_v6 = vrot.slane %v6178_v33, 5  ;;  %v6158_v42 = vrot.slane %v6157_v1, 4  ;;  %v6172_v13 = vrot.slane %v6170_v25, 5 }
 0x273   : > { %v6191_v30 = vor.u32 %v6190_v20, %v6186_v41  ;;  %v6139_v21 = vsel %vm8895_vm4, %v6134_v60, %v6138_v35  ;;  %v6194_v11 = vshll.u32 %v11158_v46, 16 }
 0x274   : > { %8465 = vmatmul.mubr.bf16.vlgmr.msra.gmra.mxu1 %v7624_v12  ;;  %v6148_v12 = vrot.slane %v6146_v52, 5  ;;  %v6173_v50 = vsel %vm8895_vm4, %v6168_v51, %v6172_v13  ;;  %v6181_v15 = vor.u32 %v6180_v6, %v6177_v18  ;;  %v6163_v43 = vsel %vm8895_vm4, %v6158_v42, %v6162_v14 }
 0x275   : > { %8468 = vmatprep.mubr.bf16.mxu1 %v7625_v9  ;;  %v7629_v28 = vcombine.low %v6163_v43, %v6173_v50  ;;  %v6192_v55 = vrot.slane %v6191_v30, 4  ;;  %v6196_v10 = vrot.slane %v6194_v11, 5 }
 0x276   : > { %v6149_v29 = vsel %vm8895_vm4, %v6144_v61, %v6148_v12  ;;  %v6182_v48 = vrot.slane %v6181_v15, 4 }
 0x277   : > { %v7628_v63 = vcombine.low %v6139_v21, %v6149_v29  ;;  %v6197_v4 = vsel %vm8895_vm4, %v6192_v55, %v6196_v10 }
 0x278   : > { %v6187_v22 = vsel %vm8895_vm4, %v6182_v48, %v6186_v41 }
 0x279   : > { %v7630_v49 = vcombine.low %v6187_v22, %v6197_v4 }
 0x27c   : > { %8469 = vmatmul.mubr.bf16.gmra.mxu1 %v7626_v24 }
 0x27d   : > { %8472 = vmatprep.mubr.bf16.mxu1 %v7627_v8 }
 0x284   : > { %8473 = vmatmul.mubr.bf16.gmra.mxu1 %v7628_v63 }
 0x285   : > { %8476 = vmatprep.mubr.bf16.mxu1 %v7629_v28 }
 0x28c   : > { %8477 = vmatmul.mubr.bf16.gmra.mxu1 %v7630_v49 }
 0x298   : > { %v8306_v44 = vpop.f32.mrf.mxu0 }
 0x29a   : > { %v4693_v46 = vpop.f32.mrf.mxu0 }
 0x29c   : > { %v8307_v45 = vpop.f32.mrf.mxu0 }
 0x29e   : > { %v4696_v62 = vpop.f32.mrf.mxu0 }
 0x2a3   : > { %v8242_v31 = vpop.f32.mrf.mxu1 }
 0x2a5   : > { %v8310_v26 = vpop.f32.mrf.mxu0  ;;  %v4226_v9 = vpop.f32.mrf.mxu1 }
 0x2a7   : > { %v4709_v27 = vpop.f32.mrf.mxu0  ;;  %v8243_v35 = vpop.f32.mrf.mxu1 }
 0x2a9   : > { %v8311_v47 = vpop.f32.mrf.mxu0  ;;  %v4229_v2 = vpop.f32.mrf.mxu1 }
 0x2ab   : > { %v4712_v32 = vpop.f32.mrf.mxu0 }
 0x2af   : > { %v8246_v14 = vpop.f32.mrf.mxu1 }
 0x2b0   : > { %v8314_v54 = vpop.f32.mrf.mxu0 }
 0x2b1   : > { %v4242_v36 = vpop.f32.mrf.mxu1 }
 0x2b2   : > { %v4725_v40 = vpop.f32.mrf.mxu0 }
 0x2b3   : > { %v8247_v7 = vpop.f32.mrf.mxu1 }
 0x2b4   : > { %v8315_v19 = vpop.f32.mrf.mxu0 }
 0x2b5   : > { %v4245_v5 = vpop.f32.mrf.mxu1 }
 0x2b6   : > { %v4728_v23 = vpop.f32.mrf.mxu0 }
 0x2bb   : > { %v8250_v53 = vpop.f32.mrf.mxu1  ;;  %v11263_v38 = vpop.f32.mrf.mxu0 }
 0x2bd   : > { %v4258_v16 = vpop.f32.mrf.mxu1  ;;  %v11265_v56 = vpop.f32.mrf.mxu0 }
 0x2bf   : > { %v8251_v39 = vpop.f32.mrf.mxu1  ;;  %v11267_v0 = vpop.f32.mrf.mxu0 }
 0x2c1   : > { %v4261_v17 = vpop.f32.mrf.mxu1  ;;  %v11269_v59 = vpop.f32.mrf.mxu0 }
 0x2cb   : > { %v8254_v34 = vpop.f32.mrf.mxu1 }
 0x2cd   : > { %v4274_v37 = vpop.f32.mrf.mxu1 }
 0x2cf   : > { %v8255_v57 = vpop.f32.mrf.mxu1 }
 0x2d0   : > { %v11271_v52 = vpop.f32.mrf.mxu0 }
 0x2d1   : > { %v4277_v58 = vpop.f32.mrf.mxu1 }
 0x2d2   : > { %v11273_v33 = vpop.f32.mrf.mxu0 }
 0x2d3   : > { %v8274_v24 = vpop.f32.mrf.mxu1 }
 0x2d4   : > { %v4428_v3 = vadd.f32 %v8274_v24, %v8242_v31  ;;  %v11275_v1 = vpop.f32.mrf.mxu0 }
 0x2d5   : > { %v4419_v25 = vpop.f32.mrf.mxu1 }
 0x2d6   : > { %v4420_v8 = vadd.f32 %v4419_v25, %v4226_v9  ;;  %v11277_v61 = vadd.f32 %v8306_v44, %v4428_v3  ;;  %v11279_v41 = vpop.f32.mrf.mxu0 }
 0x2d7   : > { %v8275_v20 = vpop.f32.mrf.mxu1 }
 0x2d8   : > { %v4431_v51 = vadd.f32 %v8275_v20, %v8243_v35  ;;  %v11281_v60 = vadd.f32 %v4693_v46, %v4420_v8 }
 0x2d9   : > { %v11283_v12 = vpop.f32.mrf.mxu0  ;;  %v4422_v18 = vpop.f32.mrf.mxu1 }
 0x2da   : > { %v4423_v6 = vadd.f32 %v4422_v18, %v4229_v2  ;;  %v11285_v42 = vadd.f32 %v8307_v45, %v4431_v51 }
 0x2db   : > { %v11287_v13 = vpop.f32.mrf.mxu0  ;;  %v8278_v29 = vpop.f32.mrf.mxu1 }
 0x2dc   : > { %v4444_v30 = vadd.f32 %v8278_v29, %v8246_v14  ;;  %v11289_v50 = vadd.f32 %v4696_v62, %v4423_v6 }
 0x2dd   : > { %v11291_v21 = vpop.f32.mrf.mxu0  ;;  %v4435_v15 = vpop.f32.mrf.mxu1 }
 0x2de   : > { %v4436_v11 = vadd.f32 %v4435_v15, %v4242_v36  ;;  %v11293_v63 = vadd.f32 %v8310_v26, %v4444_v30 }
 0x2df   : > { %v11295_v43 = vpop.f32.mrf.mxu0  ;;  %v8279_v28 = vpop.f32.mrf.mxu1 }
 0x2e0   : > { %v4447_v55 = vadd.f32 %v8279_v28, %v8247_v7  ;;  %v11297_v48 = vadd.f32 %v4709_v27, %v4436_v11 }
 0x2e1   : > { %v4438_v10 = vpop.f32.mrf.mxu1 }
 0x2e2   : > { %v4439_v4 = vadd.f32 %v4438_v10, %v4245_v5  ;;  %v11299_v22 = vadd.f32 %v8311_v47, %v4447_v55 }
 0x2e3   : > { %v11301_v49 = vpop.f32.mrf.mxu0  ;;  %v8282_v44 = vpop.f32.mrf.mxu1 }
 0x2e4   : > { %v4460_v46 = vadd.f32 %v8282_v44, %v8250_v53  ;;  %v11303_v45 = vadd.f32 %v4712_v32, %v4439_v4 }
 0x2e5   : > { %v11305_v62 = vpop.f32.mrf.mxu0  ;;  %v4451_v31 = vpop.f32.mrf.mxu1 }
 0x2e6   : > { %v4452_v26 = vadd.f32 %v4451_v31, %v4258_v16  ;;  %v11307_v9 = vadd.f32 %v8314_v54, %v4460_v46 }
 0x2e7   : > { %v11309_v35 = vpop.f32.mrf.mxu0  ;;  %v8283_v27 = vpop.f32.mrf.mxu1 }
 0x2e8   : > { %11690 = vst [vmem:[#allocation15_spill] sm:$0xff] %v11309_v35  ;;  %v4463_v2 = vadd.f32 %v8283_v27, %v8251_v39  ;;  %v11311_v14 = vadd.f32 %v4725_v40, %v4452_v26 }
 0x2e9   : > { %v11313_v47 = vpop.f32.mrf.mxu0  ;;  %v4454_v36 = vpop.f32.mrf.mxu1 }
 0x2ea   : > { %11691 = vst [vmem:[#allocation17_spill] sm:$0xff] %v11313_v47  ;;  %v4455_v7 = vadd.f32 %v4454_v36, %v4261_v17  ;;  %v11315_v5 = vadd.f32 %v8315_v19, %v4463_v2 }
 0x2eb   : > { %v11317_v32 = vpop.f32.mrf.mxu0  ;;  %v8286_v53 = vpop.f32.mrf.mxu1 }
 0x2ec   : > { %11692 = vst [vmem:[#allocation19_spill] sm:$0xff] %v11317_v32  ;;  %v4476_v24 = vadd.f32 %v8286_v53, %v8254_v34  ;;  %v11319_v3 = vadd.f32 %v4728_v23, %v4455_v7 }
 0x2ed   : > { %v11321_v54 = vpop.f32.mrf.mxu0  ;;  %v4467_v16 = vpop.f32.mrf.mxu1 }
 0x2ee   : > { %11693 = vst [vmem:[#allocation20_spill] sm:$0xff] %v11321_v54  ;;  %v4468_v25 = vadd.f32 %v4467_v16, %v4274_v37  ;;  %v11324_v39 = vadd.f32 %v11263_v38, %v4476_v24 }
 0x2ef   : > { %v11326_v40 = vpop.f32.mrf.mxu0  ;;  %v8287_v8 = vpop.f32.mrf.mxu1 }
 0x2f0   : > { %11694 = vst [vmem:[#allocation5_spill] sm:$0xff] %v11326_v40  ;;  %v4479_v20 = vadd.f32 %v8287_v8, %v8255_v57  ;;  %v11329_v19 = vadd.f32 %v11265_v56, %v4468_v25 }
 0x2f1   : > { %v11331_v17 = vpop.f32.mrf.mxu0  ;;  %v4470_v51 = vpop.f32.mrf.mxu1 }
 0x2f2   : > { %11695 = vst [vmem:[#allocation9_spill] sm:$0xff] %v11331_v17  ;;  %v4471_v34 = vadd.f32 %v4470_v51, %v4277_v58  ;;  %v11334_v23 = vadd.f32 %v11267_v0, %v4479_v20 }
 0x2f3   : > { %v11336_v18 = vpop.f32.mrf.mxu0  ;;  %v8338_v37 = vpop.f32.mrf.mxu1 }
 0x2f4   : > { %v11339_v38 = vadd.f32 %v11269_v59, %v4471_v34  ;;  %v5001_v32 = vadd.f32 %v8338_v37, %v11277_v61 }
 0x2f5   : > { %v11341_v6 = vpop.f32.mrf.mxu0  ;;  %v4936_v29 = vpop.f32.mrf.mxu1 }
 0x2f7   : > { %v11343_v57 = vpop.f32.mrf.mxu0  ;;  %v8339_v56 = vpop.f32.mrf.mxu1 }
 0x2f9   : > { %v11345_v30 = vpop.f32.mrf.mxu0  ;;  %v4939_v15 = vpop.f32.mrf.mxu1 }
 0x2fb   : > { %v11347_v11 = vpop.f32.mrf.mxu0  ;;  %v8342_v58 = vpop.f32.mrf.mxu1 }
 0x2fc   : > { %11696 = vst [vmem:[#allocation6_spill] sm:$0xff] %v11347_v11 }
 0x2fd   : > { %v11349_v0 = vpop.f32.mrf.mxu0  ;;  %v4952_v28 = vpop.f32.mrf.mxu1 }
 0x2fe   : > { %11697 = vst [vmem:[#allocation23_spill] sm:$0xff] %v11349_v0 }
 0x2ff   : > { %v11351_v55 = vpop.f32.mrf.mxu0  ;;  %v8343_v10 = vpop.f32.mrf.mxu1 }
 0x300   : > { %11698 = vst [vmem:[#allocation11_spill] sm:$0xff] %v11351_v55 }
 0x301   : > { %v11353_v59 = vpop.f32.mrf.mxu0  ;;  %v4955_v4 = vpop.f32.mrf.mxu1 }
 0x302   : > { %11699 = vst [vmem:[#allocation7_spill] sm:$0xff] %v11353_v59 }
 0x303   : > { %v11355_v44 = vpop.f32.mrf.mxu0  ;;  %v8346_v46 = vpop.f32.mrf.mxu1 }
 0x304   : > { %11700 = vst [vmem:[#allocation12_spill] sm:$0xff] %v11355_v44 }
 0x305   : > { %v11357_v31 = vpop.f32.mrf.mxu0  ;;  %v4968_v26 = vpop.f32.mrf.mxu1 }
 0x306   : > { %11701 = vst [vmem:[#allocation8_spill] sm:$0xff] %v11357_v31 }
 0x307   : > { %v11359_v27 = vpop.f32.mrf.mxu0  ;;  %v11361_v2 = vpop.f32.mrf.mxu1 }
 0x308   : > { %11702 = vst [vmem:[#allocation26_spill] sm:$0xff] %v11359_v27 }
 0x309   : > { %v11363_v36 = vpop.f32.mrf.mxu0  ;;  %v11365_v7 = vpop.f32.mrf.mxu1 }
 0x30a   : > { %11703 = vst [vmem:[#allocation10_spill] sm:$0xff] %v11363_v36 }
 0x30b   : > { %v11367_v53 = vpop.f32.mrf.mxu0  ;;  %v8350_v24 = vpop.f32.mrf.mxu1 }
 0x30c   : > { %11704 = vst [vmem:[#allocation13_spill] sm:$0xff] %v11367_v53 }
 0x30d   : > { %v11369_v16 = vpop.f32.mrf.mxu0  ;;  %v11371_v25 = vpop.f32.mrf.mxu1 }
 0x30e   : > { %11705 = vst [vmem:[#allocation28_spill] sm:$0xff] %v11369_v16 }
 0x30f   : > { %v11373_v8 = vpop.f32.mrf.mxu1  ;;  %v11375_v20 = vpop.f32.mrf.mxu0 }
 0x310   : > { %11706 = vst [vmem:[#allocation14_spill] sm:$0xff] %v11375_v20 }
 0x311   : > { %v11377_v51 = vpop.f32.mrf.mxu1  ;;  %v11379_v27 = vpop.f32.mrf.mxu0 }
 0x312   : > { %11707 = vst [vmem:[#allocation16_spill] sm:$0xff] %v11379_v27 }
 0x313   : > { %v8498_v44 = vpop.f32.mrf.mxu0 }
 0x314   : > { %v8402_v34 = vpop.f32.mrf.mxu1 }
 0x315   : > { %v11381_v53 = vpop.f32.mrf.mxu0 }
 0x316   : > { %v5660_v31 = vpop.f32.mrf.mxu1  ;;  %11708 = vst [vmem:[#allocation18_spill] sm:$0xff] %v11381_v53 }
 0x317   : > { %v11385_v17 = vpop.f32.mrf.mxu0 }
 0x318   : > { %v8403_v36 = vpop.f32.mrf.mxu1  ;;  %11710 = vst [vmem:[#allocation22_spill] sm:$0xff] %v11385_v17  ;;  %v5002_v17 = vadd.f32 %v8339_v56, %v11285_v42  ;;  %v5004_v42 = vadd.f32 %v4955_v4, %v11303_v45 }
 0x319   : > { %v11391_v40 = vpop.f32.mrf.mxu0 }
 0x31a   : > { %v5663_v59 = vpop.f32.mrf.mxu1  ;;  %11712 = vst [vmem:[#allocation25_spill] sm:$0xff] %v11391_v40 }
 0x31b   : > { %v11398_v47 = vpop.f32.mrf.mxu0 }
 0x31c   : > { %v8406_v55 = vpop.f32.mrf.mxu1 }
 0x31d   : > { %v11407_v40 = vpop.f32.mrf.mxu0 }
 0x31e   : > { %v5676_v0 = vpop.f32.mrf.mxu1 }
 0x31f   : > { %v11421_v56 = vpop.f32.mrf.mxu0 }
 0x320   : > { %v11383_v16 = vpop.f32.mrf.mxu1 }
 0x321   : > { %11709 = vst [vmem:[#allocation21_spill] sm:$0xff] %v11383_v16  ;;  %v4999_v16 = vadd.f32 %v4936_v29, %v11281_v60  ;;  %v5003_v60 = vadd.f32 %v4952_v28, %v11297_v48  ;;  %v5006_v29 = vadd.f32 %v8343_v10, %v11299_v22 }
 0x322   : > { %v11387_v11 = vpop.f32.mrf.mxu1 }
 0x323   : > { %v5425_v37 = vadd.f32 %v11273_v33, %v4999_v16  ;;  %v5007_v33 = vadd.f32 %v4968_v26, %v11311_v14  ;;  %v5432_v28 = vadd.f32 %v11291_v21, %v5006_v29  ;;  %v11438_v14 = vpop.f32.mrf.mxu0  ;;  %v5008_v21 = vadd.f32 %v11365_v7, %v11319_v3  ;;  %v11725_v29 = vld [vmem:[#allocation5_spill] sm:$0xff] }
 0x324   : > { %v11389_v20 = vpop.f32.mrf.mxu1  ;;  %v5014_v3 = vadd.f32 %v11373_v8, %v11334_v23  ;;  %v11718_v23 = vld [vmem:[#allocation18_spill] sm:$0xff] }
 0x325   : > { %11711 = vst [vmem:[#allocation24_spill] sm:$0xff] %v11389_v20  ;;  %v5427_v20 = vadd.f32 %v11271_v52, %v5001_v32  ;;  %v5009_v52 = vadd.f32 %v8346_v46, %v11307_v9  ;;  %v5723_v32 = vadd.f32 %v5660_v31, %v5425_v37  ;;  %v5429_v9 = vadd.f32 %v11287_v13, %v5003_v60  ;;  %v11466_v26 = vpop.f32.mrf.mxu0  ;;  %v11724_v37 = vld [vmem:[#allocation20_spill] sm:$0xff] }
 0x326   : > { %v11393_v54 = vpop.f32.mrf.mxu1  ;;  %v5010_v13 = vadd.f32 %v11361_v2, %v11315_v5 }
 0x327   : > { %11713 = vst [vmem:[#allocation27_spill] sm:$0xff] %v11393_v54  ;;  %v5000_v54 = vadd.f32 %v4939_v15, %v11289_v50  ;;  %v5725_v61 = vadd.f32 %v8402_v34, %v5427_v20  ;;  %v5428_v50 = vadd.f32 %v11275_v1, %v5002_v17  ;;  %v5727_v31 = vadd.f32 %v5676_v0, %v5429_v9  ;;  %v11722_v0 = vld [vmem:[#allocation19_spill] sm:$0xff] }
 0x328   : > { %v11395_v27 = vpop.f32.mrf.mxu1  ;;  %v11729_v9 = vld [vmem:[#allocation23_spill] sm:$0xff] }
 0x329   : > { %11714 = vst [vmem:[#allocation29_spill] sm:$0xff] %v11395_v27  ;;  %v5726_v22 = vadd.f32 %v8403_v36, %v5428_v50  ;;  %v5968_v15 = vadd.f32 %v11336_v18, %v5725_v61  ;;  %v5433_v18 = vadd.f32 %v11305_v62, %v5007_v33  ;;  %v5012_v62 = vadd.f32 %v11377_v51, %v11339_v38  ;;  %v11720_v36 = vld [vmem:[#allocation15_spill] sm:$0xff]  ;;  %v11723_v51 = vld [vmem:[#allocation22_spill] sm:$0xff] }
 0x32a   : > { %v11400_v35 = vpop.f32.mrf.mxu1  ;;  %v5436_v7 = vadd.f32 %v11720_v36, %v5010_v13 }
 0x32b   : > { %11715 = vst [vmem:[#allocation30_spill] sm:$0xff] %v11400_v35  ;;  %v5005_v35 = vadd.f32 %v8342_v58, %v11293_v63  ;;  %v5426_v63 = vadd.f32 %v11279_v41, %v5000_v54  ;;  %v5430_v41 = vadd.f32 %v11295_v43, %v5004_v42  ;;  %v5435_v54 = vadd.f32 %v11301_v49, %v5009_v52  ;;  %v11452_v43 = vld [vmem:[%s11593_s5] ss:$0 sm:$0xff] }
 0x32c   : > { %v11403_v53 = vpop.f32.mrf.mxu1  ;;  %v5969_v5 = vadd.f32 %v11343_v57, %v5726_v22  ;;  %v11472_v57 = vld [vmem:[%s11594_s6] ss:$0 sm:$0xff]  ;;  %v11485_v42 = vadd.f32 %v11725_v29, %v5014_v3  ;;  %v11738_v29 = vld [vmem:[#allocation26_spill] sm:$0xff] }
 0x32d   : > { %11716 = vst [vmem:[#allocation31_spill] sm:$0xff] %v11403_v53  ;;  %v5724_v58 = vadd.f32 %v5663_v59, %v5426_v63  ;;  %v5431_v45 = vadd.f32 %v11283_v12, %v5005_v35  ;;  %v5966_v12 = vadd.f32 %v11341_v6, %v5723_v32  ;;  %v5013_v35 = vadd.f32 %v8350_v24, %v11324_v39  ;;  %v11721_v24 = vld [vmem:[#allocation17_spill] sm:$0xff]  ;;  %v11726_v32 = vld [vmem:[#allocation6_spill] sm:$0xff]  ;;  %v11491_v63 = vpop.f32.mrf.mxu0 }
 0x32e   : > { %v11410_v27 = vpop.f32.mrf.mxu1  ;;  %v5011_v6 = vadd.f32 %v11371_v25, %v11329_v19  ;;  %v5728_v8 = vadd.f32 %v11387_v11, %v5430_v41  ;;  %v11727_v11 = vld [vmem:[#allocation9_spill] sm:$0xff]  ;;  %v11733_v3 = vld [vmem:[#allocation27_spill] sm:$0xff] }
 0x32f   : > { %v5729_v39 = vadd.f32 %v8406_v55, %v5431_v45  ;;  %v5967_v46 = vadd.f32 %v11345_v30, %v5724_v58  ;;  %v11719_v55 = vld [vmem:[#allocation21_spill] sm:$0xff]  ;;  %v5434_v30 = vadd.f32 %v11721_v24, %v5008_v21  ;;  %v5439_v16 = vadd.f32 %v11722_v0, %v5013_v35  ;;  %v11731_v21 = vld [vmem:[#allocation11_spill] sm:$0xff] }
 0x330   : > { %v11416_v53 = vpop.f32.mrf.mxu1  ;;  %v5730_v2 = vadd.f32 %v11719_v55, %v5432_v28  ;;  %v5437_v60 = vadd.f32 %v11724_v37, %v5011_v6  ;;  %v11494_v22 = vadd.f32 %v11727_v11, %v5012_v62  ;;  %v11728_v58 = vld [vmem:[#allocation25_spill] sm:$0xff]  ;;  %v5970_v28 = vadd.f32 %v11729_v9, %v5727_v31 }
 0x331   : > { %v5972_v50 = vadd.f32 %v11726_v32, %v5729_v39  ;;  %v5731_v62 = vadd.f32 %v11733_v3, %v5433_v18  ;;  %v11734_v39 = vld [vmem:[#allocation29_spill] sm:$0xff] }
 0x332   : > { %v11426_v48 = vpop.f32.mrf.mxu1  ;;  %v5973_v35 = vadd.f32 %v11731_v21, %v5730_v2  ;;  %v11735_v2 = vld [vmem:[#allocation30_spill] sm:$0xff] }
 0x333   : > { %v5732_v36 = vadd.f32 %v11735_v2, %v5434_v30 }
 0x334   : > { %v8466_v1 = vpop.f32.mrf.mxu1 }
 0x335   : > { %v6394_v17 = vadd.f32 %v8466_v1, %v5968_v15  ;;  %v11730_v1 = vld [vmem:[#allocation24_spill] sm:$0xff] }
 0x336   : > { %v6329_v49 = vpop.f32.mrf.mxu1  ;;  %v5733_v41 = vadd.f32 %v11730_v1, %v5435_v54  ;;  %v11740_v1 = vld [vmem:[#allocation10_spill] sm:$0xff] }
 0x337   : > { %v6692_v10 = vadd.f32 %v8498_v44, %v6394_v17  ;;  %v6392_v59 = vadd.f32 %v6329_v49, %v5966_v12 }
 0x338   : > { %v8467_v4 = vpop.f32.mrf.mxu1 }
 0x339   : > { %v6715_v19 = vmul.f32 %v11452_v43, %v6692_v10  ;;  %v6690_v44 = vadd.f32 %v11718_v23, %v6392_v59  ;;  %v6395_v38 = vadd.f32 %v8467_v4, %v5969_v5  ;;  %v11732_v59 = vld [vmem:[#allocation7_spill] sm:$0xff]  ;;  %v5734_v4 = vadd.f32 %v11734_v39, %v5436_v7  ;;  %v11736_v7 = vld [vmem:[#allocation12_spill] sm:$0xff] }
 0x33a   : > { %v6332_v25 = vpop.f32.mrf.mxu1  ;;  %v5971_v5 = vadd.f32 %v11732_v59, %v5728_v8  ;;  %v5976_v0 = vadd.f32 %v11736_v7, %v5733_v41  ;;  %v5975_v41 = vadd.f32 %v11740_v1, %v5732_v36 }
 0x33b   : > { %v6713_v20 = vmul.f32 %v11452_v43, %v6690_v44  ;;  %v6693_v34 = vadd.f32 %v11723_v51, %v6395_v38  ;;  %v6393_v61 = vadd.f32 %v6332_v25, %v5967_v46  ;;  %v6738_v52 = vadd.f32 %v11472_v57, %v6715_v19  ;;  %v8507_v19 = vpop.f32.mrf.mxu0 }
 0x33c   : > { %v8470_v33 = vpop.f32.mrf.mxu1 }
 0x33d   : > { %v6716_v15 = vmul.f32 %v11452_v43, %v6693_v34  ;;  %v6691_v45 = vadd.f32 %v11728_v58, %v6393_v61  ;;  %v6736_v17 = vadd.f32 %v11472_v57, %v6713_v20  ;;  %v6398_v12 = vadd.f32 %v8470_v33, %v5972_v50  ;;  %v11737_v61 = vld [vmem:[#allocation8_spill] sm:$0xff]  ;;  %v6662_v32 = vpop.f32.mrf.mxu0  ;;  %v11739_v58 = vld [vmem:[#allocation31_spill] sm:$0xff] }
 0x33e   : > { %v6345_v13 = vpop.f32.mrf.mxu1  ;;  %v6754_v46 = vmax.f32 %v6738_v52, 0.0  ;;  %v5974_v37 = vadd.f32 %v11737_v61, %v5731_v62  ;;  %v5977_v52 = vadd.f32 %v11738_v29, %v5734_v4 }
 0x33f   : > { %v6739_v49 = vadd.f32 %v11472_v57, %v6716_v15  ;;  %v6714_v6 = vmul.f32 %v11452_v43, %v6691_v45  ;;  %v6396_v10 = vadd.f32 %v6345_v13, %v5970_v28  ;;  %v6696_v54 = vadd.f32 %v11398_v47, %v6398_v12  ;;  %v8510_v59 = vpop.f32.mrf.mxu0 }
 0x340   : > { %v8471_v31 = vpop.f32.mrf.mxu1  ;;  %v6752_v24 = vmax.f32 %v6736_v17, 0.0  ;;  %v5737_v45 = vadd.f32 %v11739_v58, %v5439_v16  ;;  %v5735_v17 = vadd.f32 %v11410_v27, %v5437_v60  ;;  %v5738_v27 = vadd.f32 %v11416_v53, %v11485_v42 }
 0x341   : > { %v6755_v23 = vmax.f32 %v6739_v49, 0.0  ;;  %v6737_v44 = vadd.f32 %v11472_v57, %v6714_v6  ;;  %v6694_v38 = vadd.f32 %v11407_v40, %v6396_v10  ;;  %v6399_v55 = vadd.f32 %v8471_v31, %v5973_v35  ;;  %v6675_v36 = vpop.f32.mrf.mxu0 }
 0x342   : > { %v6719_v18 = vmul.f32 %v11452_v43, %v6696_v54  ;;  %v6348_v47 = vpop.f32.mrf.mxu1  ;;  %v5736_v53 = vadd.f32 %v11426_v48, %v11494_v22 }
 0x343   : > { %v7744_v25 = vpack.c.bf16 %v6755_v23, %v6754_v46  ;;  %v6753_v8 = vmax.f32 %v6737_v44, 0.0  ;;  %v6717_v20 = vmul.f32 %v11452_v43, %v6694_v38  ;;  %v6697_v40 = vadd.f32 %v11421_v56, %v6399_v55  ;;  %v8511_v29 = vpop.f32.mrf.mxu0 }
 0x344   : > { %v6742_v30 = vadd.f32 %v11472_v57, %v6719_v18  ;;  %v6397_v51 = vadd.f32 %v6348_v47, %v5971_v5  ;;  %v8474_v34 = vpop.f32.mrf.mxu1  ;;  %v11742_v18 = vld [vmem:[#allocation28_spill] sm:$0xff] }
 0x345   : > { %7776 = vst [vmem:[%s11515_s21 + $0x8] sm:$0xff] %v7744_v25   ;;  %v7739_v50 = vpack.c.bf16 %v6753_v8, %v6752_v24  ;;  %v6848_v33 = vadd.f32 %v6753_v8, %v6752_v24  ;;  %v6740_v11 = vadd.f32 %v11472_v57, %v6717_v20  ;;  %v6720_v15 = vmul.f32 %v11452_v43, %v6697_v40 }
 0x346   : > { %v6695_v56 = vadd.f32 %v11438_v14, %v6397_v51  ;;  %v6402_v9 = vadd.f32 %v8474_v34, %v5976_v0  ;;  %v6361_v28 = vpop.f32.mrf.mxu1  ;;  %v6758_v35 = vmax.f32 %v6742_v30, 0.0  ;;  %v5978_v47 = vadd.f32 %v11742_v18, %v5735_v17  ;;  %v11743_v51 = vld [vmem:[#allocation14_spill] sm:$0xff] }
 0x347   : > { %7740 = vst [vmem:[%s11515_s21] sm:$0xff] %v7739_v50   ;;  %v6849_v12 = vadd.f32 %v6848_v33, %v6754_v46  ;;  %v6743_v13 = vadd.f32 %v11472_v57, %v6720_v15  ;;  %v6400_v21 = vadd.f32 %v6361_v28, %v5974_v37  ;;  %v6756_v49 = vmax.f32 %v6740_v11, 0.0  ;;  %v11741_v46 = vld [vmem:[#allocation13_spill] sm:$0xff] }
 0x348   : > { %v6718_v6 = vmul.f32 %v11452_v43, %v6695_v56  ;;  %v6700_v10 = vadd.f32 %v11466_v26, %v6402_v9  ;;  %v8475_v16 = vpop.f32.mrf.mxu1  ;;  %v5980_v54 = vadd.f32 %v11741_v46, %v5737_v45  ;;  %v5981_v34 = vadd.f32 %v11743_v51, %v5738_v27  ;;  %v11744_v45 = vld [vmem:[#allocation16_spill] sm:$0xff] }
 0x349   : > { %v6850_v14 = vadd.f32 %v6849_v12, %v6755_v23  ;;  %v6759_v5 = vmax.f32 %v6743_v13, 0.0  ;;  %v6698_v3 = vadd.f32 %v11491_v63, %v6400_v21  ;;  %v6403_v62 = vadd.f32 %v8475_v16, %v5977_v52  ;;  %v6678_v21 = vpop.f32.mrf.mxu0 }
 0x34a   : > { %v6741_v60 = vadd.f32 %v11472_v57, %v6718_v6  ;;  %v6723_v39 = vmul.f32 %v11452_v43, %v6700_v10  ;;  %v6364_v4 = vpop.f32.mrf.mxu1  ;;  %v5979_v56 = vadd.f32 %v11744_v45, %v5736_v53 }
 0x34b   : > { %v6851_v31 = vadd.f32 %v6850_v14, %v6756_v49  ;;  %v7754_v26 = vpack.c.bf16 %v6759_v5, %v6758_v35  ;;  %v6721_v44 = vmul.f32 %v11452_v43, %v6698_v3  ;;  %v6701_v23 = vadd.f32 %v8507_v19, %v6403_v62 }
 0x34c   : > { %v6757_v38 = vmax.f32 %v6741_v60, 0.0  ;;  %v6746_v63 = vadd.f32 %v11472_v57, %v6723_v39  ;;  %v6401_v55 = vadd.f32 %v6364_v4, %v5975_v41  ;;  %v8478_v2 = vpop.f32.mrf.mxu1 }
 0x34d   : > { %7778 = vst [vmem:[%s11515_s21 + $0x18] sm:$0xff] %v7754_v26   ;;  %v6724_v42 = vmul.f32 %v11452_v43, %v6701_v23  ;;  %v6406_v24 = vadd.f32 %v8478_v2, %v5980_v54  ;;  %v6744_v19 = vadd.f32 %v11472_v57, %v6721_v44 }
 0x34e   : > { %v7749_v7 = vpack.c.bf16 %v6757_v38, %v6756_v49  ;;  %v6852_v0 = vadd.f32 %v6851_v31, %v6757_v38  ;;  %v6699_v25 = vadd.f32 %v6662_v32, %v6401_v55  ;;  %v6377_v8 = vpop.f32.mrf.mxu1  ;;  %v6762_v22 = vmax.f32 %v6746_v63, 0.0 }
 0x34f   : > { %v6747_v20 = vadd.f32 %v11472_v57, %v6724_v42  ;;  %v6704_v40 = vadd.f32 %v8510_v59, %v6406_v24  ;;  %v6404_v30 = vadd.f32 %v6377_v8, %v5978_v47  ;;  %v6760_v11 = vmax.f32 %v6744_v19, 0.0 }
 0x350   : > { %7777 = vst [vmem:[%s11515_s21 + $0x10] sm:$0xff] %v7749_v7   ;;  %v6853_v48 = vadd.f32 %v6852_v0, %v6758_v35  ;;  %v6722_v61 = vmul.f32 %v11452_v43, %v6699_v25  ;;  %v8479_v37 = vpop.f32.mrf.mxu1 }
 0x351   : > { %v6763_v52 = vmax.f32 %v6747_v20, 0.0  ;;  %v6727_v50 = vmul.f32 %v11452_v43, %v6704_v40  ;;  %v6702_v33 = vadd.f32 %v6675_v36, %v6404_v30  ;;  %v6407_v32 = vadd.f32 %v8479_v37, %v5981_v34 }
 0x352   : > { %v6854_v15 = vadd.f32 %v6853_v48, %v6759_v5  ;;  %v6745_v58 = vadd.f32 %v11472_v57, %v6722_v61  ;;  %v6380_v9 = vpop.f32.mrf.mxu1 }
 0x353   : > { %v7764_v28 = vpack.c.bf16 %v6763_v52, %v6762_v22  ;;  %v6725_v1 = vmul.f32 %v11452_v43, %v6702_v33  ;;  %v6705_v41 = vadd.f32 %v8511_v29, %v6407_v32  ;;  %v6405_v13 = vadd.f32 %v6380_v9, %v5979_v56 }
 0x354   : > { %v6855_v17 = vadd.f32 %v6854_v15, %v6760_v11  ;;  %v6761_v12 = vmax.f32 %v6745_v58, 0.0  ;;  %v6750_v35 = vadd.f32 %v11472_v57, %v6727_v50 }
 0x355   : > { %7780 = vst [vmem:[%s11515_s21 + $0x28] sm:$0xff] %v7764_v28   ;;  %v6728_v49 = vmul.f32 %v11452_v43, %v6705_v41  ;;  %v6748_v16 = vadd.f32 %v11472_v57, %v6725_v1  ;;  %v6703_v59 = vadd.f32 %v6678_v21, %v6405_v13 }
 0x356   : > { %v7759_v6 = vpack.c.bf16 %v6761_v12, %v6760_v11  ;;  %v6856_v10 = vadd.f32 %v6855_v17, %v6761_v12  ;;  %v6766_v62 = vmax.f32 %v6750_v35, 0.0 }
 0x357   : > { %v6751_v14 = vadd.f32 %v11472_v57, %v6728_v49  ;;  %v6726_v3 = vmul.f32 %v11452_v43, %v6703_v59  ;;  %v6764_v60 = vmax.f32 %v6748_v16, 0.0 }
 0x358   : > { %7779 = vst [vmem:[%s11515_s21 + $0x20] sm:$0xff] %v7759_v6   ;;  %v6857_v5 = vadd.f32 %v6856_v10, %v6762_v22 }
 0x359   : > { %v6767_v27 = vmax.f32 %v6751_v14, 0.0  ;;  %v6749_v4 = vadd.f32 %v11472_v57, %v6726_v3 }
 0x35a   : > { %v6858_v39 = vadd.f32 %v6857_v5, %v6763_v52 }
 0x35b   : > { %v7774_v46 = vpack.c.bf16 %v6767_v27, %v6766_v62  ;;  %v6765_v31 = vmax.f32 %v6749_v4, 0.0 }
 0x35c   : > { %v6859_v54 = vadd.f32 %v6858_v39, %v6764_v60 }
 0x35d   : > { %7782 = vst [vmem:[%s11515_s21 + $0x38] sm:$0xff] %v7774_v46   ;;  %v7769_v26 = vpack.c.bf16 %v6765_v31, %v6764_v60 }
 0x35e   : > { %v6860_v44 = vadd.f32 %v6859_v54, %v6765_v31 }
 0x35f   : > { %7781 = vst [vmem:[%s11515_s21 + $0x30] sm:$0xff] %v7769_v26  }
 0x360   : > { %v6861_v23 = vadd.f32 %v6860_v44, %v6766_v62 }
 0x362   : > { %v6862_v38 = vadd.f32 %v6861_v23, %v6767_v27 }
 0x364   : > { %v6863_v63 = vrot.slane %v6862_v38, 4 }
 0x366   : > { %v6864_v43 = vadd.f32 %v6863_v63, %v6862_v38 }
 0x368   : > { %v6865_v55 = vrot.slane %v6864_v43, 2 }
 0x36a   : > { %v6866_v2 = vadd.f32 %v6865_v55, %v6864_v43 }
 0x36c   : > { %v6867_v36 = vrot.slane %v6866_v2, 1 }
 0x36e   : > { %v6868_v57 = vadd.f32 %v6867_v36, %v6866_v2 }
 0x370   : > { %6869 = vst [vmem:[%s347_s26] sm:$0x1] %v6868_v57 }
 0x371 PF: > { %s19_s9 = sadd.s32 1, %s8729_s9   ;;  %s11745_s27 = smov %s8721_s29 }
 0x372   : > { %p16_p8 = scmp.ge.s32.totalorder %s19_s9, 6   ;;  %s11746_s28 = smov %s8725_s30 }
 0x373   : > { %s11747_s29 = smov %s11750_s10  ;;  %s11748_s30 = smov %s11754_s11 }
 0x374   :  { %18 = sbr.rel (!%p16_p8) target bundleno = 3 (0x3), region = 111 }

</bundles_post_ra>
